<compile_context>
chip_gen: v5e
topology: v5e:2x2
jax: 0.10.0
libtpu: 0.0.40
codegen_flags: <defaults>
</compile_context>

<pallas_src>
import functools

import jax
import jax.numpy as jnp
from jax import lax
from jax.experimental import pallas as pl
from jax.experimental.pallas import tpu as pltpu

LANE = 128


def _round_up(n, m):
    return ((n + m - 1) // m) * m


def _silu(x):
    return x * jax.nn.sigmoid(x)


def bottleneck_kernel(xc_ref, xt_ref, xb_ref, w1_ref, b1_ref, w2_ref, b2_ref,
                      o_ref, y1_ref, col_ref, *, th, w, add):
    """One (batch, row-tile) grid step.

    xc_ref : (1, TH, W, C1p)   center rows of x (== this tile's output rows)
    xt_ref : (1, 1,  W, C1p)   row directly above the tile (clamped at border)
    xb_ref : (1, 1,  W, C1p)   row directly below the tile (clamped at border)
    w1_ref : (C1p, C_p)        1x1 weight, BN scale folded in
    b1_ref : (1, C_p)          folded BN bias of cv1
    w2_ref : (9*C_p, C2p)      3x3 weight, tap-major im2col layout, BN folded
    b2_ref : (1, C2p)          folded BN bias of cv2
    o_ref  : (1, TH, W, C2p)
    y1_ref : ((TH+2)*W, C_p)   VMEM scratch: cv1 output incl. 1-row halos
    col_ref: (TH*W, 9*C_p)     VMEM scratch: im2col slab for cv2
    """
    t = pl.program_id(1)
    nt = pl.num_programs(1)
    c1p = xc_ref.shape[-1]
    c_p = w1_ref.shape[-1]
    c2p = w2_ref.shape[-1]
    rows = th * w

    w1 = w1_ref[...]
    b1 = b1_ref[...]

    # ---- cv1 (1x1 conv + folded BN + SiLU) on the tile's own rows -----------
    xc = xc_ref[0].reshape(rows, c1p)
    yc = jnp.dot(xc, w1, preferred_element_type=jnp.float32) + b1
    y1_ref[w:w + rows, :] = _silu(yc)

    # ---- cv1 on the 1-row halos; zero them at the image border (SAME pad) ---
    yt = jnp.dot(xt_ref[0, 0], w1, preferred_element_type=jnp.float32) + b1
    y1_ref[0:w, :] = jnp.where(t > 0, _silu(yt), 0.0)

    yb = jnp.dot(xb_ref[0, 0], w1, preferred_element_type=jnp.float32) + b1
    y1_ref[(th + 1) * w:(th + 2) * w, :] = jnp.where(t < nt - 1, _silu(yb), 0.0)

    # ---- build the im2col slab (lane-aligned 128-wide column groups) --------
    cidx = lax.broadcasted_iota(jnp.int32, (rows, 1), 0) % w
    left_edge = cidx == 0
    right_edge = cidx == w - 1
    for kh in range(3):
        base = kh * w                       # row offset for dr = kh - 1 (aligned)
        for kw in range(3):
            dc = kw - 1
            slab = y1_ref[base:base + rows, :]
            if dc != 0:
                # +/-1 column shift == +/-1 flat-row shift; the wrapped rows
                # are exactly the out-of-image columns and are masked to zero.
                slab = pltpu.roll(slab, (-dc) % rows, axis=0)
                slab = jnp.where(right_edge if dc > 0 else left_edge, 0.0, slab)
            k = kh * 3 + kw
            col_ref[:, k * c_p:(k + 1) * c_p] = slab

    # ---- cv2: single MXU matmul over the 9*C_ contraction + BN bias + SiLU --
    y2 = jnp.dot(col_ref[...], w2_ref[...], preferred_element_type=jnp.float32)
    y2 = _silu(y2 + b2_ref[...])

    if add:                                 # residual (c1 == c2, same padding)
        y2 = y2 + xc.astype(jnp.float32)

    o_ref[0] = y2.reshape(th, w, c2p).astype(o_ref.dtype)


def bottleneck_pallas(x_nchw, params, shortcut=True, row_tile=None):
    """Bottleneck forward. Accepts / returns NCHW to match the PyTorch module.

    NOTE: a full-NHWC model should drop the two transposes below and chain
    Bottleneck blocks directly in NHWC; they are kept only for the standalone
    PyTorch-compatible interface of this example.
    """
    w1, s1, b1, w2, s2, b2 = params
    n, c1, h, w = x_nchw.shape
    c_ = w1.shape[1]
    c2 = w2.shape[-1]
    add = bool(shortcut and c1 == c2)

    c1p = _round_up(c1, LANE)
    c_p = _round_up(c_, LANE)
    c2p = _round_up(c2, LANE)

    if row_tile is None:
        # ~1024 spatial rows per tile keeps the matmul M dim large while the
        # VMEM working set stays bounded (halve this on v7x for big maps).
        target = max(1, 1024 // max(w, 1))
        row_tile = next(d for d in range(min(h, target), 0, -1) if h % d == 0)
    assert h % row_tile == 0, "row_tile must divide H"
    ht = h // row_tile

    f32 = jnp.float32
    # ---- fold BN scale into conv weights (one-time, host side) --------------
    w1f = w1.astype(f32) * s1.astype(f32)[None, :]                    # (c1, c_)
    w2f = w2.astype(f32) * s2.astype(f32)[None, None, None, :]        # (3,3,c_,c2)

    # ---- pad channels to lane width (zero pads are exact no-ops end-to-end) -
    w1p = jnp.zeros((c1p, c_p), f32).at[:c1, :c_].set(w1f)
    b1p = jnp.zeros((1, c_p), f32).at[0, :c_].set(b1.astype(f32))
    w2p = jnp.zeros((3, 3, c_p, c2p), f32).at[:, :, :c_, :c2].set(w2f)
    w2p = w2p.reshape(9 * c_p, c2p)                                   # tap-major
    b2p = jnp.zeros((1, c2p), f32).at[0, :c2].set(b2.astype(f32))

    x = jnp.transpose(x_nchw, (0, 2, 3, 1))                           # NCHW->NHWC
    xp = jnp.pad(x, ((0, 0), (0, 0), (0, 0), (0, c1p - c1)))

    kernel = functools.partial(bottleneck_kernel, th=row_tile, w=w, add=add)

    def center_map(i, t):
        return (i, t, 0, 0)

    def top_map(i, t):                       # row above the tile, clamped
        return (i, jnp.maximum(t * row_tile - 1, 0), 0, 0)

    def bot_map(i, t):                       # row below the tile, clamped
        return (i, jnp.minimum((t + 1) * row_tile, h - 1), 0, 0)

    def const_map(i, t):
        return (0, 0)

    out = pl.pallas_call(
        kernel,
        out_shape=jax.ShapeDtypeStruct((n, h, w, c2p), x.dtype),
        grid_spec=pltpu.PrefetchScalarGridSpec(
            num_scalar_prefetch=0,
            grid=(n, ht),
            in_specs=[
                pl.BlockSpec((1, row_tile, w, c1p), center_map),
                pl.BlockSpec((1, 1, w, c1p), top_map),
                pl.BlockSpec((1, 1, w, c1p), bot_map),
                pl.BlockSpec((c1p, c_p), const_map),
                pl.BlockSpec((1, c_p), const_map),
                pl.BlockSpec((9 * c_p, c2p), const_map),
                pl.BlockSpec((1, c2p), const_map),
            ],
            out_specs=pl.BlockSpec((1, row_tile, w, c2p), center_map),
            scratch_shapes=[
                pltpu.VMEM(((row_tile + 2) * w, c_p), f32),    # cv1 + halos
                pltpu.VMEM((row_tile * w, 9 * c_p), f32),      # im2col slab
            ],
        ),
        compiler_params=pltpu.CompilerParams(
            dimension_semantics=("parallel", "parallel"),
            # Safe everywhere (v5e default is only 16 MiB); re-derive tile size
            # + limit for v7x's 64 MiB physical VMEM when maps get large.
            vmem_limit_bytes=32 * 1024 * 1024,
        ),
    )(xp, xp, xp, w1p, b1p, w2p, b2p)

    out = out[..., :c2]                                               # drop pad
    return jnp.transpose(out, (0, 3, 1, 2))                           # NHWC->NCHW


def bottleneck_ref(x_nchw, params, shortcut=True):
    """Pure-JAX reference (lax conv) for correctness check."""
    w1, s1, b1, w2, s2, b2 = params
    x = jnp.transpose(x_nchw, (0, 2, 3, 1))
    dn = ('NHWC', 'HWIO', 'NHWC')
    y1 = lax.conv_general_dilated(x, w1.reshape(1, 1, *w1.shape), (1, 1),
                                  'SAME', dimension_numbers=dn)
    y1 = _silu(y1 * s1 + b1)
    y2 = lax.conv_general_dilated(y1, w2, (1, 1), 'SAME', dimension_numbers=dn)
    y2 = _silu(y2 * s2 + b2)
    out = x + y2 if (shortcut and x.shape[-1] == y2.shape[-1]) else y2
    return jnp.transpose(out, (0, 3, 1, 2))


def init_params(key, c1, c2, e=0.5):
    """Deterministic synthetic weights; BN folded to scale/bias (eval mode)."""
    c_ = int(c2 * e)
    ks = jax.random.split(key, 10)
    eps = 1e-5

    w1 = 0.1 * jax.random.normal(ks[0], (c1, c_), jnp.float32)          # 1x1, (I,O)
    g1 = 1.0 + 0.1 * jax.random.normal(ks[1], (c_,), jnp.float32)
    be1 = 0.1 * jax.random.normal(ks[2], (c_,), jnp.float32)
    m1 = 0.1 * jax.random.normal(ks[3], (c_,), jnp.float32)
    v1 = jnp.abs(jax.random.normal(ks[4], (c_,), jnp.float32)) + 0.5
    s1 = g1 / jnp.sqrt(v1 + eps)
    b1 = be1 - m1 * s1

    w2 = 0.1 * jax.random.normal(ks[5], (3, 3, c_, c2), jnp.float32)    # HWIO
    g2 = 1.0 + 0.1 * jax.random.normal(ks[6], (c2,), jnp.float32)
    be2 = 0.1 * jax.random.normal(ks[7], (c2,), jnp.float32)
    m2 = 0.1 * jax.random.normal(ks[8], (c2,), jnp.float32)
    v2 = jnp.abs(jax.random.normal(ks[9], (c2,), jnp.float32)) + 0.5
    s2 = g2 / jnp.sqrt(v2 + eps)
    b2 = be2 - m2 * s2

    return (w1, s1, b1, w2, s2, b2)


if __name__ == "__main__":
    key = jax.random.PRNGKey(0)
    kx, kp = jax.random.split(key)

    n, c1, h, w = 2, 4, 16, 16
    c2 = 4                                    # shortcut active (c1 == c2)
    x = jax.random.normal(kx, (n, c1, h, w), jnp.float32)
    params = init_params(kp, c1, c2, e=0.5)

    out = bottleneck_pallas(x, params, shortcut=True, row_tile=8)
    out = jax.block_until_ready(out)

    ref = jax.block_until_ready(bottleneck_ref(x, params, shortcut=True))
    assert out.shape == (n, c2, h, w)
    err = jnp.max(jnp.abs(out - ref))
    assert jnp.allclose(out, ref, atol=1e-4, rtol=1e-4), f"max abs err {err}"

    print("KERNEL_OK")
</pallas_src>

<mosaic_0001>
module attributes {stable_mosaic.version = 11 : i64} {
  func.func @bottleneck_kernel(%arg0: i32, %arg1: i32, %arg2: memref<1x8x16x128xf32, #tpu.memory_space<vmem>>, %arg3: memref<1x1x16x128xf32, #tpu.memory_space<vmem>>, %arg4: memref<1x1x16x128xf32, #tpu.memory_space<vmem>>, %arg5: memref<128x128xf32, #tpu.memory_space<vmem>>, %arg6: memref<1x128xf32, #tpu.memory_space<vmem>>, %arg7: memref<1152x128xf32, #tpu.memory_space<vmem>>, %arg8: memref<1x128xf32, #tpu.memory_space<vmem>>, %arg9: memref<1x8x16x128xf32, #tpu.memory_space<vmem>>, %arg10: memref<160x128xf32, #tpu.memory_space<vmem>>, %arg11: memref<128x1152xf32, #tpu.memory_space<vmem>>) attributes {dimension_semantics = [#tpu.dimension_semantics<parallel>, #tpu.dimension_semantics<parallel>], iteration_bounds = array<i64: 2, 2>, scalar_prefetch = 0 : i64, scratch_operands = 2 : i64, tpu.core_type = #tpu.core_type<tc>, window_params = [{transform_indices = @transform_0, window_bounds = array<i64: 1, 8, 16, 128>}, {transform_indices = @transform_1, window_bounds = array<i64: 1, 1, 16, 128>}, {transform_indices = @transform_2, window_bounds = array<i64: 1, 1, 16, 128>}, {pipeline_mode = #tpu.pipeline_mode<synchronous>, transform_indices = @transform_3, window_bounds = array<i64: 128, 128>}, {pipeline_mode = #tpu.pipeline_mode<synchronous>, transform_indices = @transform_4, window_bounds = array<i64: 1, 128>}, {pipeline_mode = #tpu.pipeline_mode<synchronous>, transform_indices = @transform_5, window_bounds = array<i64: 1152, 128>}, {pipeline_mode = #tpu.pipeline_mode<synchronous>, transform_indices = @transform_6, window_bounds = array<i64: 1, 128>}, {transform_indices = @transform_7, window_bounds = array<i64: 1, 8, 16, 128>}]} {
    %c0 = arith.constant 0 : index
    %c0_0 = arith.constant 0 : index
    %0 = vector.load %arg5[%c0, %c0_0] : memref<128x128xf32, #tpu.memory_space<vmem>>, vector<128x128xf32>
    %c0_1 = arith.constant 0 : index
    %c0_2 = arith.constant 0 : index
    %1 = vector.load %arg6[%c0_1, %c0_2] : memref<1x128xf32, #tpu.memory_space<vmem>>, vector<1x128xf32>
    %c0_3 = arith.constant 0 : index
    %c0_4 = arith.constant 0 : index
    %c0_5 = arith.constant 0 : index
    %c0_6 = arith.constant 0 : index
    %2 = vector.load %arg2[%c0_3, %c0_4, %c0_5, %c0_6] : memref<1x8x16x128xf32, #tpu.memory_space<vmem>>, vector<1x8x16x128xf32>
    %3 = vector.shape_cast %2 : vector<1x8x16x128xf32> to vector<8x16x128xf32>
    %4 = vector.shape_cast %3 : vector<8x16x128xf32> to vector<128x128xf32>
    %cst = arith.constant dense<0.000000e+00> : vector<128x128xf32>
    %5 = tpu.matmul %4, %0, %cst {dimension_numbers = #tpu.dot_dimension_numbers<[1], [0], [0], [1], [0, 0, 1, 1], [], []>} : vector<128x128xf32>, vector<128x128xf32>, vector<128x128xf32> -> vector<128x128xf32>
    %6 = vector.broadcast %1 : vector<1x128xf32> to vector<128x128xf32>
    %7 = arith.addf %5, %6 : vector<128x128xf32>
    %8 = arith.negf %7 : vector<128x128xf32>
    %9 = math.exp %8 : vector<128x128xf32>
    %cst_7 = arith.constant 1.000000e+00 : f32
    %10 = vector.broadcast %cst_7 : f32 to vector<128x128xf32>
    %11 = arith.addf %10, %9 : vector<128x128xf32>
    %12 = arith.divf %10, %11 : vector<128x128xf32>
    %13 = arith.mulf %7, %12 : vector<128x128xf32>
    %c16 = arith.constant 16 : index
    %c0_8 = arith.constant 0 : index
    %14 = vector.load %arg10[%c16, %c0_8] : memref<160x128xf32, #tpu.memory_space<vmem>>, vector<128x128xf32>
    tpu.vector_store %arg10[%c16, %c0_8], %13 {strides = array<i32>} : memref<160x128xf32, #tpu.memory_space<vmem>>, vector<128x128xf32>,
    %c0_9 = arith.constant 0 : index
    %c0_10 = arith.constant 0 : index
    %c0_11 = arith.constant 0 : index
    %c0_12 = arith.constant 0 : index
    %15 = vector.load %arg3[%c0_9, %c0_10, %c0_11, %c0_12] : memref<1x1x16x128xf32, #tpu.memory_space<vmem>>, vector<1x1x16x128xf32>
    %16 = vector.shape_cast %15 : vector<1x1x16x128xf32> to vector<16x128xf32>
    %cst_13 = arith.constant dense<0.000000e+00> : vector<16x128xf32>
    %17 = tpu.matmul %16, %0, %cst_13 {dimension_numbers = #tpu.dot_dimension_numbers<[1], [0], [0], [1], [0, 0, 1, 1], [], []>} : vector<16x128xf32>, vector<128x128xf32>, vector<16x128xf32> -> vector<16x128xf32>
    %18 = vector.broadcast %1 : vector<1x128xf32> to vector<16x128xf32>
    %19 = arith.addf %17, %18 : vector<16x128xf32>
    %c0_i32 = arith.constant 0 : i32
    %20 = arith.cmpi sgt, %arg1, %c0_i32 : i32
    %21 = arith.negf %19 : vector<16x128xf32>
    %22 = math.exp %21 : vector<16x128xf32>
    %cst_14 = arith.constant 1.000000e+00 : f32
    %23 = vector.broadcast %cst_14 : f32 to vector<16x128xf32>
    %24 = arith.addf %23, %22 : vector<16x128xf32>
    %25 = arith.divf %23, %24 : vector<16x128xf32>
    %26 = arith.mulf %19, %25 : vector<16x128xf32>
    %cst_15 = arith.constant 0.000000e+00 : f32
    %27 = vector.broadcast %cst_15 : f32 to vector<16x128xf32>
    %28 = arith.select %20, %26, %27 : vector<16x128xf32>
    %c0_16 = arith.constant 0 : index
    %c0_17 = arith.constant 0 : index
    %29 = vector.load %arg10[%c0_16, %c0_17] : memref<160x128xf32, #tpu.memory_space<vmem>>, vector<16x128xf32>
    tpu.vector_store %arg10[%c0_16, %c0_17], %28 {strides = array<i32>} : memref<160x128xf32, #tpu.memory_space<vmem>>, vector<16x128xf32>,
    %c0_18 = arith.constant 0 : index
    %c0_19 = arith.constant 0 : index
    %c0_20 = arith.constant 0 : index
    %c0_21 = arith.constant 0 : index
    %30 = vector.load %arg4[%c0_18, %c0_19, %c0_20, %c0_21] : memref<1x1x16x128xf32, #tpu.memory_space<vmem>>, vector<1x1x16x128xf32>
    %31 = vector.shape_cast %30 : vector<1x1x16x128xf32> to vector<16x128xf32>
    %cst_22 = arith.constant dense<0.000000e+00> : vector<16x128xf32>
    %32 = tpu.matmul %31, %0, %cst_22 {dimension_numbers = #tpu.dot_dimension_numbers<[1], [0], [0], [1], [0, 0, 1, 1], [], []>} : vector<16x128xf32>, vector<128x128xf32>, vector<16x128xf32> -> vector<16x128xf32>
    %33 = vector.broadcast %1 : vector<1x128xf32> to vector<16x128xf32>
    %34 = arith.addf %32, %33 : vector<16x128xf32>
    %c1_i32 = arith.constant 1 : i32
    %35 = arith.cmpi slt, %arg1, %c1_i32 : i32
    %36 = arith.negf %34 : vector<16x128xf32>
    %37 = math.exp %36 : vector<16x128xf32>
    %cst_23 = arith.constant 1.000000e+00 : f32
    %38 = vector.broadcast %cst_23 : f32 to vector<16x128xf32>
    %39 = arith.addf %38, %37 : vector<16x128xf32>
    %40 = arith.divf %38, %39 : vector<16x128xf32>
    %41 = arith.mulf %34, %40 : vector<16x128xf32>
    %cst_24 = arith.constant 0.000000e+00 : f32
    %42 = vector.broadcast %cst_24 : f32 to vector<16x128xf32>
    %43 = arith.select %35, %41, %42 : vector<16x128xf32>
    %c144 = arith.constant 144 : index
    %c0_25 = arith.constant 0 : index
    %44 = vector.load %arg10[%c144, %c0_25] : memref<160x128xf32, #tpu.memory_space<vmem>>, vector<16x128xf32>
    tpu.vector_store %arg10[%c144, %c0_25], %43 {strides = array<i32>} : memref<160x128xf32, #tpu.memory_space<vmem>>, vector<16x128xf32>,
    %45 = tpu.iota {dimensions = array<i32: 0>} : vector<128x1xi32>
    %c16_i32 = arith.constant 16 : i32
    %c0_i32_26 = arith.constant 0 : i32
    %46 = arith.cmpi eq, %c16_i32, %c0_i32_26 : i32
    %c1_i32_27 = arith.constant 1 : i32
    %47 = arith.select %46, %c1_i32_27, %c16_i32 : i32
    %48 = vector.broadcast %47 : i32 to vector<128x1xi32>
    %49 = arith.remsi %45, %48 : vector<128x1xi32>
    %c0_i32_28 = arith.constant 0 : i32
    %50 = vector.broadcast %c0_i32_28 : i32 to vector<128x1xi32>
    %51 = arith.cmpi ne, %49, %50 : vector<128x1xi32>
    %c0_i32_29 = arith.constant 0 : i32
    %52 = vector.broadcast %c0_i32_29 : i32 to vector<128x1xi32>
    %53 = arith.cmpi slt, %49, %52 : vector<128x1xi32>
    %c0_i32_30 = arith.constant 0 : i32
    %54 = arith.cmpi slt, %47, %c0_i32_30 : i32
    %55 = vector.broadcast %54 : i1 to vector<128x1xi1>
    %56 = vector.broadcast %55 : vector<128x1xi1> to vector<128x1xi1>
    %57 = arith.xori %53, %56 : vector<128x1xi1>
    %58 = arith.andi %57, %51 : vector<128x1xi1>
    %59 = vector.broadcast %47 : i32 to vector<128x1xi32>
    %60 = arith.addi %49, %59 : vector<128x1xi32>
    %61 = arith.select %58, %60, %49 : vector<128x1xi1>, vector<128x1xi32>
    %c0_i32_31 = arith.constant 0 : i32
    %62 = vector.broadcast %c0_i32_31 : i32 to vector<128x1xi32>
    %63 = arith.cmpi eq, %61, %62 : vector<128x1xi32>
    %c15_i32 = arith.constant 15 : i32
    %64 = vector.broadcast %c15_i32 : i32 to vector<128x1xi32>
    %65 = arith.cmpi eq, %61, %64 : vector<128x1xi32>
    %c0_32 = arith.constant 0 : index
    %c0_33 = arith.constant 0 : index
    %66 = vector.load %arg10[%c0_32, %c0_33] : memref<160x128xf32, #tpu.memory_space<vmem>>, vector<128x128xf32>
    %c1_i32_34 = arith.constant 1 : i32
    %67 = tpu.dynamic_rotate %66 by %c1_i32_34 dim 0 : vector<128x128xf32>, i32 -> vector<128x128xf32>
    %cst_35 = arith.constant 0.000000e+00 : f32
    %68 = vector.shape_cast %63 : vector<128x1xi1> to vector<128x1xi1>
    %69 = vector.broadcast %68 : vector<128x1xi1> to vector<128x128xi1>
    %70 = vector.broadcast %cst_35 : f32 to vector<128x128xf32>
    %71 = arith.select %69, %70, %67 : vector<128x128xi1>, vector<128x128xf32>
    %c0_36 = arith.constant 0 : index
    %c0_37 = arith.constant 0 : index
    %72 = vector.load %arg11[%c0_36, %c0_37] : memref<128x1152xf32, #tpu.memory_space<vmem>>, vector<128x128xf32>
    tpu.vector_store %arg11[%c0_36, %c0_37], %71 {strides = array<i32>} : memref<128x1152xf32, #tpu.memory_space<vmem>>, vector<128x128xf32>,
    %c0_38 = arith.constant 0 : index
    %c0_39 = arith.constant 0 : index
    %73 = vector.load %arg10[%c0_38, %c0_39] : memref<160x128xf32, #tpu.memory_space<vmem>>, vector<128x128xf32>
    %c0_40 = arith.constant 0 : index
    %c128 = arith.constant 128 : index
    %74 = vector.load %arg11[%c0_40, %c128] : memref<128x1152xf32, #tpu.memory_space<vmem>>, vector<128x128xf32>
    tpu.vector_store %arg11[%c0_40, %c128], %73 {strides = array<i32>} : memref<128x1152xf32, #tpu.memory_space<vmem>>, vector<128x128xf32>,
    %c0_41 = arith.constant 0 : index
    %c0_42 = arith.constant 0 : index
    %75 = vector.load %arg10[%c0_41, %c0_42] : memref<160x128xf32, #tpu.memory_space<vmem>>, vector<128x128xf32>
    %c127_i32 = arith.constant 127 : i32
    %76 = tpu.dynamic_rotate %75 by %c127_i32 dim 0 : vector<128x128xf32>, i32 -> vector<128x128xf32>
    %cst_43 = arith.constant 0.000000e+00 : f32
    %77 = vector.shape_cast %65 : vector<128x1xi1> to vector<128x1xi1>
    %78 = vector.broadcast %77 : vector<128x1xi1> to vector<128x128xi1>
    %79 = vector.broadcast %cst_43 : f32 to vector<128x128xf32>
    %80 = arith.select %78, %79, %76 : vector<128x128xi1>, vector<128x128xf32>
    %c0_44 = arith.constant 0 : index
    %c256 = arith.constant 256 : index
    %81 = vector.load %arg11[%c0_44, %c256] : memref<128x1152xf32, #tpu.memory_space<vmem>>, vector<128x128xf32>
    tpu.vector_store %arg11[%c0_44, %c256], %80 {strides = array<i32>} : memref<128x1152xf32, #tpu.memory_space<vmem>>, vector<128x128xf32>,
    %c16_45 = arith.constant 16 : index
    %c0_46 = arith.constant 0 : index
    %82 = vector.load %arg10[%c16_45, %c0_46] : memref<160x128xf32, #tpu.memory_space<vmem>>, vector<128x128xf32>
    %c1_i32_47 = arith.constant 1 : i32
    %83 = tpu.dynamic_rotate %82 by %c1_i32_47 dim 0 : vector<128x128xf32>, i32 -> vector<128x128xf32>
    %cst_48 = arith.constant 0.000000e+00 : f32
    %84 = vector.shape_cast %63 : vector<128x1xi1> to vector<128x1xi1>
    %85 = vector.broadcast %84 : vector<128x1xi1> to vector<128x128xi1>
    %86 = vector.broadcast %cst_48 : f32 to vector<128x128xf32>
    %87 = arith.select %85, %86, %83 : vector<128x128xi1>, vector<128x128xf32>
    %c0_49 = arith.constant 0 : index
    %c384 = arith.constant 384 : index
    %88 = vector.load %arg11[%c0_49, %c384] : memref<128x1152xf32, #tpu.memory_space<vmem>>, vector<128x128xf32>
    tpu.vector_store %arg11[%c0_49, %c384], %87 {strides = array<i32>} : memref<128x1152xf32, #tpu.memory_space<vmem>>, vector<128x128xf32>,
    %c16_50 = arith.constant 16 : index
    %c0_51 = arith.constant 0 : index
    %89 = vector.load %arg10[%c16_50, %c0_51] : memref<160x128xf32, #tpu.memory_space<vmem>>, vector<128x128xf32>
    %c0_52 = arith.constant 0 : index
    %c512 = arith.constant 512 : index
    %90 = vector.load %arg11[%c0_52, %c512] : memref<128x1152xf32, #tpu.memory_space<vmem>>, vector<128x128xf32>
    tpu.vector_store %arg11[%c0_52, %c512], %89 {strides = array<i32>} : memref<128x1152xf32, #tpu.memory_space<vmem>>, vector<128x128xf32>,
    %c16_53 = arith.constant 16 : index
    %c0_54 = arith.constant 0 : index
    %91 = vector.load %arg10[%c16_53, %c0_54] : memref<160x128xf32, #tpu.memory_space<vmem>>, vector<128x128xf32>
    %c127_i32_55 = arith.constant 127 : i32
    %92 = tpu.dynamic_rotate %91 by %c127_i32_55 dim 0 : vector<128x128xf32>, i32 -> vector<128x128xf32>
    %cst_56 = arith.constant 0.000000e+00 : f32
    %93 = vector.shape_cast %65 : vector<128x1xi1> to vector<128x1xi1>
    %94 = vector.broadcast %93 : vector<128x1xi1> to vector<128x128xi1>
    %95 = vector.broadcast %cst_56 : f32 to vector<128x128xf32>
    %96 = arith.select %94, %95, %92 : vector<128x128xi1>, vector<128x128xf32>
    %c0_57 = arith.constant 0 : index
    %c640 = arith.constant 640 : index
    %97 = vector.load %arg11[%c0_57, %c640] : memref<128x1152xf32, #tpu.memory_space<vmem>>, vector<128x128xf32>
    tpu.vector_store %arg11[%c0_57, %c640], %96 {strides = array<i32>} : memref<128x1152xf32, #tpu.memory_space<vmem>>, vector<128x128xf32>,
    %c32 = arith.constant 32 : index
    %c0_58 = arith.constant 0 : index
    %98 = vector.load %arg10[%c32, %c0_58] : memref<160x128xf32, #tpu.memory_space<vmem>>, vector<128x128xf32>
    %c1_i32_59 = arith.constant 1 : i32
    %99 = tpu.dynamic_rotate %98 by %c1_i32_59 dim 0 : vector<128x128xf32>, i32 -> vector<128x128xf32>
    %cst_60 = arith.constant 0.000000e+00 : f32
    %100 = vector.shape_cast %63 : vector<128x1xi1> to vector<128x1xi1>
    %101 = vector.broadcast %100 : vector<128x1xi1> to vector<128x128xi1>
    %102 = vector.broadcast %cst_60 : f32 to vector<128x128xf32>
    %103 = arith.select %101, %102, %99 : vector<128x128xi1>, vector<128x128xf32>
    %c0_61 = arith.constant 0 : index
    %c768 = arith.constant 768 : index
    %104 = vector.load %arg11[%c0_61, %c768] : memref<128x1152xf32, #tpu.memory_space<vmem>>, vector<128x128xf32>
    tpu.vector_store %arg11[%c0_61, %c768], %103 {strides = array<i32>} : memref<128x1152xf32, #tpu.memory_space<vmem>>, vector<128x128xf32>,
    %c32_62 = arith.constant 32 : index
    %c0_63 = arith.constant 0 : index
    %105 = vector.load %arg10[%c32_62, %c0_63] : memref<160x128xf32, #tpu.memory_space<vmem>>, vector<128x128xf32>
    %c0_64 = arith.constant 0 : index
    %c896 = arith.constant 896 : index
    %106 = vector.load %arg11[%c0_64, %c896] : memref<128x1152xf32, #tpu.memory_space<vmem>>, vector<128x128xf32>
    tpu.vector_store %arg11[%c0_64, %c896], %105 {strides = array<i32>} : memref<128x1152xf32, #tpu.memory_space<vmem>>, vector<128x128xf32>,
    %c32_65 = arith.constant 32 : index
    %c0_66 = arith.constant 0 : index
    %107 = vector.load %arg10[%c32_65, %c0_66] : memref<160x128xf32, #tpu.memory_space<vmem>>, vector<128x128xf32>
    %c127_i32_67 = arith.constant 127 : i32
    %108 = tpu.dynamic_rotate %107 by %c127_i32_67 dim 0 : vector<128x128xf32>, i32 -> vector<128x128xf32>
    %cst_68 = arith.constant 0.000000e+00 : f32
    %109 = vector.shape_cast %65 : vector<128x1xi1> to vector<128x1xi1>
    %110 = vector.broadcast %109 : vector<128x1xi1> to vector<128x128xi1>
    %111 = vector.broadcast %cst_68 : f32 to vector<128x128xf32>
    %112 = arith.select %110, %111, %108 : vector<128x128xi1>, vector<128x128xf32>
    %c0_69 = arith.constant 0 : index
    %c1024 = arith.constant 1024 : index
    %113 = vector.load %arg11[%c0_69, %c1024] : memref<128x1152xf32, #tpu.memory_space<vmem>>, vector<128x128xf32>
    tpu.vector_store %arg11[%c0_69, %c1024], %112 {strides = array<i32>} : memref<128x1152xf32, #tpu.memory_space<vmem>>, vector<128x128xf32>,
    %c0_70 = arith.constant 0 : index
    %c0_71 = arith.constant 0 : index
    %114 = vector.load %arg11[%c0_70, %c0_71] : memref<128x1152xf32, #tpu.memory_space<vmem>>, vector<128x1152xf32>
    %c0_72 = arith.constant 0 : index
    %c0_73 = arith.constant 0 : index
    %115 = vector.load %arg7[%c0_72, %c0_73] : memref<1152x128xf32, #tpu.memory_space<vmem>>, vector<1152x128xf32>
    %cst_74 = arith.constant dense<0.000000e+00> : vector<128x128xf32>
    %116 = tpu.matmul %114, %115, %cst_74 {dimension_numbers = #tpu.dot_dimension_numbers<[1], [0], [0], [1], [0, 0, 1, 1], [], []>} : vector<128x1152xf32>, vector<1152x128xf32>, vector<128x128xf32> -> vector<128x128xf32>
    %c0_75 = arith.constant 0 : index
    %c0_76 = arith.constant 0 : index
    %117 = vector.load %arg8[%c0_75, %c0_76] : memref<1x128xf32, #tpu.memory_space<vmem>>, vector<1x128xf32>
    %118 = vector.broadcast %117 : vector<1x128xf32> to vector<128x128xf32>
    %119 = arith.addf %116, %118 : vector<128x128xf32>
    %120 = arith.negf %119 : vector<128x128xf32>
    %121 = math.exp %120 : vector<128x128xf32>
    %cst_77 = arith.constant 1.000000e+00 : f32
    %122 = vector.broadcast %cst_77 : f32 to vector<128x128xf32>
    %123 = arith.addf %122, %121 : vector<128x128xf32>
    %124 = arith.divf %122, %123 : vector<128x128xf32>
    %125 = arith.mulf %119, %124 : vector<128x128xf32>
    %126 = arith.addf %125, %4 : vector<128x128xf32>
    %127 = vector.shape_cast %126 : vector<128x128xf32> to vector<8x16x128xf32>
    %c0_78 = arith.constant 0 : index
    %c0_79 = arith.constant 0 : index
    %c0_80 = arith.constant 0 : index
    %c0_81 = arith.constant 0 : index
    %128 = vector.load %arg9[%c0_78, %c0_79, %c0_80, %c0_81] : memref<1x8x16x128xf32, #tpu.memory_space<vmem>>, vector<1x8x16x128xf32>
    %129 = vector.shape_cast %128 : vector<1x8x16x128xf32> to vector<8x16x128xf32>
    %130 = vector.shape_cast %127 : vector<8x16x128xf32> to vector<1x8x16x128xf32>
    tpu.vector_store %arg9[%c0_78, %c0_79, %c0_80, %c0_81], %130 {strides = array<i32>} : memref<1x8x16x128xf32, #tpu.memory_space<vmem>>, vector<1x8x16x128xf32>,
    return
  }
  func.func @transform_0(%arg0: i32, %arg1: i32) -> (i32, i32, i32, i32) {
    %c0_i32 = arith.constant 0 : i32
    %c0_i32_0 = arith.constant 0 : i32
    %c0_i32_1 = arith.constant 0 : i32
    return %arg0, %arg1, %c0_i32, %c0_i32_0 : i32, i32, i32, i32
  }
  func.func @transform_1(%arg0: i32, %arg1: i32) -> (i32, i32, i32, i32) {
    %c8_i32 = arith.constant 8 : i32
    %0 = arith.muli %arg1, %c8_i32 : i32
    %c1_i32 = arith.constant 1 : i32
    %1 = arith.subi %0, %c1_i32 : i32
    %c0_i32 = arith.constant 0 : i32
    %2 = arith.maxsi %1, %c0_i32 : i32
    %c0_i32_0 = arith.constant 0 : i32
    %c0_i32_1 = arith.constant 0 : i32
    %c0_i32_2 = arith.constant 0 : i32
    return %arg0, %2, %c0_i32_0, %c0_i32_1 : i32, i32, i32, i32
  }
  func.func @transform_2(%arg0: i32, %arg1: i32) -> (i32, i32, i32, i32) {
    %c1_i32 = arith.constant 1 : i32
    %0 = arith.addi %arg1, %c1_i32 : i32
    %c8_i32 = arith.constant 8 : i32
    %1 = arith.muli %0, %c8_i32 : i32
    %c15_i32 = arith.constant 15 : i32
    %2 = arith.minsi %1, %c15_i32 : i32
    %c0_i32 = arith.constant 0 : i32
    %c0_i32_0 = arith.constant 0 : i32
    %c0_i32_1 = arith.constant 0 : i32
    return %arg0, %2, %c0_i32, %c0_i32_0 : i32, i32, i32, i32
  }
  func.func @transform_3(%arg0: i32, %arg1: i32) -> (i32, i32) {
    %c0_i32 = arith.constant 0 : i32
    %c0_i32_0 = arith.constant 0 : i32
    %c0_i32_1 = arith.constant 0 : i32
    return %c0_i32, %c0_i32_0 : i32, i32
  }
  func.func @transform_4(%arg0: i32, %arg1: i32) -> (i32, i32) {
    %c0_i32 = arith.constant 0 : i32
    %c0_i32_0 = arith.constant 0 : i32
    %c0_i32_1 = arith.constant 0 : i32
    return %c0_i32, %c0_i32_0 : i32, i32
  }
  func.func @transform_5(%arg0: i32, %arg1: i32) -> (i32, i32) {
    %c0_i32 = arith.constant 0 : i32
    %c0_i32_0 = arith.constant 0 : i32
    %c0_i32_1 = arith.constant 0 : i32
    return %c0_i32, %c0_i32_0 : i32, i32
  }
  func.func @transform_6(%arg0: i32, %arg1: i32) -> (i32, i32) {
    %c0_i32 = arith.constant 0 : i32
    %c0_i32_0 = arith.constant 0 : i32
    %c0_i32_1 = arith.constant 0 : i32
    return %c0_i32, %c0_i32_0 : i32, i32
  }
  func.func @transform_7(%arg0: i32, %arg1: i32) -> (i32, i32, i32, i32) {
    %c0_i32 = arith.constant 0 : i32
    %c0_i32_0 = arith.constant 0 : i32
    %c0_i32_1 = arith.constant 0 : i32
    return %arg0, %arg1, %c0_i32, %c0_i32_0 : i32, i32, i32, i32
  }
}

</mosaic_0001>

<bundles_post_ra>
// kernel: tpu_custom_call.1
= control target key start
LH: loop header
LB: loop body
LE: loop exit
PB: predicated region body
PF: predicated region fallthrough
CT: control target
= control target key end

     0   :  { %s6296_s0 = inlined_call_operand.hbm [shape: f32[2,16,16,128], index: 0, kind: input, shape index: {}]   ;;  %s6297_s1 = inlined_call_operand.hbm [shape: f32[2,16,16,128], index: 1, kind: input, shape index: {}]   ;;  %s6298_s2 = inlined_call_operand.hbm [shape: f32[2,16,16,128], index: 2, kind: input, shape index: {}]   ;;  %s6299_s3 = inlined_call_operand.hbm [shape: f32[128,128], index: 3, kind: input, shape index: {}]   ;;  %s6300_s4 = inlined_call_operand.vmem [shape: f32[1,128], index: 4, kind: input, shape index: {}]   ;;  %s6301_s5 = inlined_call_operand.hbm [shape: f32[1152,128], index: 5, kind: input, shape index: {}]   ;;  %s6302_s6 = inlined_call_operand.vmem [shape: f32[1,128], index: 6, kind: input, shape index: {}]   ;;  %s6303_s7 = inlined_call_operand.hbm [shape: f32[2,16,16,128], index: 7, kind: output, shape index: {}]  }
   0x1   :  { %6358 = sst [smem:[#allocation57_spill]] %s6296_s0 }
   0x2   :  { %6359 = sst [smem:[#allocation58_spill]] %s6297_s1 }
   0x3   :  { %6360 = sst [smem:[#allocation59_spill]] %s6298_s2 }
   0x4   :  { %6361 = sst [smem:[#allocation60_spill]] %s6299_s3 }
   0x5   :  { %6362 = sst [smem:[#allocation61_spill]] %s6300_s4 }
   0x6   :  { %6363 = sst [smem:[#allocation62_spill]] %s6301_s5 }
   0x7   :  { %6364 = sst [smem:[#allocation63_spill]] %s6302_s6 }
   0x8   :  { %6365 = sst [smem:[#allocation64_spill]] %s6303_s7 }
   0x9   :  { %12 = vsyncpa [#allocation5], 0 }
   0xa   :  { %14 = vsyncpa [#allocation5 + $0x1], 0 }
   0xb   :  { %15 = vsyncpa [#allocation8], 0 }
   0xc   :  { %17 = vsyncpa [#allocation8 + $0x1], 0 }
   0xd   :  { %18 = vsyncpa [#allocation11], 0 }
   0xe   :  { %19 = vsyncpa [#allocation6], 0 }
   0xf   :  { %21 = vsyncpa [#allocation6 + $0x1], 0  ;;  %s4260_s24 = smov 0   ;;  %s4262_s25 = smov 0  }
  0x10   :  { %s4264_s26 = smov 0   ;;  %s4266_s27 = smov 0  }
  0x11   :  { %s4268_s28 = smov 0   ;;  %s4270_s29 = smov 0  }
  0x12   :  { %s4272_s30 = smov 0   ;;  %s4274_s8 = smov 0  }
  0x13   :  { %s4276_s9 = smov 0   ;;  %s4278_s10 = smov 0  }
  0x14   :  { %s4280_s11 = smov 0   ;;  %s4282_s12 = smov 0  }
  0x15   :  { %s4284_s13 = smov 0   ;;  %s4286_s14 = smov 0  }
  0x16 LB: > { %6366 = sst [smem:[#allocation19_spill]] %s4176_s28  ;;  %s4331_s15 = sadd.s32 4294967295, %s4212_s14   ;;  %s4212_s14 = sphi %s4286_s14, %s27_s14   ;;  %s4208_s13 = sphi %s4284_s13, %s6574_s13   ;;  %s4204_s12 = sphi %s4282_s12, %s6573_s12   ;;  %s4200_s11 = sphi %s4280_s11, %s6572_s11   ;;  %s4196_s10 = sphi %s4278_s10, %s6571_s10   ;;  %s4192_s9 = sphi %s4276_s9, %s6570_s9   ;;  %s4188_s8 = sphi %s4274_s8, %s6579_s8   ;;  %s4184_s30 = sphi %s4272_s30, %s6578_s30   ;;  %s4180_s29 = sphi %s4270_s29, %s6568_s29   ;;  %s4176_s28 = sphi %s4268_s28, %s6567_s28   ;;  %s4172_s27 = sphi %s4266_s27, %s6566_s27   ;;  %s4168_s26 = sphi %s4264_s26, %s6577_s26   ;;  %s4164_s25 = sphi %s4262_s25, %s6576_s25   ;;  %s4160_s24 = sphi %s4260_s24, %s6575_s24  }
  0x17   : > { %6367 = sst [smem:[#allocation20_spill]] %s4180_s29  ;;  %p3354_p0 = scmp.ge.s32.totalorder %s4212_s14, 1 }
  0x18   : > { %6368 = sst [smem:[#allocation21_spill]] %s4192_s9  ;;  %p62_p1 = scmp.eq.s32.totalorder %s4331_s15, 0 }
  0x19   : > { %6369 = sst [smem:[#allocation22_spill]] %s4196_s10  ;;  %p256_p2 = scmp.lt.s32.totalorder %s4212_s14, 5 }
  0x1a   : > { %6370 = sst [smem:[#allocation23_spill]] %s4200_s11  ;;  %s4214_s20 = smov [#allocation10]  }
  0x1b   : > { %6371 = sst [smem:[#allocation24_spill]] %s4204_s12  ;;  %p4339_p3 = pnand %p3354_p0, %p256_p2 }
  0x1c   : > { %6372 = sst [smem:[#allocation25_spill]] %s4208_s13  ;;  %s269_s21 = sshll.u32 %s4214_s20, 4  ;;  %s270_s21 = int_to_ptr.vmem [resolvable:$true] %s269_s21 }
  0x1d   : > { %s6373_s3 = sld [smem:[#allocation60_spill]]  ;;  %p3580_p4 = pneg %p4339_p3 }
  0x1e   : > { %s6374_s19 = scalar_select %p4339_p3, 1, 0 }
  0x1f   : > { %p4347_p5 = pnand %p3580_p4, %p62_p1  ;;  %s6305_s23 = smov 128  }
  0x20   : > { %6375 = sst [smem:[#allocation26_spill]] %s6374_s19  ;;  %s6307_s16 = smov 8  }
  0x21   : > { %s36_s17 = sadd.s32 1, %s4204_s12  ;;  %p56_p7 = scmp.eq.s32.totalorder %s4212_s14, 0 }
  0x22   : > { %p37_p6 = scmp.ge.s32.totalorder %s36_s17, 2  ;;  %s3348_s20 = sshll.u32 %s4204_s12, 3 }
  0x23   : > { %s267_s18 = sshll.u32 %s6373_s3, 4  ;;  %s39_s3 = sadd.s32 1, %s4208_s13  ;;  %s268_s18 = int_to_ptr.hbm [resolvable:$true] %s267_s18 }
  0x24   : > { %3583 = dma.hbm_to_vmem [thread:$0]  (!%p4347_p5), %s268_s18, 2048, %s270_s21, [#allocation11], %s6305_s23, %s6305_s23, %s6307_s16  }
  0x25   : > { %s6581_s17 = smov (%p37_p6, %s36_s17), 0  ;;  %s6583_s3 = smov (!%p37_p6, %s39_s3), %s4208_s13 }
  0x26   : > { %6377 = sst [smem:[#allocation27_spill]] %s6581_s17  ;;  %s44_s7 = ssub.s32 %s4204_s12, %s6581_s17 }
  0x27   : > { %s3349_s11 = sadd.s32 4294967295, %s3348_s20  ;;  %p41_p8 = scmp.ge.s32.totalorder %s6583_s3, 2 }
  0x28   : > { %p73_p9 = scmp.gt.s32.totalorder %s3349_s11, 0  ;;  %s3350_s18 = sshll.u32 %s6581_s17, 3 }
  0x29   : > { %s84_s21 = sadd.s32 1, %s4180_s29  ;;  %s6585_s3 = smov (%p41_p8, %s6583_s3), 0 }
  0x2a   : > { %6378 = sst [smem:[#allocation28_spill]] %s6585_s3  ;;  %s6587_s11 = smov (!%p73_p9, %s3349_s11), 0 }
  0x2b   : > { %s4371_s23 = ssub.s32 %s4208_s13, %s6585_s3  ;;  %s3351_s16 = sadd.s32 4294967295, %s3350_s18 }
  0x2c   : > { %s4374_s6 = sor.u32 %s44_s7, %s4371_s23  ;;  %p77_p10 = scmp.gt.s32.totalorder %s3351_s16, 0 }
  0x2d   : > { %p46_p11 = scmp.eq.s32.totalorder %s4374_s6, 0  ;;  %p91_p12 = scmp.ne.s32.totalorder %s4180_s29, %s4176_s28 }
  0x2e   : > { %s6589_s16 = smov (!%p77_p10, %s3351_s16), 0  ;;  %p97_p0 = scmp.ne.s32.totalorder %s4176_s28, %s4172_s27 }
  0x2f   : > { %p4381_p13 = por %p91_p12, %p56_p7  ;;  %s80_s3 = ssub.s32 %s6587_s11, %s6589_s16 }
  0x30   : > { %s4387_s10 = sadd.s32 8, %s3348_s20  ;;  %s81_s7 = sor.u32 %s80_s3, %s4371_s23 }
  0x31   : > { %p4392_p2 = por %p97_p0, %p62_p1  ;;  %p82_p4 = scmp.eq.s32.totalorder %s81_s7, 0 }
  0x32   : > { %p109_p6 = scmp.lt.s32.totalorder %s4387_s10, 15  ;;  %s4397_s19 = sadd.s32 8, %s3350_s18 }
  0x33   : > { %s6380_s4 = scalar_select %p4392_p2, 1, 0 }
  0x34   : > { %p6320_p8 = scmp.lt.s32.totalorder %s4212_s14, 4  ;;  %s4405_s27 = sshll.u32 %s4208_s13, 5 }
  0x35   : > { %6381 = sst [smem:[#allocation29_spill]] %s6380_s4  ;;  %s328_s3 = sand.u32 1, %s4212_s14  }
  0x36   : > { %s4401_s2 = scalar_select %p82_p4, %s4180_s29, %s84_s21  }
  0x37   : > { %s330_s16 = sand.u32 1, %s4180_s29   ;;  %s3366_s28 = sshll.u32 %s6587_s11, 1 }
  0x38   : > { %6382 = sst [smem:[#allocation30_spill]] %s4401_s2  ;;  %s3363_s20 = sshll.u32 %s330_s16, 4 }
  0x39   : > { %s341_s0 = sadd.s32 %s3366_s28, %s4405_s27  ;;  %s332_s7 = scalar_lea.vmem [#allocation7], %s3363_s20 }
  0x3a   : > { %s346_s4 = sshll.u32 %s332_s7, 4  ;;  %s3368_s18 = sshll.u32 %s341_s0, 3  ;;  %s347_s4 = int_to_ptr.vmem [resolvable:$true] %s346_s4 }
  0x3b   : > { %s6383_s1 = sld [smem:[#allocation58_spill]]  ;;  %p3591_p10 = pnand %p6320_p8, %p4381_p13 }
  0x3c   : > { %s6384_s5 = sld [smem:[#allocation62_spill]]  ;;  %s4420_s20 = scalar_lea.sflag [#allocation8], %s328_s3 }
  0x3d   : > { %s6385_s2 = smov 8   ;;  %s6386_s7 = smov 128  }
  0x3e   : > { %s4217_s17 = smov [#allocation12]   ;;  %s48_s3 = sadd.s32 1, %s4192_s9 }
  0x3f   : > { %s4436_s21 = scalar_select %p46_p11, %s4192_s9, %s48_s3  }
  0x40   : > { %p55_p12 = scmp.ne.s32.totalorder %s4192_s9, %s4188_s8  ;;  %p61_p13 = scmp.ne.s32.totalorder %s4188_s8, %s4184_s30 }
  0x41   : > { %s343_s13 = scalar_lea.hbm %s6383_s1, %s3368_s18  ;;  %s286_s18 = sshll.u32 %s4217_s17, 4  ;;  %s287_s18 = int_to_ptr.vmem [resolvable:$true] %s286_s18 }
  0x42   : > { %s344_s28 = sshll.u32 %s343_s13, 4  ;;  %s284_s0 = sshll.u32 %s6384_s5, 4  ;;  %s345_s28 = int_to_ptr.hbm [resolvable:$true] %s344_s28  ;;  %s285_s0 = int_to_ptr.hbm [resolvable:$true] %s284_s0 }
  0x43   : > { %3593 = dma.hbm_to_vmem [thread:$0]  (!%p3591_p10), %s345_s28, 256, %s347_s4, %s4420_s20, %s6386_s7, %s6386_s7, %s6385_s2  }
  0x44   : > { %3586 = dma.hbm_to_vmem [thread:$0]  (!%p4347_p5), %s285_s0, 18432, %s287_s18, [#allocation11], %s6386_s7, %s6386_s7, %s6385_s2  }
  0x45   : > { %s3347_s13 = sadd.s32 4294967294, %s4212_s14   ;;  %6387 = sst [smem:[#allocation31_spill]] %s4436_s21 }
  0x46   : > { %p243_p0 = scmp.eq.s32.totalorder %s4331_s15, 3  ;;  %p249_p4 = scmp.eq.s32.totalorder %s3347_s13, 3 }
  0x47   : > { %p4445_p10 = por %p56_p7, %p55_p12  ;;  %p4451_p9 = por %p62_p1, %p61_p13 }
  0x48   : > { %p4455_p5 = por %p243_p0, %p55_p12  ;;  %p4459_p11 = por %p249_p4, %p61_p13 }
  0x49   : > { %s303_s11 = sand.u32 1, %s4192_s9   ;;  %s3428_s16 = sshll.u32 %s4204_s12, 4 }
  0x4a   : > { %s3358_s0 = sshll.u32 %s303_s11, 7  ;;  %s313_s17 = sadd.s32 %s3428_s16, %s4405_s27 }
  0x4b   : > { %s3362_s18 = sshll.u32 %s313_s17, 3  ;;  %s307_s13 = scalar_lea.vmem [#allocation4], %s3358_s0 }
  0x4c   : > { %s318_s3 = sshll.u32 %s307_s13, 4  ;;  %s6392_s21 = sld [smem:[#allocation57_spill]]  ;;  %s319_s3 = int_to_ptr.vmem [resolvable:$true] %s318_s3 }
  0x4d   : > { %p3588_p12 = pnand %p6320_p8, %p4445_p10  ;;  %s304_s16 = scalar_lea.sflag [#allocation5], %s303_s11 }
  0x4e   : > { %s6591_s10 = smov (!%p109_p6, %s4387_s10), 15  ;;  %p6393_p13 = scmp.lt.s32.totalorder %s4397_s19, 15 }
  0x4f   : > { %s120_s1 = sadd.s32 1, %s4168_s26  ;;  %p127_p0 = scmp.ne.s32.totalorder %s4168_s26, %s4164_s25 }
  0x50   : > { %s6593_s19 = smov (!%p6393_p13, %s4397_s19), 15  ;;  %p133_p4 = scmp.ne.s32.totalorder %s4164_s25, %s4160_s24 }
  0x51   : > { %s116_s5 = ssub.s32 %s6591_s10, %s6593_s19  ;;  %p4490_p10 = por %p127_p0, %p56_p7 }
  0x52   : > { %s315_s29 = scalar_lea.hbm %s6392_s21, %s3362_s18  ;;  %s358_s4 = sand.u32 1, %s4168_s26  }
  0x53   : > { %s316_s9 = sshll.u32 %s315_s29, 4  ;;  %s117_s29 = sor.u32 %s116_s5, %s4371_s23  ;;  %s317_s9 = int_to_ptr.hbm [resolvable:$true] %s316_s9 }
  0x54   : > { %3590 = dma.hbm_to_vmem [thread:$0]  (!%p3588_p12), %s317_s9, 2048, %s319_s3, %s304_s16, %s6386_s7, %s6386_s7, %s6385_s2  }
  0x55   : > { %p118_p8 = scmp.eq.s32.totalorder %s117_s29, 0  ;;  %p4496_p12 = por %p133_p4, %p62_p1 }
  0x56   : > { %s3371_s11 = sshll.u32 %s6591_s10, 1  ;;  %s3369_s24 = sshll.u32 %s358_s4, 4 }
  0x57   : > { %s4502_s0 = scalar_select %p118_p8, %s4168_s26, %s120_s1  }
  0x58   : > { %s369_s19 = sadd.s32 %s3371_s11, %s4405_s27  ;;  %s6396_s13 = sld [smem:[#allocation59_spill]] }
  0x59   : > { %s3373_s23 = sshll.u32 %s369_s19, 3  ;;  %s360_s16 = scalar_lea.vmem [#allocation9], %s3369_s24 }
  0x5a   : > { %s374_s5 = sshll.u32 %s360_s16, 4  ;;  %p6397_p7 = scmp.lt.s32.totalorder %s4212_s14, 4  ;;  %s375_s5 = int_to_ptr.vmem [resolvable:$true] %s374_s5 }
  0x5c   : > { %p3594_p6 = pnand %p6397_p7, %p4490_p10  ;;  %386 = sbr.rel (%p4339_p3) target bundleno = 855 (0x357), region = 48 }
  0x5e   : > { %s371_s3 = scalar_lea.hbm %s6396_s13, %s3373_s23 }
  0x5f   : > { %s372_s12 = sshll.u32 %s371_s3, 4  ;;  %s373_s12 = int_to_ptr.hbm [resolvable:$true] %s372_s12 }
  0x60   : > { %3596 = dma.hbm_to_vmem [thread:$0]  (!%p3594_p6), %s373_s12, 256, %s375_s5, %s4420_s20, %s6386_s7, %s6386_s7, %s6385_s2  }
  0x61   : > { %s4519_s27 = sand.u32 1, %s4188_s8  }
  0x62   : > { %s3375_s1 = sshll.u32 %s4519_s27, 7  ;;  %s389_s29 = scalar_lea.sflag [#allocation5], %s4519_s27 }
  0x63   : > { %s4525_s21 = scalar_lea.vmem [#allocation4], %s3375_s1 }
  0x64   : > { %4139 = dma.done.wait (%p4451_p9), %s389_s29, 2048  }
  0x65   : > { %4141 = vsyncadd (%p4451_p9), %s389_s29, 4294965248  ;;  %s6399_s12 = sld [smem:[#allocation19_spill]]  ;;  %s398_s2 = sand.u32 1, %s4331_s15  }
  0x66   : > { %s399_s11 = scalar_lea.sflag [#allocation8], %s398_s2 }
  0x6b   : > { %s400_s7 = sand.u32 1, %s6399_s12  }
  0x6c   : > { %s4533_s4 = sshll.u32 %s400_s7, 4 }
  0x6d   : > { %s402_s24 = scalar_lea.vmem [#allocation7], %s4533_s4 }
  0x6e   : > { %4143 = dma.done.wait (%p4392_p2), %s399_s11, 256  }
  0x6f   : > { %4145 = vsyncadd (%p4392_p2), %s399_s11, 4294967040  ;;  %s410_s19 = sand.u32 1, %s4164_s25  }
  0x70   : > { %s4541_s22 = sshll.u32 %s410_s19, 4 }
  0x71   : > { %s412_s23 = scalar_lea.vmem [#allocation9], %s4541_s22 }
  0x72   : > { %4147 = dma.done.wait (%p4496_p12), %s399_s11, 256  }
  0x73   : > { %4149 = vsyncadd (%p4496_p12), %s399_s11, 4294967040 }
  0x74   : > { %4151 = dma.done.wait (%p62_p1), [#allocation11], 20480  }
  0x75   : > { %4153 = vsyncadd (%p62_p1), [#allocation11], 4294946816  ;;  %v4552_v0 = vld [vmem:[#allocation10 + $0x78] sm:$0xff]  ;;  %v4554_v1 = vld [vmem:[#allocation10 + $0x70] sm:$0xff]  ;;  %s6401_s17 = sld [smem:[#allocation61_spill]]  ;;  %s6058_s20 = scalar_lea.vmem [#allocation13], %s3375_s1 }
  0x76   : > { %510 = vmatpush.msra.mxu0 %v4552_v0  ;;  %3532 = vmatpush.msra.mxu1 %v4552_v0  ;;  %v4559_v2 = vld [vmem:[#allocation10 + $0x68] sm:$0xff]  ;;  %v4564_v3 = vld [vmem:[#allocation10 + $0x60] sm:$0xff]  ;;  %v4569_v4 = vld [vmem:[#allocation10 + $0x58] sm:$0xff]  ;;  %s6422_s18 = sld [smem:[#allocation22_spill]]  ;;  %s3185_s15 = sshll.u32 %s6058_s20, 4  ;;  %s3186_s15 = int_to_ptr.vmem [resolvable:$true] %s3185_s15 }
  0x77   : > { %986 = vmatpush.msra.mxu2 %v4552_v0  ;;  %v4574_v5 = vld [vmem:[#allocation10 + $0x50] sm:$0xff]  ;;  %v483_v6 = vld [vmem:[#allocation10 + $0x48] sm:$0xff]  ;;  %v482_v7 = vld [vmem:[#allocation10 + $0x40] sm:$0xff]  ;;  %s6507_s29 = sld [smem:[#allocation63_spill]] }
  0x78   : > { %511 = vmatpush.msra.mxu0 %v4554_v1  ;;  %3533 = vmatpush.msra.mxu1 %v4554_v1  ;;  %v481_v8 = vld [vmem:[#allocation10 + $0x38] sm:$0xff]  ;;  %v480_v9 = vld [vmem:[#allocation10 + $0x30] sm:$0xff]  ;;  %v479_v10 = vld [vmem:[#allocation10 + $0x28] sm:$0xff]  ;;  %s6563_s1 = sld [smem:[#allocation23_spill]] }
  0x79   : > { %987 = vmatpush.msra.mxu2 %v4554_v1  ;;  %v478_v11 = vld [vmem:[#allocation10 + $0x20] sm:$0xff]  ;;  %v477_v12 = vld [vmem:[#allocation10 + $0x18] sm:$0xff]  ;;  %v476_v13 = vld [vmem:[#allocation10 + $0x10] sm:$0xff]  ;;  %s6564_s22 = sld [smem:[#allocation64_spill]] }
  0x7a   : > { %512 = vmatpush.msra.mxu0 %v4559_v2  ;;  %3534 = vmatpush.msra.mxu1 %v4559_v2  ;;  %v475_v14 = vld [vmem:[#allocation10 + $0x8] sm:$0xff]  ;;  %v474_v15 = vld [vmem:[#allocation10] sm:$0xff]  ;;  %v501_v17 = vld [vmem:[%s4525_s21 + $0x50] sm:$0xff] }
  0x7b   : > { %988 = vmatpush.msra.mxu2 %v4559_v2  ;;  %v491_v16 = vld [vmem:[%s4525_s21] sm:$0xff]  ;;  %v492_v19 = vld [vmem:[%s4525_s21 + $0x8] sm:$0xff]  ;;  %v502_v20 = vld [vmem:[%s4525_s21 + $0x58] sm:$0xff] }
  0x7c   : > { %513 = vmatpush.msra.mxu0 %v4564_v3  ;;  %3535 = vmatpush.msra.mxu1 %v4564_v3  ;;  %v984_v18 = vld [vmem:[%s412_s23] sm:$0xff]  ;;  %v985_v21 = vld [vmem:[%s412_s23 + $0x8] sm:$0xff]  ;;  %p936_p1 = scmp.gt.s32.totalorder %s6422_s18, 0  ;;  %p1009_p3 = scmp.lt.s32.totalorder %s6422_s18, 1 }
  0x7d   : > { %989 = vmatpush.msra.mxu2 %v4564_v3  ;;  %v493_v22 = vld [vmem:[%s4525_s21 + $0x10] sm:$0xff]  ;;  %v503_v23 = vld [vmem:[%s4525_s21 + $0x60] sm:$0xff]  ;;  %v494_v24 = vld [vmem:[%s4525_s21 + $0x18] sm:$0xff]  ;;  %s3431_s2 = sshll.u32 %s6422_s18, 4  ;;  %s3170_s18 = scalar_lea.sflag [#allocation6], %s4519_s27 }
  0x7e   : > { %514 = vmatpush.msra.mxu0 %v4569_v4  ;;  %3536 = vmatpush.msra.mxu1 %v4569_v4  ;;  %v504_v25 = vld [vmem:[%s4525_s21 + $0x68] sm:$0xff]  ;;  %v495_v26 = vld [vmem:[%s4525_s21 + $0x20] sm:$0xff]  ;;  %v505_v27 = vld [vmem:[%s4525_s21 + $0x70] sm:$0xff]  ;;  %s4957_s13 = scalar_select %p936_p1, 1, 0 }
  0x7f   : > { %990 = vmatpush.msra.mxu2 %v4569_v4  ;;  %v496_v28 = vld [vmem:[%s4525_s21 + $0x28] sm:$0xff]  ;;  %v506_v29 = vld [vmem:[%s4525_s21 + $0x78] sm:$0xff]  ;;  %v497_v30 = vld [vmem:[%s4525_s21 + $0x30] sm:$0xff]  ;;  %s1050_s12 = scalar_select %p1009_p3, 1, 0 }
  0x80   : > { %515 = vmatpush.msra.mxu0 %v4574_v5  ;;  %3537 = vmatpush.msra.mxu1 %v4574_v5  ;;  %v911_v31 = vld [vmem:[%s402_s24] sm:$0xff]  ;;  %v498_v32 = vld [vmem:[%s4525_s21 + $0x38] sm:$0xff]  ;;  %v500_v35 = vld [vmem:[%s4525_s21 + $0x48] sm:$0xff]  ;;  %s3420_s7 = sshll.u32 %s6563_s1, 5  ;;  %s4074_s10 = scalar_lea.hbm %s6564_s22, 512 }
  0x81   : > { %991 = vmatpush.msra.mxu2 %v4574_v5  ;;  %v912_v33 = vld [vmem:[%s402_s24 + $0x8] sm:$0xff]  ;;  %v499_v34 = vld [vmem:[%s4525_s21 + $0x40] sm:$0xff]  ;;  %v2098_v50 = vld [vmem:[#allocation12 + $0x70] sm:$0xff]  ;;  %s3182_s4 = sadd.s32 %s3431_s2, %s3420_s7 }
  0x82   : > { %516 = vmatpush.msra.mxu0 %v483_v6  ;;  %3538 = vmatpush.msra.mxu1 %v483_v6  ;;  %v4615_v38 = vld [vmem:[%s6401_s17] ss:$0 sm:$0xff]  ;;  %v2099_v49 = vld [vmem:[#allocation12 + $0x78] sm:$0xff]  ;;  %v2097_v52 = vld [vmem:[#allocation12 + $0x68] sm:$0xff]  ;;  %s3421_s11 = sshll.u32 %s3182_s4, 3 }
  0x83   : > { %992 = vmatpush.msra.mxu2 %v483_v6  ;;  %3548 = vmatpush.msra.mxu3 %v2099_v49  ;;  %v2096_v56 = vld [vmem:[#allocation12 + $0x60] sm:$0xff]  ;;  %v2095_v58 = vld [vmem:[#allocation12 + $0x58] sm:$0xff]  ;;  %v2094_v63 = vld [vmem:[#allocation12 + $0x50] sm:$0xff]  ;;  %s3184_s23 = scalar_lea.hbm %s6564_s22, %s3421_s11 }
  0x84   : > { %517 = vmatpush.msra.mxu0 %v482_v7  ;;  %3539 = vmatpush.msra.mxu1 %v482_v7  ;;  %v2147_v59 = vld [vmem:[#allocation12 + $0x1f8] sm:$0xff]  ;;  %s3187_s9 = sshll.u32 %s3184_s23, 4  ;;  %s3188_s9 = int_to_ptr.hbm [resolvable:$true] %s3187_s9 }
  0x85   : > { %993 = vmatpush.msra.mxu2 %v482_v7  ;;  %3549 = vmatpush.msra.mxu3 %v2098_v50 }
  0x86   : > { %518 = vmatpush.msra.mxu0 %v481_v8  ;;  %3540 = vmatpush.msra.mxu1 %v481_v8 }
  0x87   : > { %994 = vmatpush.msra.mxu2 %v481_v8  ;;  %3550 = vmatpush.msra.mxu3 %v2097_v52 }
  0x88   : > { %519 = vmatpush.msra.mxu0 %v480_v9  ;;  %3541 = vmatpush.msra.mxu1 %v480_v9 }
  0x89   : > { %995 = vmatpush.msra.mxu2 %v480_v9  ;;  %3551 = vmatpush.msra.mxu3 %v2096_v56 }
  0x8a   : > { %520 = vmatpush.msra.mxu0 %v479_v10  ;;  %3542 = vmatpush.msra.mxu1 %v479_v10 }
  0x8b   : > { %996 = vmatpush.msra.mxu2 %v479_v10  ;;  %3552 = vmatpush.msra.mxu3 %v2095_v58 }
  0x8c   : > { %521 = vmatpush.msra.mxu0 %v478_v11  ;;  %3543 = vmatpush.msra.mxu1 %v478_v11 }
  0x8d   : > { %997 = vmatpush.msra.mxu2 %v478_v11  ;;  %3553 = vmatpush.msra.mxu3 %v2094_v63 }
  0x8e   : > { %522 = vmatpush.msra.mxu0 %v477_v12  ;;  %3544 = vmatpush.msra.mxu1 %v477_v12 }
  0x8f   : > { %998 = vmatpush.msra.mxu2 %v477_v12 }
  0x90   : > { %523 = vmatpush.msra.mxu0 %v476_v13  ;;  %3545 = vmatpush.msra.mxu1 %v476_v13 }
  0x91   : > { %999 = vmatpush.msra.mxu2 %v476_v13 }
  0x92   : > { %524 = vmatpush.msra.mxu0 %v475_v14  ;;  %3546 = vmatpush.msra.mxu1 %v475_v14 }
  0x93   : > { %1000 = vmatpush.msra.mxu2 %v475_v14 }
  0x94   : > { %525 = vmatpush.msra.mxu0 %v474_v15  ;;  %3547 = vmatpush.msra.mxu1 %v474_v15 }
  0x95   : > { %526 = vmatmul.f32.vlgmr.msra.gmra.mxu0 %v491_v16  ;;  %556 = vmatmul.f32.vlgmr.msra.gmra.mxu1 %v501_v17 }
  0x96   : > { %1001 = vmatpush.msra.mxu2 %v474_v15  ;;  %913 = vmatpush.msrb.mxu1 %v4552_v0  ;;  %v2146_v0 = vld [vmem:[#allocation12 + $0x1f0] sm:$0xff] }
  0x97   : > { %1002 = vmatmul.f32.vlgmr.msra.gmra.mxu2 %v984_v18  ;;  %2427 = vmatpush.msrb.mxu0 %v2147_v59  ;;  %v2093_v18 = vld [vmem:[#allocation12 + $0x48] sm:$0xff] }
  0x98   : > { %914 = vmatpush.msrb.mxu1 %v4554_v1  ;;  %2232 = vmatpush.msrb.mxu2 %v2099_v49  ;;  %v2112_v49 = vld [vmem:[#allocation12 + $0xe0] sm:$0xff] }
  0x99   : > { %2428 = vmatpush.msrb.mxu0 %v2146_v0  ;;  %3554 = vmatpush.msra.mxu3 %v2093_v18 }
  0x9a   : > { %915 = vmatpush.msrb.mxu1 %v4559_v2  ;;  %2233 = vmatpush.msrb.mxu2 %v2098_v50 }
  0x9c   : > { %916 = vmatpush.msrb.mxu1 %v4564_v3  ;;  %2234 = vmatpush.msrb.mxu2 %v2097_v52 }
  0x9d   : > { %529 = vmatmul.f32.gmra.mxu0 %v492_v19  ;;  %559 = vmatmul.f32.gmra.mxu1 %v502_v20  ;;  %v2145_v19 = vld [vmem:[#allocation12 + $0x1e8] sm:$0xff] }
  0x9e   : > { %917 = vmatpush.msrb.mxu1 %v4569_v4  ;;  %2235 = vmatpush.msrb.mxu2 %v2096_v56  ;;  %v2141_v56 = vld [vmem:[#allocation12 + $0x1c8] sm:$0xff] }
  0x9f   : > { %1005 = vmatmul.f32.gmra.mxu2 %v985_v21  ;;  %2429 = vmatpush.msrb.mxu0 %v2145_v19  ;;  %v2139_v19 = vld [vmem:[#allocation12 + $0x1b8] sm:$0xff] }
  0xa0   : > { %918 = vmatpush.msrb.mxu1 %v4574_v5  ;;  %2236 = vmatpush.msrb.mxu2 %v2095_v58 }
  0xa2   : > { %919 = vmatpush.msrb.mxu1 %v483_v6  ;;  %2237 = vmatpush.msrb.mxu2 %v2094_v63  ;;  %v2111_v63 = vld [vmem:[#allocation12 + $0xd8] sm:$0xff] }
  0xa4   : > { %920 = vmatpush.msrb.mxu1 %v482_v7  ;;  %2238 = vmatpush.msrb.mxu2 %v2093_v18  ;;  %v2087_v18 = vld [vmem:[#allocation12 + $0x18] sm:$0xff] }
  0xa5   : > { %532 = vmatmul.f32.gmra.mxu0 %v493_v22  ;;  %562 = vmatmul.f32.gmra.mxu1 %v503_v23  ;;  %v2115_v22 = vld [vmem:[#allocation12 + $0xf8] sm:$0xff]  ;;  %v2092_v23 = vld [vmem:[#allocation12 + $0x40] sm:$0xff] }
  0xa6   : > { %921 = vmatpush.msrb.mxu1 %v481_v8  ;;  %3555 = vmatpush.msra.mxu3 %v2092_v23 }
  0xa7   : > { %2239 = vmatpush.msrb.mxu2 %v2092_v23 }
  0xa8   : > { %922 = vmatpush.msrb.mxu1 %v480_v9 }
  0xaa   : > { %923 = vmatpush.msrb.mxu1 %v479_v10 }
  0xac   : > { %924 = vmatpush.msrb.mxu1 %v478_v11 }
  0xad   : > { %535 = vmatmul.f32.gmra.mxu0 %v494_v24  ;;  %565 = vmatmul.f32.gmra.mxu1 %v504_v25  ;;  %v2144_v24 = vld [vmem:[#allocation12 + $0x1e0] sm:$0xff] }
  0xae   : > { %925 = vmatpush.msrb.mxu1 %v477_v12  ;;  %2430 = vmatpush.msrb.mxu0 %v2144_v24 }
  0xb0   : > { %926 = vmatpush.msrb.mxu1 %v476_v13 }
  0xb2   : > { %927 = vmatpush.msrb.mxu1 %v475_v14 }
  0xb4   : > { %928 = vmatpush.msrb.mxu1 %v474_v15 }
  0xb5   : > { %538 = vmatmul.f32.gmra.mxu0 %v495_v26  ;;  %568 = vmatmul.f32.gmra.mxu1 %v505_v27 }
  0xb6   : > { %2297 = vmatpush.msra.mxu1 %v2115_v22 }
  0xbd   : > { %541 = vmatmul.f32.gmra.mxu0 %v496_v28  ;;  %571 = vmatmul.f32.gmra.mxu1 %v506_v29  ;;  %v2114_v29 = vld [vmem:[#allocation12 + $0xf0] sm:$0xff] }
  0xbe   : > { %2298 = vmatpush.msra.mxu1 %v2114_v29 }
  0xc5   : > { %544 = vmatmul.f32.gmra.mxu0 %v497_v30  ;;  %929 = vmatmul.f32.vlgmr.msrb.gmra.mxu1 %v911_v31 }
  0xcd   : > { %547 = vmatmul.f32.gmra.mxu0 %v498_v32  ;;  %932 = vmatmul.f32.gmra.mxu1 %v912_v33  ;;  %v2091_v32 = vld [vmem:[#allocation12 + $0x38] sm:$0xff] }
  0xce   : > { %v2143_v33 = vld [vmem:[#allocation12 + $0x1d8] sm:$0xff]  ;;  %3556 = vmatpush.msra.mxu3 %v2091_v32  ;;  %2240 = vmatpush.msrb.mxu2 %v2091_v32 }
  0xcf   : > { %2431 = vmatpush.msrb.mxu0 %v2143_v33 }
  0xd5   : > { %550 = vmatmul.f32.gmra.mxu0 %v499_v34 }
  0xdd   : > { %553 = vmatmul.f32.gmra.mxu0 %v500_v35 }
 0x112   : > { %v527_v36 = vpop.f32.mrf.mxu0  ;;  %v557_v37 = vpop.f32.mrf.mxu1 }
 0x113   : > { %v4618_v41 = vadd.f32 %v4615_v38, %v527_v36  ;;  %v4634_v60 = vadd.f32 %v4615_v38, %v557_v37  ;;  %v2113_v36 = vld [vmem:[#allocation12 + $0xe8] sm:$0xff] }
 0x114   : > { %2299 = vmatpush.msra.mxu1 %v2113_v36 }
 0x115   : > { %v3381_v43 = vmul.f32 -1.442695, %v4618_v41  ;;  %v3391_v3 = vmul.f32 -1.442695, %v4634_v60 }
 0x116   : > { %2300 = vmatpush.msra.mxu1 %v2112_v49 }
 0x117   : > { %3743 = vpow2.f32 %v3381_v43 }
 0x118   : > { %2301 = vmatpush.msra.mxu1 %v2111_v63 }
 0x11a   : > { %v530_v39 = vpop.f32.mrf.mxu0  ;;  %v560_v40 = vpop.f32.mrf.mxu1 }
 0x11b   : > { %v4621_v42 = vadd.f32 %v4615_v38, %v530_v39  ;;  %v4659_v10 = vadd.f32 %v4615_v38, %v560_v40  ;;  %v2090_v39 = vld [vmem:[#allocation12 + $0x30] sm:$0xff] }
 0x11c   : > { %v2142_v40 = vld [vmem:[#allocation12 + $0x1d0] sm:$0xff]  ;;  %3557 = vmatpush.msra.mxu3 %v2090_v39  ;;  %2241 = vmatpush.msrb.mxu2 %v2090_v39 }
 0x11d   : > { %v3382_v44 = vmul.f32 -1.442695, %v4621_v42  ;;  %v3744_v53 = vpop.eup %3743  ;;  %v3392_v20 = vmul.f32 -1.442695, %v4659_v10  ;;  %2432 = vmatpush.msrb.mxu0 %v2142_v40 }
 0x11e   : > { %v4631_v57 = vadd.f32 1.0, %v3744_v53 }
 0x11f   : > { %3745 = vpow2.f32 %v3382_v44  ;;  %2433 = vmatpush.msrb.mxu0 %v2141_v56 }
 0x120   : > { %vm644_vm0 = vweird.f32 %v4631_v57  ;;  %v648_v58 = vand.u32 2147483647, %v4631_v57  ;;  %v650_v59 = vand.u32 2147483648, %v4631_v57 }
 0x122   : > { %v533_v45 = vpop.f32.mrf.mxu0  ;;  %v4625_v46 = vpop.f32.mrf.mxu1  ;;  %vm649_vm9 = vcmp.eq.f32.partialorder %v648_v58, 8.507059e+37  ;;  %v2136_v58 = vld [vmem:[#allocation12 + $0x1a0] sm:$0xff] }
 0x123   : > { %v4628_v47 = vadd.f32 %v4615_v38, %v533_v45 }
 0x125   : > { %v3383_v48 = vmul.f32 -1.442695, %v4628_v47  ;;  %v3746_v54 = vpop.eup %3745 }
 0x126   : > { %v4636_v61 = vadd.f32 1.0, %v3746_v54 }
 0x127   : > { %3747 = vpow2.f32 %v3383_v48 }
 0x128   : > { %3749 = vrcp.f32 %v4631_v57  ;;  %v665_v0 = vand.u32 2147483648, %v4636_v61  ;;  %vm659_vm5 = vweird.f32 %v4636_v61  ;;  %v663_v23 = vand.u32 2147483647, %v4636_v61 }
 0x129   : > { %3751 = vrcp.f32 %v4636_v61 }
 0x12a   : > { %v536_v51 = vpop.f32.mrf.mxu0  ;;  %v566_v55 = vpop.f32.mrf.mxu1  ;;  %vm664_vm10 = vcmp.eq.f32.partialorder %v663_v23, 8.507059e+37 }
 0x12b   : > { %v4647_v5 = vadd.f32 %v4615_v38, %v536_v51  ;;  %v4650_v6 = vadd.f32 %v4615_v38, %v566_v55  ;;  %v2089_v55 = vld [vmem:[#allocation12 + $0x28] sm:$0xff] }
 0x12c   : > { %3558 = vmatpush.msra.mxu3 %v2089_v55  ;;  %2242 = vmatpush.msrb.mxu2 %v2089_v55 }
 0x12d   : > { %v3748_v62 = vpop.eup %3747  ;;  %v3384_v11 = vmul.f32 -1.442695, %v4647_v5  ;;  %v3394_v13 = vmul.f32 -1.442695, %v4650_v6 }
 0x12e   : > { %v4638_v1 = vadd.f32 1.0, %v3748_v62  ;;  %v4652_v7 = vpop.eup %3749 }
 0x12f   : > { %v4654_v8 = vpop.eup %3751  ;;  %v640_v14 = vmul.f32 %v4652_v7, %v4631_v57  ;;  %vm645_vm1 = vweird.f32 %v4652_v7  ;;  %v2084_v57 = vld [vmem:[#allocation12] sm:$0xff] }
 0x130   : > { %3753 = vrcp.f32 %v4638_v1  ;;  %v655_v15 = vmul.f32 %v4654_v8, %v4636_v61  ;;  %vm660_vm2 = vweird.f32 %v4654_v8  ;;  %vm4720_vm4 = vmor %vm644_vm0, %vm645_vm1  ;;  %v680_v24 = vand.u32 2147483648, %v4638_v1  ;;  %v2086_v61 = vld [vmem:[#allocation12 + $0x10] sm:$0xff] }
 0x131   : > { %3755 = vpow2.f32 %v3391_v3  ;;  %v641_v25 = vsub.f32 1.0, %v640_v14  ;;  %v2088_v3 = vld [vmem:[#allocation12 + $0x20] sm:$0xff]  ;;  %vm4731_vm6 = vmor %vm659_vm5, %vm660_vm2  ;;  %vm674_vm7 = vweird.f32 %v4638_v1 }
 0x132   : > { %v539_v2 = vpop.f32.mrf.mxu0  ;;  %v4644_v4 = vpop.f32.mrf.mxu1  ;;  %3757 = vpow2.f32 %v3384_v11  ;;  %v656_v27 = vsub.f32 1.0, %v655_v15  ;;  %v2140_v11 = vld [vmem:[#allocation12 + $0x1c0] sm:$0xff]  ;;  %3559 = vmatpush.msra.mxu3 %v2088_v3  ;;  %v2110_v15 = vld [vmem:[#allocation12 + $0xd0] sm:$0xff]  ;;  %2243 = vmatpush.msrb.mxu2 %v2088_v3  ;;  %v681_v49 = vor.u32 1.1754944e-38, %v680_v24 }
 0x133   : > { %v4671_v21 = vadd.f32 %v4615_v38, %v539_v2  ;;  %3759 = vpow2.f32 %v3394_v13  ;;  %v642_v44 = vmul.f32 %v4652_v7, %v641_v25  ;;  %v4702_v2 = vadd.f32 %v4615_v38, %v4625_v46  ;;  %2434 = vmatpush.msrb.mxu0 %v2140_v11  ;;  %2302 = vmatpush.msra.mxu1 %v2110_v15 }
 0x134   : > { %3761 = vpow2.f32 %v3392_v20  ;;  %v657_v45 = vmul.f32 %v4654_v8, %v656_v27  ;;  %3560 = vmatpush.msra.mxu3 %v2087_v18  ;;  %v2109_v27 = vld [vmem:[#allocation12 + $0xc8] sm:$0xff]  ;;  %2244 = vmatpush.msrb.mxu2 %v2087_v18 }
 0x135   : > { %v3385_v31 = vmul.f32 -1.442695, %v4671_v21  ;;  %v643_v13 = vadd.f32 %v4652_v7, %v642_v44  ;;  %2435 = vmatpush.msrb.mxu0 %v2139_v19  ;;  %2303 = vmatpush.msra.mxu1 %v2109_v27  ;;  %v2085_v44 = vld [vmem:[#allocation12 + $0x8] sm:$0xff] }
 0x136   : > { %v4656_v9 = vpop.eup %3753  ;;  %v658_v14 = vadd.f32 %v4654_v8, %v657_v45  ;;  %3561 = vmatpush.msra.mxu3 %v2086_v61  ;;  %v2137_v45 = vld [vmem:[#allocation12 + $0x1a8] sm:$0xff]  ;;  %2245 = vmatpush.msrb.mxu2 %v2086_v61 }
 0x137   : > { %v3756_v16 = vpop.eup %3755  ;;  %v670_v17 = vmul.f32 %v4656_v9, %v4638_v1  ;;  %3763 = vpow2.f32 %v3385_v31  ;;  %vm675_vm3 = vweird.f32 %v4656_v9  ;;  %v2138_v31 = vld [vmem:[#allocation12 + $0x1b0] sm:$0xff]  ;;  %v647_v33 = vsel %vm4720_vm4, %v4652_v7, %v643_v13 }
 0x138   : > { %v4673_v26 = vadd.f32 1.0, %v3756_v16  ;;  %v3758_v43 = vpop.eup %3757  ;;  %vm4747_vm8 = vmor %vm674_vm7, %vm675_vm3  ;;  %2436 = vmatpush.msrb.mxu0 %v2138_v31  ;;  %v666_v7 = vor.u32 1.1754944e-38, %v665_v0  ;;  %3562 = vmatpush.msra.mxu3 %v2085_v44 }
 0x139   : > { %v671_v30 = vsub.f32 1.0, %v670_v17  ;;  %v3760_v50 = vpop.eup %3759  ;;  %v4688_v52 = vadd.f32 1.0, %v3758_v43  ;;  %v3393_v43 = vmul.f32 -1.442695, %v4702_v2  ;;  %2246 = vmatpush.msrb.mxu2 %v2085_v44 }
 0x13a   : > { %v542_v12 = vpop.f32.mrf.mxu0  ;;  %v572_v28 = vpop.f32.mrf.mxu1  ;;  %3765 = vrcp.f32 %v4673_v26  ;;  %v4696_v62 = vadd.f32 1.0, %v3760_v50  ;;  %2437 = vmatpush.msrb.mxu0 %v2137_v45  ;;  %3563 = vmatpush.msra.mxu3 %v2084_v57 }
 0x13b   : > { %v4677_v34 = vadd.f32 %v4615_v38, %v542_v12  ;;  %v4681_v37 = vadd.f32 %v4615_v38, %v572_v28  ;;  %v672_v51 = vmul.f32 %v4656_v9, %v671_v30  ;;  %v3762_v12 = vpop.eup %3761  ;;  %v651_v28 = vor.u32 1.1754944e-38, %v650_v59  ;;  %2247 = vmatpush.msrb.mxu2 %v2084_v57 }
 0x13c   : > { %v678_v30 = vand.u32 2147483647, %v4638_v1  ;;  %v4743_v36 = vadd.f32 1.0, %v3762_v12  ;;  %v2108_v1 = vld [vmem:[#allocation12 + $0xc0] sm:$0xff]  ;;  %2438 = vmatpush.msrb.mxu0 %v2136_v58  ;;  %v693_v22 = vand.u32 2147483647, %v4688_v52  ;;  %vm689_vm12 = vweird.f32 %v4688_v52 }
 0x13d   : > { %v3386_v48 = vmul.f32 -1.442695, %v4677_v34  ;;  %v3396_v53 = vmul.f32 -1.442695, %v4681_v37  ;;  %v3764_v46 = vpop.eup %3763  ;;  %v4710_v16 = vadd.f32 %v4656_v9, %v672_v51  ;;  %2304 = vmatpush.msra.mxu1 %v2108_v1  ;;  %v843_v24 = vand.u32 2147483647, %v4696_v62 }
 0x13e   : > { %v4727_v25 = vadd.f32 1.0, %v3764_v46  ;;  %vm679_vm11 = vcmp.eq.f32.partialorder %v678_v30, 8.507059e+37  ;;  %v845_v27 = vand.u32 2147483648, %v4696_v62  ;;  %vm839_vm14 = vweird.f32 %v4696_v62 }
 0x13f   : > { %3767 = vpow2.f32 %v3386_v48  ;;  %vm4811_vm0 = vcmp.eq.f32.partialorder %v693_v22, 8.507059e+37  ;;  %vm4826_vm2 = vcmp.eq.f32.partialorder %v843_v24, 8.507059e+37 }
 0x140   : > { %3769 = vrcp.f32 %v4688_v52  ;;  %v4714_v20 = vpop.eup %3765  ;;  %v710_v39 = vand.u32 2147483648, %v4727_v25  ;;  %vm704_vm4 = vweird.f32 %v4727_v25 }
 0x141   : > { %3771 = vrcp.f32 %v4696_v62  ;;  %v4774_v11 = vmul.f32 %v4714_v20, %v4673_v26 }
 0x142   : > { %v545_v35 = vpop.f32.mrf.mxu0  ;;  %3773 = vpow2.f32 %v3396_v53  ;;  %v652_v53 = vsel %vm649_vm9, %v651_v28, %v647_v33 }
 0x143   : > { %v4692_v54 = vadd.f32 %v4615_v38, %v545_v35  ;;  %v662_v35 = vsel %vm4731_vm6, %v4654_v8, %v658_v14  ;;  %3775 = vrcp.f32 %v4727_v25  ;;  %v677_v8 = vsel %vm4747_vm8, %v4656_v9, %v4710_v16  ;;  %v2107_v9 = vld [vmem:[#allocation12 + $0xb8] sm:$0xff] }
 0x144   : > { %v667_v55 = vsel %vm664_vm10, %v666_v7, %v662_v35  ;;  %2305 = vmatpush.msra.mxu1 %v2107_v9  ;;  %v682_v63 = vsel %vm679_vm11, %v681_v49, %v677_v8  ;;  %v4781_v15 = vmul.f32 %v652_v53, %v4618_v41  ;;  %v708_v35 = vand.u32 2147483647, %v4727_v25 }
 0x145   : > { %v3387_v17 = vmul.f32 -1.442695, %v4692_v54  ;;  %v3768_v32 = vpop.eup %3767  ;;  %v4784_v46 = vmul.f32 %v667_v55, %v4621_v42  ;;  %v4789_v19 = vmul.f32 %v682_v63, %v4628_v47  ;;  %v695_v42 = vand.u32 2147483648, %v4688_v52 }
 0x146   : > { %v4752_v40 = vpop.eup %3769  ;;  %v4770_v3 = vadd.f32 1.0, %v3768_v32  ;;  %vm4852_vm6 = vcmp.eq.f32.partialorder %v708_v35, 8.507059e+37 }
 0x147   : > { %3777 = vpow2.f32 %v3387_v17  ;;  %v4759_v48 = vpop.eup %3771  ;;  %v685_v50 = vmul.f32 %v4752_v40, %v4688_v52  ;;  %v930_v17 = vpop.f32.mrf.mxu1  ;;  %vm690_vm13 = vweird.f32 %v4752_v40  ;;  %v696_v8 = vor.u32 1.1754944e-38, %v695_v42  ;;  %v2163_v52 = vld [vmem:[#allocation12 + $0x278] sm:$0xff] }
 0x148   : > { %v3774_v51 = vpop.eup %3773  ;;  %v835_v56 = vmul.f32 %v4759_v48, %v4696_v62  ;;  %3779 = vrcp.f32 %v4743_v36  ;;  %vm840_vm15 = vweird.f32 %v4759_v48  ;;  %vm4822_vm1 = vmor %vm689_vm12, %vm690_vm13  ;;  %v723_v44 = vand.u32 2147483647, %v4770_v3  ;;  %2492 = vmatpush.msrb.mxu3 %v2163_v52  ;;  %v2131_v52 = vld [vmem:[#allocation12 + $0x178] sm:$0xff] }
 0x149   : > { %v686_v0 = vsub.f32 1.0, %v685_v50  ;;  %3781 = vpow2.f32 %v3393_v43  ;;  %v4776_v13 = vadd.f32 1.0, %v3774_v51  ;;  %v4778_v14 = vpop.eup %3775  ;;  %v725_v45 = vand.u32 2147483648, %v4770_v3  ;;  %vm4837_vm3 = vmor %vm839_vm14, %vm840_vm15  ;;  %v2135_v43 = vld [vmem:[#allocation12 + $0x198] sm:$0xff]  ;;  %2362 = vmatpush.msra.mxu2 %v2131_v52 }
 0x14a   : > { %v4767_v59 = vpop.f32.mrf.mxu0  ;;  %v836_v12 = vsub.f32 1.0, %v835_v56  ;;  %3783 = vrcp.f32 %v4770_v3  ;;  %v700_v41 = vmul.f32 %v4778_v14, %v4727_v25  ;;  %v846_v50 = vor.u32 1.1754944e-38, %v845_v27  ;;  %2439 = vmatpush.msrb.mxu0 %v2135_v43 }
 0x14b   : > { %v687_v16 = vmul.f32 %v4752_v40, %v686_v0  ;;  %3785 = vrcp.f32 %v4776_v13  ;;  %vm705_vm5 = vweird.f32 %v4778_v14  ;;  %v711_v56 = vor.u32 1.1754944e-38, %v710_v39  ;;  %v2106_v39 = vld [vmem:[#allocation12 + $0xb0] sm:$0xff] }
 0x14c   : > { %v837_v23 = vmul.f32 %v4759_v48, %v836_v12  ;;  %v701_v47 = vsub.f32 1.0, %v700_v41  ;;  %vm719_vm7 = vweird.f32 %v4770_v3  ;;  %vm4859_vm8 = vcmp.eq.f32.partialorder %v723_v44, 8.507059e+37  ;;  %vm4869_vm9 = vmor %vm704_vm4, %vm705_vm5  ;;  %2306 = vmatpush.msra.mxu1 %v2106_v39 }
 0x14d   : > { %v3778_v18 = vpop.eup %3777  ;;  %v688_v28 = vadd.f32 %v4752_v40, %v687_v16  ;;  %v726_v63 = vor.u32 1.1754944e-38, %v725_v45  ;;  %vm869_vm10 = vweird.f32 %v4776_v13  ;;  %v4881_v24 = vadd.f32 %v4615_v38, %v930_v17 }
 0x14e   : > { %v4802_v29 = vpop.eup %3779  ;;  %v838_v30 = vadd.f32 %v4759_v48, %v837_v23  ;;  %v4807_v61 = vadd.f32 1.0, %v3778_v18  ;;  %v702_v33 = vmul.f32 %v4778_v14, %v701_v47  ;;  %v873_v23 = vand.u32 2147483647, %v4776_v13  ;;  %v2103_v18 = vld [vmem:[#allocation12 + $0x98] sm:$0xff] }
 0x14f   : > { %v4809_v31 = vpop.eup %3781  ;;  %v692_v49 = vsel %vm4822_vm1, %v4752_v40, %v688_v28  ;;  %v933_v12 = vpop.f32.mrf.mxu1  ;;  %v4889_v28 = vadd.f32 %v4615_v38, %v4767_v59  ;;  %v875_v32 = vand.u32 2147483648, %v4776_v13  ;;  %v1057_v40 = vlaneseq }
 0x150   : > { %v4818_v1 = vpop.eup %3783  ;;  %v842_v53 = vsel %vm4837_vm3, %v4759_v48, %v838_v30  ;;  %v703_v55 = vadd.f32 %v4778_v14, %v702_v33  ;;  %3787 = vrcp.f32 %v4807_v61  ;;  %v697_v58 = vsel %vm4811_vm0, %v696_v8, %v692_v49 }
 0x151   : > { %v715_v9 = vmul.f32 %v4818_v1, %v4770_v3  ;;  %v4850_v62 = vpop.eup %3785  ;;  %v847_v16 = vsel %vm4826_vm2, %v846_v50, %v842_v53  ;;  %vm720_vm11 = vweird.f32 %v4818_v1  ;;  %v4884_v25 = vmul.f32 %v697_v58, %v4647_v5  ;;  %v2134_v50 = vld [vmem:[#allocation12 + $0x190] sm:$0xff] }
 0x152   : > { %v551_v51 = vpop.f32.mrf.mxu0  ;;  %v865_v0 = vmul.f32 %v4850_v62, %v4776_v13  ;;  %v707_v41 = vsel %vm4869_vm9, %v4778_v14, %v703_v55  ;;  %v4892_v47 = vadd.f32 %v4615_v38, %v933_v12  ;;  %v4897_v14 = vmul.f32 %v847_v16, %v4650_v6  ;;  %vm4906_vm12 = vmor %vm719_vm7, %vm720_vm11  ;;  %v2162_v58 = vld [vmem:[#allocation12 + $0x270] sm:$0xff]  ;;  %2440 = vmatpush.msrb.mxu0 %v2134_v50 }
 0x153   : > { %v716_v57 = vsub.f32 1.0, %v715_v9  ;;  %v3397_v5 = vmul.f32 -1.442695, %v4881_v24  ;;  %v712_v33 = vsel %vm4852_vm6, %v711_v56, %v707_v41  ;;  %vm870_vm13 = vweird.f32 %v4850_v62  ;;  %v2104_v56 = vld [vmem:[#allocation12 + $0xa0] sm:$0xff]  ;;  %2493 = vmatpush.msrb.mxu3 %v2162_v58 }
 0x154   : > { %v866_v42 = vsub.f32 1.0, %v865_v0  ;;  %v3388_v35 = vmul.f32 -1.442695, %v4889_v28  ;;  %v3398_v3 = vmul.f32 -1.442695, %v4892_v47  ;;  %vm4919_vm14 = vcmp.eq.f32.partialorder %v873_v23, 8.507059e+37  ;;  %vm4936_vm15 = vmor %vm869_vm10, %vm870_vm13 }
 0x155   : > { %v717_v22 = vmul.f32 %v4818_v1, %v716_v57  ;;  %3789 = vpow2.f32 %v3397_v5  ;;  %v4925_v49 = vadd.f32 %v4615_v38, %v551_v51  ;;  %v4928_v53 = vmul.f32 %v712_v33, %v4671_v21  ;;  %v2133_v57 = vld [vmem:[#allocation12 + $0x188] sm:$0xff] }
 0x156   : > { %v4894_v30 = vpop.eup %3787  ;;  %v867_v17 = vmul.f32 %v4850_v62, %v866_v42  ;;  %3791 = vpow2.f32 %v3388_v35  ;;  %v876_v55 = vor.u32 1.1754944e-38, %v875_v32  ;;  %v738_v12 = vand.u32 2147483647, %v4807_v61  ;;  %v2161_v23 = vld [vmem:[#allocation12 + $0x268] sm:$0xff]  ;;  %2441 = vmatpush.msrb.mxu0 %v2133_v57 }
 0x157   : > { %v718_v27 = vadd.f32 %v4818_v1, %v717_v22  ;;  %v730_v6 = vmul.f32 %v4894_v30, %v4807_v61  ;;  %3793 = vpow2.f32 %v3398_v3  ;;  %v3389_v16 = vmul.f32 -1.442695, %v4925_v49  ;;  %v2132_v22 = vld [vmem:[#allocation12 + $0x180] sm:$0xff]  ;;  %2494 = vmatpush.msrb.mxu3 %v2161_v23  ;;  %v2159_v3 = vld [vmem:[#allocation12 + $0x258] sm:$0xff] }
 0x158   : > { %v868_v8 = vadd.f32 %v4850_v62, %v867_v17  ;;  %vm735_vm0 = vweird.f32 %v4894_v30  ;;  %v4947_v13 = vshrl.u32 %v1057_v40, 7  ;;  %vm734_vm1 = vweird.f32 %v4807_v61  ;;  %2442 = vmatpush.msrb.mxu0 %v2132_v22 }
 0x159   : > { %v722_v7 = vsel %vm4906_vm12, %v4818_v1, %v718_v27  ;;  %v731_v45 = vsub.f32 1.0, %v730_v6  ;;  %v2105_v1 = vld [vmem:[#allocation12 + $0xa8] sm:$0xff]  ;;  %v740_v42 = vand.u32 2147483648, %v4807_v61  ;;  %3795 = vpow2.f32 %v3389_v16  ;;  %v2160_v27 = vld [vmem:[#allocation12 + $0x260] sm:$0xff]  ;;  %vm4971_vm2 = vmor %vm734_vm1, %vm735_vm0 }
 0x15a   : > { %v554_v9 = vpop.f32.mrf.mxu0  ;;  %2307 = vmatpush.msra.mxu1 %v2105_v1  ;;  %v727_v51 = vsel %vm4859_vm8, %v726_v63, %v722_v7  ;;  %v872_v48 = vsel %vm4936_vm15, %v4850_v62, %v868_v8  ;;  %v2102_v62 = vld [vmem:[#allocation12 + $0x90] sm:$0xff]  ;;  %v1064_v32 = vadd.s32 48, %v4947_v13  ;;  %v1320_v5 = vrot.slane %v4928_v53, 7  ;;  %v2101_v8 = vld [vmem:[#allocation12 + $0x88] sm:$0xff]  ;;  %2495 = vmatpush.msrb.mxu3 %v2160_v27 }
 0x15b   : > { %v732_v21 = vmul.f32 %v4894_v30, %v731_v45  ;;  %v4950_v63 = vadd.f32 %v4615_v38, %v554_v9  ;;  %v3790_v17 = vpop.eup %3789  ;;  %v4960_v38 = vmul.f32 %v727_v51, %v4677_v34  ;;  %v877_v6 = vsel %vm4919_vm14, %v876_v55, %v872_v48  ;;  %v2100_v9 = vld [vmem:[#allocation12 + $0x80] sm:$0xff]  ;;  %v2158_v55 = vld [vmem:[#allocation12 + $0x250] sm:$0xff] }
 0x15c   : > { %2308 = vmatpush.msra.mxu1 %v2104_v56  ;;  %v3792_v59 = vpop.eup %3791  ;;  %vm4975_vm3 = vcmp.eq.f32.partialorder %v738_v12, 8.507059e+37  ;;  %v4979_v39 = vadd.f32 1.0, %v3790_v17  ;;  %v6322_v7 = vrot.slane %v4884_v25, 7  ;;  %v1120_v45 = vand.u32 15, %v1064_v32  ;;  %2496 = vmatpush.msrb.mxu3 %v2159_v3  ;;  %v2130_v48 = vld [vmem:[#allocation12 + $0x170] sm:$0xff]  ;;  %v2156_v3 = vld [vmem:[#allocation12 + $0x240] sm:$0xff] }
 0x15d   : > { %v733_v41 = vadd.f32 %v4894_v30, %v732_v21  ;;  %v3390_v33 = vmul.f32 -1.442695, %v4950_v63  ;;  %v3794_v43 = vpop.eup %3793  ;;  %v4985_v44 = vadd.f32 1.0, %v3792_v59  ;;  %v741_v1 = vor.u32 1.1754944e-38, %v740_v42  ;;  %2363 = vmatpush.msra.mxu2 %v2130_v48 }
 0x15e   : > { %2309 = vmatpush.msra.mxu1 %v2103_v18  ;;  %v978_v50 = vstv %s4957_s13  ;;  %vm6344_vm4 = vcmp.lt.s32.totalorder %v4947_v13, 1  ;;  %v4991_v40 = vmul.f32 %v877_v6, %v4681_v37  ;;  %v6323_v56 = vrot.slane %v4960_v38, 7  ;;  %2497 = vmatpush.msrb.mxu3 %v2158_v55  ;;  %v2157_v18 = vld [vmem:[#allocation12 + $0x248] sm:$0xff]  ;;  %s4068_s13 = sshra.s32 %s3188_s9, 4  ;;  %s4069_s13 = int_to_ptr.hbm [resolvable:$true] %s4068_s13 }
 0x15f   : > { %v737_v61 = vsel %vm4971_vm2, %v4894_v30, %v733_v41  ;;  %3797 = vpow2.f32 %v3390_v33  ;;  %v4998_v30 = vsel %vm6344_vm4, %v6322_v7, %v1320_v5  ;;  %v3796_v57 = vpop.eup %3795  ;;  %v954_v51 = vand.u32 2147483647, %v4979_v39  ;;  %v2155_v41 = vld [vmem:[#allocation12 + $0x238] sm:$0xff]  ;;  %s4070_s3 = scalar_lea.hbm %s4069_s13, 128  ;;  %p4075_p13 = scmp.lt.s32.totalorder %s4069_s13, %s6564_s22 }
 0x160   : > { %2310 = vmatpush.msra.mxu1 %v2102_v62  ;;  %3799 = vrcp.f32 %v4979_v39  ;;  %v742_v58 = vsel %vm4975_vm3, %v741_v1, %v737_v61  ;;  %v5004_v37 = vadd.f32 1.0, %v3794_v43  ;;  %v956_v0 = vand.u32 2147483648, %v4979_v39  ;;  %2498 = vmatpush.msrb.mxu3 %v2157_v18  ;;  %v2120_v43 = vld [vmem:[#allocation12 + $0x120] sm:$0xff]  ;;  %p4071_p2 = scmp.ne.s32.totalorder %s4069_s13, %s4070_s3  ;;  %p4076_p0 = scmp.lt.s32.totalorder %s4074_s10, %s4070_s3 }
 0x161   : > { %3801 = vrcp.f32 %v4985_v44  ;;  %v5007_v21 = vadd.f32 1.0, %v3796_v57  ;;  %vm5009_vm5 = vcmp.ne.s32.totalorder %v1120_v45, 0  ;;  %v6433_v12 = vmov 0  ;;  %v2154_v45 = vld [vmem:[#allocation12 + $0x230] sm:$0xff] }
 0x162   : > { %2311 = vmatpush.msra.mxu1 %v2101_v8  ;;  %v6434_v12 = vsel %vm5009_vm5, 4294967295, %v6433_v12  ;;  %v5014_v16 = vrot.slane %v4781_v15, 7  ;;  %v753_v22 = vand.u32 2147483647, %v4985_v44  ;;  %3803 = vrcp.f32 %v5004_v37  ;;  %3439 = vmatmul.msk.f32.vlgmr.msra.gmra.mxu3 %vm5009_vm5, %v4998_v30  ;;  %v2129_v8 = vld [vmem:[#allocation12 + $0x168] sm:$0xff]  ;;  %p4072_p8 = pnand %p4071_p2, %p4455_p5  ;;  %p4077_p4 = por %p4076_p0, %p4075_p13 }
 0x163   : > { %6435 = vst [vmem:[#allocation32_spill] sm:$0xff] %v6434_v12  ;;  %v1078_v23 = vand.u32 15, %v4947_v13  ;;  %v5024_v62 = vmul.f32 %v742_v58, %v4692_v54  ;;  %v755_v27 = vand.u32 2147483648, %v4985_v44  ;;  %3805 = vrcp.f32 %v5007_v21  ;;  %2364 = vmatpush.msra.mxu2 %v2129_v8  ;;  %2499 = vmatpush.msrb.mxu3 %v2156_v3 }
 0x164   : > { %2312 = vmatpush.msra.mxu1 %v2100_v9  ;;  %v5032_v17 = vsel %vm6344_vm4, %v1320_v5, %v6323_v56  ;;  %vm950_vm6 = vweird.f32 %v4979_v39  ;;  %vm749_vm7 = vweird.f32 %v4985_v44  ;;  %vm5044_vm8 = vcmp.eq.f32.partialorder %v954_v51, 8.507059e+37  ;;  %p4073_p9 = pneg %p4072_p8 }
 0x165   : > { %v3798_v42 = vpop.eup %3797  ;;  %v957_v5 = vor.u32 1.1754944e-38, %v956_v0  ;;  %v969_v35 = vand.u32 2147483647, %v5004_v37  ;;  %v971_v34 = vand.u32 2147483648, %v5004_v37  ;;  %vm5050_vm9 = vcmp.eq.s32.totalorder %v978_v50, 1  ;;  %2500 = vmatpush.msrb.mxu3 %v2155_v41 }
 0x166   : > { %v5034_v32 = vpop.eup %3799  ;;  %v5038_v33 = vadd.f32 1.0, %v3798_v42  ;;  %vm5056_vm10 = vcmp.eq.f32.partialorder %v753_v22, 8.507059e+37  ;;  %v768_v52 = vand.u32 2147483647, %v5007_v21  ;;  %v756_v9 = vor.u32 1.1754944e-38, %v755_v27  ;;  %p4078_p10 = pnand %p4077_p4, %p4073_p9 }
 0x167   : > { %v5040_v54 = vpop.eup %3801  ;;  %v946_v59 = vmul.f32 %v5034_v32, %v4979_v39  ;;  %vm965_vm11 = vweird.f32 %v5004_v37  ;;  %v770_v50 = vand.u32 2147483648, %v5007_v21  ;;  %vm951_vm12 = vweird.f32 %v5034_v32  ;;  %2501 = vmatpush.msrb.mxu3 %v2154_v45 }
 0x168   : > { %v745_v61 = vmul.f32 %v5040_v54, %v4985_v44  ;;  %3807 = vrcp.f32 %v5038_v33  ;;  %v5064_v55 = vpop.eup %3803  ;;  %vm764_vm13 = vweird.f32 %v5007_v21  ;;  %v5069_v58 = vrot.slane %v4991_v40, 7  ;;  %vm5106_vm3 = vmor %vm950_vm6, %vm951_vm12 }
 0x169   : > { %v947_v1 = vsub.f32 1.0, %v946_v59  ;;  %v1066_v51 = vadd.s32 64, %v4947_v13  ;;  %v5072_v0 = vpop.eup %3805  ;;  %v961_v48 = vmul.f32 %v5064_v55, %v5004_v37  ;;  %vm5077_vm14 = vcmp.eq.f32.partialorder %v969_v35, 8.507059e+37  ;;  %v2128_v59 = vld [vmem:[#allocation12 + $0x160] sm:$0xff]  ;;  %v2127_v35 = vld [vmem:[#allocation12 + $0x158] sm:$0xff] }
 0x16a   : > { %v746_v57 = vsub.f32 1.0, %v745_v61  ;;  %6442 = vst [vmem:[#allocation33_spill] sm:$0xff] %v5069_v58  ;;  %v972_v42 = vor.u32 1.1754944e-38, %v971_v34  ;;  %vm5081_vm15 = vcmp.ne.s32.totalorder %v1078_v23, 0  ;;  %vm750_vm0 = vweird.f32 %v5040_v54  ;;  %2269 = vmatmul.f32.gmra.mxu3 %v5032_v17  ;;  %2365 = vmatpush.msra.mxu2 %v2128_v59 }
 0x16b   : > { %v948_v18 = vmul.f32 %v5034_v32, %v947_v1  ;;  %v760_v3 = vmul.f32 %v5072_v0, %v5007_v21  ;;  %vm5089_vm1 = vcmp.eq.f32.partialorder %v768_v52, 8.507059e+37  ;;  %v962_v34 = vsub.f32 1.0, %v961_v48  ;;  %vm751_vm6 = vmor %vm749_vm7, %vm750_vm0 }
 0x16c   : > { %v747_v8 = vmul.f32 %v5040_v54, %v746_v57  ;;  %vm966_vm2 = vweird.f32 %v5064_v55  ;;  %v1603_v1 = vsel %vm6344_vm4, %v5069_v58, %v5014_v16  ;;  %v1134_v59 = vand.u32 15, %v1066_v51  ;;  %2366 = vmatpush.msra.mxu2 %v2127_v35 }
 0x16d   : > { %v949_v23 = vadd.f32 %v5034_v32, %v948_v18  ;;  %v761_v48 = vsub.f32 1.0, %v760_v3  ;;  %3467 = vmatmul.msk.f32.vlgmr.msrb.gmra.mxu0 %vm5081_vm15, %v1603_v1  ;;  %v1322_v7 = vrot.slane %v5024_v62, 7  ;;  %v963_v39 = vmul.f32 %v5064_v55, %v962_v34  ;;  %vm967_vm7 = vmor %vm965_vm11, %vm966_vm2 }
 0x16e   : > { %v5100_v57 = vpop.eup %3807  ;;  %v748_v18 = vadd.f32 %v5040_v54, %v747_v8  ;;  %vm765_vm12 = vweird.f32 %v5072_v0  ;;  %v2126_v8 = vld [vmem:[#allocation12 + $0x150] sm:$0xff]  ;;  %v771_v6 = vor.u32 1.1754944e-38, %v770_v50  ;;  %v5173_v21 = vrot.slane %v4897_v14, 7  ;;  %v2124_v50 = vld [vmem:[#allocation12 + $0x140] sm:$0xff] }
 0x16f   : > { %v953_v56 = vsel %vm5106_vm3, %v5034_v32, %v949_v23  ;;  %v775_v51 = vmul.f32 %v5100_v57, %v5038_v33  ;;  %v762_v32 = vmul.f32 %v5072_v0, %v761_v48  ;;  %2367 = vmatpush.msra.mxu2 %v2126_v8  ;;  %v964_v34 = vadd.f32 %v5064_v55, %v963_v39 }
 0x170   : > { %v958_v3 = vsel %vm5044_vm8, %v957_v5, %v953_v56  ;;  %v752_v35 = vsel %vm751_vm6, %v5040_v54, %v748_v18  ;;  %vm5149_vm8 = vcmp.ne.s32.totalorder %v1134_v59, 0  ;;  %v6452_v54 = vmov 0 }
 0x171   : > { %v975_v44 = vmul.f32 %v958_v3, %v4881_v24  ;;  %v757_v23 = vsel %vm5056_vm10, %v756_v9, %v752_v35  ;;  %v776_v1 = vsub.f32 1.0, %v775_v51  ;;  %v763_v56 = vadd.f32 %v5072_v0, %v762_v32  ;;  %vm766_vm10 = vmor %vm764_vm13, %vm765_vm12  ;;  %v2125_v9 = vld [vmem:[#allocation12 + $0x148] sm:$0xff]  ;;  %v2123_v35 = vld [vmem:[#allocation12 + $0x138] sm:$0xff] }
 0x172   : > { %v5134_v52 = vmul.f32 %v757_v23, %v4889_v28  ;;  %v6451_v24 = vrot.slane %v4960_v38, 7  ;;  %v6453_v54 = vsel %vm5149_vm8, 4294967295, %v6452_v54  ;;  %v968_v37 = vsel %vm967_vm7, %v5064_v55, %v964_v34  ;;  %2368 = vmatpush.msra.mxu2 %v2125_v9  ;;  %v2153_v32 = vld [vmem:[#allocation12 + $0x228] sm:$0xff] }
 0x173   : > { %6454 = vst [vmem:[#allocation34_spill] sm:$0xff] %v6453_v54  ;;  %v5155_v28 = vsel %vm5050_vm9, %v975_v44, 0.0  ;;  %v777_v5 = vmul.f32 %v5100_v57, %v776_v1  ;;  %3448 = vmatmul.msk.f32.vlgmr.msra.gmra.mxu1 %vm5050_vm9, %v975_v44  ;;  %v973_v48 = vsel %vm5077_vm14, %v972_v42, %v968_v37  ;;  %v767_v55 = vsel %vm766_vm10, %v5072_v0, %v763_v56  ;;  %v2122_v44 = vld [vmem:[#allocation12 + $0x130] sm:$0xff]  ;;  %v2181_v54 = vld [vmem:[#allocation12 + $0x308] sm:$0xff] }
 0x174   : > { %v5147_v41 = vsel %vm6344_vm4, %v6451_v24, %v1322_v7  ;;  %v1314_v18 = vrot.slane %v5155_v28, 7  ;;  %v976_v59 = vmul.f32 %v973_v48, %v4892_v47  ;;  %v772_v39 = vsel %vm5089_vm1, %v771_v6, %v767_v55  ;;  %2369 = vmatpush.msra.mxu2 %v2124_v50  ;;  %2502 = vmatpush.msrb.mxu3 %v2153_v32  ;;  %v2152_v55 = vld [vmem:[#allocation12 + $0x220] sm:$0xff]  ;;  %v2118_v32 = vld [vmem:[#allocation12 + $0x110] sm:$0xff] }
 0x175   : > { %3441 = vmatmul.msk.f32.gmra.mxu3 %vm5149_vm8, %v5147_v41  ;;  %v6455_v51 = vrot.slane %v4784_v46, 7  ;;  %v1323_v22 = vrot.slane %v5134_v52, 7  ;;  %v5187_v42 = vadd.f32 1.0, %v4809_v31  ;;  %vm779_vm11 = vweird.f32 %v5038_v33 }
 0x176   : > { %v1346_v47 = vsel %vm6344_vm4, %v5173_v21, %v1314_v18  ;;  %v1060_v61 = vadd.s32 16, %v4947_v13  ;;  %v5197_v8 = vsel %vm5050_vm9, %v976_v59, 0.0  ;;  %v778_v3 = vadd.f32 %v5100_v57, %v777_v5  ;;  %2370 = vmatpush.msra.mxu2 %v2123_v35  ;;  %2503 = vmatpush.msrb.mxu3 %v2152_v55  ;;  %v2119_v35 = vld [vmem:[#allocation12 + $0x118] sm:$0xff] }
 0x177   : > { %v5183_v0 = vsel %vm6344_vm4, %v5014_v16, %v6455_v51  ;;  %vm780_vm13 = vweird.f32 %v5100_v57  ;;  %3433 = vmatmul.msk.f32.vlgmr.msrb.gmra.mxu2 %vm5081_vm15, %v1346_v47  ;;  %v1068_v31 = vadd.s32 80, %v4947_v13  ;;  %v5205_v23 = vmul.f32 %v772_v39, %v4925_v49 }
 0x178   : > { %2446 = vmatmul.f32.gmra.mxu0 %v5183_v0  ;;  %v783_v34 = vand.u32 2147483647, %v5038_v33  ;;  %v785_v1 = vand.u32 2147483648, %v5038_v33  ;;  %v1092_v56 = vand.u32 15, %v1060_v61  ;;  %v5215_v24 = vsel %vm6344_vm4, %v1322_v7, %v1323_v22  ;;  %vm5228_vm14 = vmor %vm779_vm11, %vm780_vm13  ;;  %2371 = vmatpush.msra.mxu2 %v2122_v44  ;;  %v2121_v33 = vld [vmem:[#allocation12 + $0x128] sm:$0xff]  ;;  %v2151_v44 = vld [vmem:[#allocation12 + $0x218] sm:$0xff] }
 0x179   : > { %6456 = vst [vmem:[#allocation35_spill] sm:$0xff] %v5215_v24  ;;  %v5218_v37 = vrot.slane %v4789_v19, 7  ;;  %v1315_v49 = vrot.slane %v5197_v8, 7  ;;  %v1148_v6 = vand.u32 15, %v1068_v31  ;;  %v791_v5 = vsub.f32 1.0, %v4774_v11  ;;  %2504 = vmatpush.msrb.mxu3 %v2151_v44 }
 0x17a   : > { %v805_v45 = vmul.f32 %v4802_v29, %v4743_v36  ;;  %v5233_v7 = vadd.s32 32, %v4947_v13  ;;  %3809 = vrcp.f32 %v5187_v42  ;;  %v782_v11 = vsel %vm5228_vm14, %v5100_v57, %v778_v3  ;;  %2372 = vmatpush.msra.mxu2 %v2121_v33  ;;  %v2116_v33 = vld [vmem:[#allocation12 + $0x100] sm:$0xff] }
 0x17b   : > { %3449 = vmatmul.msk.f32.gmra.mxu1 %vm5050_vm9, %v976_v59  ;;  %vm5241_vm0 = vcmp.ne.s32.totalorder %v1092_v56, 0  ;;  %v786_v50 = vor.u32 1.1754944e-38, %v785_v1  ;;  %v1345_v39 = vsel %vm6344_vm4, %v1314_v18, %v1315_v49  ;;  %v5250_v47 = vadd.s32 96, %v4947_v13 }
 0x17c   : > { %v1106_v51 = vand.u32 15, %v5233_v7  ;;  %vm784_vm9 = vcmp.eq.f32.partialorder %v783_v34, 8.507059e+37  ;;  %v6461_v57 = vrot.slane %v4784_v46, 7  ;;  %v1324_v61 = vrot.slane %v5205_v23, 7  ;;  %2373 = vmatpush.msra.mxu2 %v2120_v43 }
 0x17d   : > { %2275 = vmatmul.f32.gmra.mxu3 %v5215_v24  ;;  %v787_v3 = vsel %vm784_vm9, %v786_v50, %v782_v11  ;;  %v1162_v18 = vand.u32 15, %v5250_v47  ;;  %v792_v31 = vmul.f32 %v4714_v20, %v791_v5  ;;  %v806_v34 = vsub.f32 1.0, %v805_v45 }
 0x17e   : > { %v5257_v59 = vsel %vm6344_vm4, %v6461_v57, %v5218_v37  ;;  %2374 = vmatpush.msra.mxu2 %v2119_v35  ;;  %v5268_v56 = vmul.f32 %v787_v3, %v4950_v63  ;;  %v5274_v9 = vsel %vm6344_vm4, %v1323_v22, %v1324_v61  ;;  %vm5276_vm1 = vcmp.ne.s32.totalorder %v1148_v6, 0  ;;  %v2117_v63 = vld [vmem:[#allocation12 + $0x108] sm:$0xff] }
 0x17f   : > { %2251 = vmatmul.f32.gmra.mxu2 %v1345_v39  ;;  %6462 = vst [vmem:[#allocation36_spill] sm:$0xff] %v5274_v9  ;;  %v6463_v5 = vmov 0  ;;  %v800_v7 = vand.u32 2147483648, %v4673_v26  ;;  %v793_v45 = vadd.f32 %v4714_v20, %v792_v31  ;;  %vm794_vm2 = vweird.f32 %v4673_v26 }
 0x180   : > { %3469 = vmatmul.msk.f32.gmra.mxu0 %vm5241_vm0, %v5257_v59  ;;  %v5265_v1 = vpop.eup %3809  ;;  %v6464_v5 = vsel %vm5276_vm1, 4294967295, %v6463_v5  ;;  %2375 = vmatpush.msra.mxu2 %v2118_v32  ;;  %vm795_vm3 = vweird.f32 %v4714_v20  ;;  %v5286_v11 = vadd.s32 112, %v4947_v13  ;;  %v798_v22 = vand.u32 2147483647, %v4673_v26  ;;  %v2150_v32 = vld [vmem:[#allocation12 + $0x210] sm:$0xff] }
 0x181   : > { %6465 = vst [vmem:[#allocation37_spill] sm:$0xff] %v6464_v5  ;;  %v807_v6 = vmul.f32 %v4802_v29, %v806_v34  ;;  %v820_v55 = vmul.f32 %v5265_v1, %v5187_v42  ;;  %v6466_v50 = vrot.slane %v4884_v25, 7  ;;  %v1325_v26 = vrot.slane %v5268_v56, 7  ;;  %vm5304_vm6 = vmor %vm794_vm2, %vm795_vm3  ;;  %2505 = vmatpush.msrb.mxu3 %v2150_v32 }
 0x182   : > { %2376 = vmatpush.msra.mxu2 %v2117_v63  ;;  %v1176_v43 = vand.u32 15, %v5286_v11  ;;  %v801_v3 = vor.u32 1.1754944e-38, %v800_v7  ;;  %v1344_v31 = vsel %vm6344_vm4, %v1315_v49, %v5014_v16  ;;  %v797_v35 = vsel %vm5304_vm6, %v4714_v20, %v793_v45  ;;  %v2149_v63 = vld [vmem:[#allocation12 + $0x208] sm:$0xff] }
 0x183   : > { %2319 = vmatmul.f32.gmra.mxu1 %v4781_v15  ;;  %v5300_v39 = vsel %vm6344_vm4, %v5218_v37, %v6466_v50  ;;  %vm799_vm12 = vcmp.eq.f32.partialorder %v798_v22, 8.507059e+37  ;;  %vm809_vm7 = vweird.f32 %v4743_v36  ;;  %v815_v44 = vand.u32 2147483648, %v4743_v36  ;;  %2506 = vmatpush.msrb.mxu3 %v2149_v63  ;;  %v2177_v11 = vld [vmem:[#allocation12 + $0x2e8] sm:$0xff] }
 0x184   : > { %2377 = vmatpush.msra.mxu2 %v2116_v33  ;;  %v808_v34 = vadd.f32 %v4802_v29, %v807_v6  ;;  %vm810_vm10 = vweird.f32 %v4802_v29  ;;  %v821_v16 = vsub.f32 1.0, %v820_v55  ;;  %v5323_v49 = vsel %vm6344_vm4, %v1324_v61, %v1325_v26  ;;  %v2195_v55 = vld [vmem:[#allocation12 + $0x378] sm:$0xff] }
 0x185   : > { %3443 = vmatmul.msk.f32.gmra.mxu3 %vm5276_vm1, %v5274_v9  ;;  %6469 = vst [vmem:[#allocation38_spill] sm:$0xff] %v5323_v49  ;;  %v802_v20 = vsel %vm799_vm12, %v801_v3, %v797_v35  ;;  %v813_v7 = vand.u32 2147483647, %v4743_v36  ;;  %vm5327_vm11 = vcmp.ne.s32.totalorder %v1106_v51, 0  ;;  %v6470_v45 = vmov 0  ;;  %vm811_vm13 = vmor %vm809_vm7, %vm810_vm10  ;;  %v2148_v51 = vld [vmem:[#allocation12 + $0x200] sm:$0xff] }
 0x186   : > { %v6471_v45 = vsel %vm5327_vm11, 4294967295, %v6470_v45  ;;  %v816_v22 = vor.u32 1.1754944e-38, %v815_v44  ;;  %v5333_v6 = vmul.f32 %v802_v20, %v4634_v60  ;;  %v812_v61 = vsel %vm811_vm13, %v4802_v29, %v808_v34  ;;  %2507 = vmatpush.msrb.mxu3 %v2148_v51  ;;  %2622 = vmatpush.msrb.mxu2 %v2195_v55  ;;  %v2211_v34 = vld [vmem:[#allocation12 + $0x3f8] sm:$0xff]  ;;  %v5395_v51 = vld [vmem:[%s6401_s17] ss:$0 sm:$0xff] }
 0x187   : > { %3435 = vmatmul.msk.f32.gmra.mxu2 %vm5241_vm0, %v1344_v31  ;;  %6472 = vst [vmem:[#allocation39_spill] sm:$0xff] %v6471_v45  ;;  %v822_v33 = vmul.f32 %v5265_v1, %v821_v16  ;;  %v5341_v36 = vadd.s32 8, %v4947_v13  ;;  %vm814_vm14 = vcmp.eq.f32.partialorder %v813_v7, 8.507059e+37  ;;  %vm824_vm9 = vweird.f32 %v5187_v42  ;;  %2687 = vmatpush.msra.mxu0 %v2211_v34  ;;  %v2226_v7 = vld [vmem:[#allocation12 + $0x470] sm:$0xff]  ;;  %v2224_v34 = vld [vmem:[#allocation12 + $0x460] sm:$0xff] }
 0x188   : > { %2452 = vmatmul.f32.gmra.mxu0 %v5300_v39  ;;  %v817_v50 = vsel %vm814_vm14, %v816_v22, %v812_v61  ;;  %v830_v60 = vand.u32 2147483648, %v5187_v42  ;;  %vm825_vm2 = vweird.f32 %v5265_v1  ;;  %v1326_v3 = vrot.slane %v5333_v6, 7  ;;  %v2193_v22 = vld [vmem:[#allocation12 + $0x368] sm:$0xff]  ;;  %v2210_v61 = vld [vmem:[#allocation12 + $0x3f0] sm:$0xff] }
 0x189   : > { %v1085_v29 = vand.u32 15, %v5341_v36  ;;  %v823_v57 = vadd.f32 %v5265_v1, %v822_v33  ;;  %vm5352_vm3 = vcmp.ne.s32.totalorder %v1162_v18, 0  ;;  %v5357_v31 = vmul.f32 %v817_v50, %v4659_v10  ;;  %vm826_vm6 = vmor %vm824_vm9, %vm825_vm2  ;;  %v2179_v10 = vld [vmem:[#allocation12 + $0x2f8] sm:$0xff]  ;;  %2688 = vmatpush.msra.mxu0 %v2210_v61 }
 0x18a   : > { %v828_v35 = vand.u32 2147483647, %v5187_v42  ;;  %v5363_v32 = vsel %vm6344_vm4, %v1325_v26, %v1326_v3  ;;  %v831_v44 = vor.u32 1.1754944e-38, %v830_v60  ;;  %v2227_v18 = vld [vmem:[#allocation12 + $0x478] sm:$0xff]  ;;  %2557 = vmatpush.msrb.mxu1 %v2179_v10  ;;  %v2194_v26 = vld [vmem:[#allocation12 + $0x370] sm:$0xff]  ;;  %v5387_v63 = vadd.s32 24, %v4947_v13 }
 0x18b   : > { %2322 = vmatmul.f32.gmra.mxu1 %v4784_v46  ;;  %6476 = vst [vmem:[#allocation41_spill] sm:$0xff] %v5363_v32  ;;  %v827_v47 = vsel %vm826_vm6, %v5265_v1, %v823_v57  ;;  %v1327_v42 = vrot.slane %v5357_v31, 7  ;;  %2752 = vmatpush.msra.mxu3 %v2227_v18  ;;  %v5399_v55 = vadd.f32 %v5395_v51, %v4644_v4  ;;  %vm5403_vm7 = vcmp.ne.s32.totalorder %v1176_v43, 0  ;;  %v2225_v43 = vld [vmem:[#allocation12 + $0x468] sm:$0xff]  ;;  %v2191_v36 = vld [vmem:[#allocation12 + $0x358] sm:$0xff] }
 0x18c   : > { %vm829_vm12 = vcmp.eq.f32.partialorder %v828_v35, 8.507059e+37  ;;  %2623 = vmatpush.msrb.mxu2 %v2194_v26  ;;  %v1099_v33 = vand.u32 15, %v5387_v63  ;;  %v6478_v50 = vmov 0  ;;  %v1460_v60 = vrot.slane %v5197_v8, 1  ;;  %v2192_v35 = vld [vmem:[#allocation12 + $0x360] sm:$0xff] }
 0x18d   : > { %2281 = vmatmul.f32.gmra.mxu3 %v5323_v49  ;;  %v832_v16 = vsel %vm829_vm12, %v831_v44, %v827_v47  ;;  %v5380_v20 = vsel %vm6344_vm4, %v1326_v3, %v1327_v42  ;;  %v6479_v50 = vsel %vm5403_vm7, 4294967295, %v6478_v50  ;;  %v6324_v3 = vrot.slane %v5155_v28, 1  ;;  %v2209_v44 = vld [vmem:[#allocation12 + $0x3e8] sm:$0xff]  ;;  %v2176_v26 = vld [vmem:[#allocation12 + $0x2e0] sm:$0xff] }
 0x18e   : > { %v5375_v1 = vmul.f32 %v832_v16, %v4702_v2  ;;  %6477 = vst [vmem:[#allocation42_spill] sm:$0xff] %v5380_v20  ;;  %2753 = vmatpush.msra.mxu3 %v2226_v7  ;;  %2624 = vmatpush.msrb.mxu2 %v2193_v22  ;;  %v3395_v4 = vmul.f32 -1.442695, %v5399_v55  ;;  %vm6347_vm10 = vcmp.lt.s32.totalorder %v4947_v13, 7  ;;  %v5432_v10 = vrot.slane %v4781_v15, 1 }
 0x18f   : > { %2257 = vmatmul.f32.gmra.mxu2 %v5183_v0  ;;  %v6473_v0 = vmov 0  ;;  %6480 = vst [vmem:[#allocation43_spill] sm:$0xff] %v6479_v50  ;;  %v1490_v8 = vsel %vm6347_vm10, %v6324_v3, %v1460_v60  ;;  %2689 = vmatpush.msra.mxu0 %v2209_v44  ;;  %vm5436_vm13 = vcmp.ne.s32.totalorder %v1085_v29, 15  ;;  %v5447_v16 = vadd.s32 40, %v4947_v13  ;;  %v2208_v29 = vld [vmem:[#allocation12 + $0x3e0] sm:$0xff] }
 0x190   : > { %3471 = vmatmul.msk.f32.gmra.mxu0 %vm5327_vm11, %v4998_v30  ;;  %v6474_v0 = vsel %vm5352_vm3, 4294967295, %v6473_v0  ;;  %v1328_v2 = vrot.slane %v5375_v1, 7  ;;  %2754 = vmatpush.msra.mxu3 %v2225_v43  ;;  %3811 = vpow2.f32 %v3395_v4  ;;  %6483 = vst [vmem:[#allocation46_spill] sm:$0xff] %v5432_v10  ;;  %v1462_v22 = vrot.slane %v4784_v46, 1  ;;  %v2223_v4 = vld [vmem:[#allocation12 + $0x458] sm:$0xff]  ;;  %v2190_v43 = vld [vmem:[#allocation12 + $0x350] sm:$0xff] }
 0x191   : > { %6475 = vst [vmem:[#allocation40_spill] sm:$0xff] %v6474_v0  ;;  %2625 = vmatpush.msrb.mxu2 %v2192_v35  ;;  %2690 = vmatpush.msra.mxu0 %v2208_v29  ;;  %v2205_v35 = vld [vmem:[#allocation12 + $0x3c8] sm:$0xff]  ;;  %vm5474_vm14 = vcmp.ne.s32.totalorder %v1099_v33, 15  ;;  %v2203_v33 = vld [vmem:[#allocation12 + $0x3b8] sm:$0xff]  ;;  %v2168_v3 = vld [vmem:[#allocation12 + $0x2a0] sm:$0xff]  ;;  %v1466_v0 = vrot.slane %v4960_v38, 1 }
 0x192   : > { %v5411_v57 = vsel %vm6344_vm4, %v1327_v42, %v1328_v2  ;;  %v5428_v47 = vsel %vm6344_vm4, %v1328_v2, %v5173_v21  ;;  %v1489_v42 = vsel %vm6347_vm10, %v1460_v60, %v5432_v10  ;;  %2755 = vmatpush.msra.mxu3 %v2224_v34  ;;  %v5462_v61 = vsel %vm6347_vm10, %v5432_v10, %v1462_v22  ;;  %v2175_v60 = vld [vmem:[#allocation12 + $0x2d8] sm:$0xff]  ;;  %v2173_v29 = vld [vmem:[#allocation12 + $0x2c8] sm:$0xff]  ;;  %v5666_v10 = vld [vmem:[%s6507_s29] ss:$0 sm:$0xff] }
 0x193   : > { %2325 = vmatmul.f32.gmra.mxu1 %v4789_v19  ;;  %6481 = vst [vmem:[#allocation44_spill] sm:$0xff] %v5411_v57  ;;  %2626 = vmatpush.msrb.mxu2 %v2191_v36  ;;  %v2222_v36 = vld [vmem:[#allocation12 + $0x450] sm:$0xff] }
 0x194   : > { %6482 = vst [vmem:[#allocation45_spill] sm:$0xff] %v5428_v47  ;;  %2756 = vmatpush.msra.mxu3 %v2223_v4  ;;  %v2189_v4 = vld [vmem:[#allocation12 + $0x348] sm:$0xff] }
 0x195   : > { %3445 = vmatmul.msk.f32.gmra.mxu3 %vm5352_vm3, %v5363_v32  ;;  %2627 = vmatpush.msrb.mxu2 %v2190_v43 }
 0x196   : > { %2757 = vmatpush.msra.mxu3 %v2222_v36 }
 0x197   : > { %3437 = vmatmul.msk.f32.gmra.mxu2 %vm5327_vm11, %v5257_v59  ;;  %v2178_v59 = vld [vmem:[#allocation12 + $0x2f0] sm:$0xff] }
 0x198   : > { %2458 = vmatmul.f32.gmra.mxu0 %v5032_v17  ;;  %2558 = vmatpush.msrb.mxu1 %v2178_v59  ;;  %v3812_v59 = vpop.eup %3811 }
 0x199   : > { %v5452_v2 = vadd.f32 1.0, %v3812_v59  ;;  %v2174_v59 = vld [vmem:[#allocation12 + $0x2d0] sm:$0xff]  ;;  %2628 = vmatpush.msrb.mxu2 %v2189_v4  ;;  %v2169_v4 = vld [vmem:[#allocation12 + $0x2a8] sm:$0xff] }
 0x19a   : > { %2559 = vmatpush.msrb.mxu1 %v2177_v11  ;;  %v2206_v11 = vld [vmem:[#allocation12 + $0x3d0] sm:$0xff] }
 0x19b   : > { %2328 = vmatmul.f32.gmra.mxu1 %v4884_v25  ;;  %3813 = vrcp.f32 %v5452_v2  ;;  %vm854_vm9 = vweird.f32 %v5452_v2 }
 0x19c   : > { %2560 = vmatpush.msrb.mxu1 %v2176_v26  ;;  %v2204_v26 = vld [vmem:[#allocation12 + $0x3c0] sm:$0xff] }
 0x19d   : > { %2287 = vmatmul.f32.gmra.mxu3 %v5380_v20 }
 0x19e   : > { %2561 = vmatpush.msrb.mxu1 %v2175_v60  ;;  %v2202_v60 = vld [vmem:[#allocation12 + $0x3b0] sm:$0xff] }
 0x19f   : > { %2263 = vmatmul.f32.gmra.mxu2 %v5300_v39 }
 0x1a0   : > { %3473 = vmatmul.msk.f32.gmra.mxu0 %vm5009_vm5, %v5147_v41  ;;  %2562 = vmatpush.msrb.mxu1 %v2174_v59  ;;  %v2200_v59 = vld [vmem:[#allocation12 + $0x3a0] sm:$0xff] }
 0x1a1   : > { %v5469_v44 = vpop.eup %3813 }
 0x1a2   : > { %v850_v63 = vmul.f32 %v5469_v44, %v5452_v2  ;;  %2563 = vmatpush.msrb.mxu1 %v2173_v29  ;;  %vm855_vm2 = vweird.f32 %v5469_v44 }
 0x1a3   : > { %2331 = vmatmul.f32.gmra.mxu1 %v4928_v53  ;;  %vm5520_vm12 = vmor %vm854_vm9, %vm855_vm2 }
 0x1a4   : > { %v851_v43 = vsub.f32 1.0, %v850_v63  ;;  %v2221_v63 = vld [vmem:[#allocation12 + $0x448] sm:$0xff] }
 0x1a5   : > { %3447 = vmatmul.msk.f32.gmra.mxu3 %vm5403_vm7, %v5411_v57 }
 0x1a6   : > { %v852_v29 = vmul.f32 %v5469_v44, %v851_v43  ;;  %2758 = vmatpush.msra.mxu3 %v2221_v63  ;;  %v2197_v43 = vld [vmem:[#allocation12 + $0x388] sm:$0xff] }
 0x1a7   : > { %2378 = vmatmul.f32.vlgmr.msra.gmra.mxu2 %v1490_v8  ;;  %v2207_v8 = vld [vmem:[#allocation12 + $0x3d8] sm:$0xff] }
 0x1a8   : > { %2464 = vmatmul.f32.gmra.mxu0 %v5215_v24  ;;  %v853_v7 = vadd.f32 %v5469_v44, %v852_v29  ;;  %v858_v29 = vand.u32 2147483647, %v5452_v2 }
 0x1a9   : > { %2691 = vmatpush.msra.mxu0 %v2207_v8  ;;  %v2172_v8 = vld [vmem:[#allocation12 + $0x2c0] sm:$0xff] }
 0x1aa   : > { %2564 = vmatpush.msrb.mxu1 %v2172_v8  ;;  %v2198_v8 = vld [vmem:[#allocation12 + $0x390] sm:$0xff]  ;;  %vm859_vm9 = vcmp.eq.f32.partialorder %v858_v29, 8.507059e+37  ;;  %v5551_v29 = vpop.f32.mrf.mxu2 }
 0x1ab   : > { %2334 = vmatmul.f32.gmra.mxu1 %v4960_v38  ;;  %2692 = vmatpush.msra.mxu0 %v2206_v11  ;;  %v1464_v11 = vrot.slane %v4884_v25, 1 }
 0x1ad   : > { %2293 = vmatmul.f32.gmra.mxu3 %v5428_v47  ;;  %2693 = vmatpush.msra.mxu0 %v2205_v35  ;;  %v2201_v35 = vld [vmem:[#allocation12 + $0x3a8] sm:$0xff] }
 0x1af   : > { %3451 = vmatmul.msk.f32.gmra.mxu2 %vm5436_vm13, %v1489_v42  ;;  %v6487_v42 = vmov 0  ;;  %2694 = vmatpush.msra.mxu0 %v2204_v26  ;;  %v2171_v26 = vld [vmem:[#allocation12 + $0x2b8] sm:$0xff] }
 0x1b0   : > { %3475 = vmatmul.msk.f32.gmra.mxu0 %vm5149_vm8, %v5274_v9  ;;  %v6488_v42 = vsel %vm5474_vm14, 4294967295, %v6487_v42  ;;  %2565 = vmatpush.msrb.mxu1 %v2171_v26  ;;  %v1465_v26 = vrot.slane %v4928_v53, 1 }
 0x1b1   : > { %6489 = vst [vmem:[#allocation48_spill] sm:$0xff] %v6488_v42  ;;  %2695 = vmatpush.msra.mxu0 %v2203_v33  ;;  %v2170_v33 = vld [vmem:[#allocation12 + $0x2b0] sm:$0xff] }
 0x1b2   : > { %2566 = vmatpush.msrb.mxu1 %v2170_v33  ;;  %v6490_v33 = vand.u32 15, %v5447_v16  ;;  %v5529_v16 = vsel %vm6347_vm10, %v1464_v11, %v1465_v26 }
 0x1b3   : > { %2337 = vmatmul.f32.gmra.mxu1 %v5024_v62  ;;  %2696 = vmatpush.msra.mxu0 %v2202_v60  ;;  %v2199_v60 = vld [vmem:[#allocation12 + $0x398] sm:$0xff] }
 0x1b4   : > { %2567 = vmatpush.msrb.mxu1 %v2169_v4  ;;  %vm5515_vm6 = vcmp.ne.s32.totalorder %v6490_v33, 15  ;;  %v2166_v4 = vld [vmem:[#allocation12 + $0x290] sm:$0xff]  ;;  %v1067_v33 = vadd.s32 72, %v4947_v13 }
 0x1b5   : > { %2508 = vmatmul.f32.vlgmr.msrb.gmra.mxu3 %v4781_v15  ;;  %v5466_v15 = vrot.slane %v4789_v19, 1  ;;  %2697 = vmatpush.msra.mxu0 %v2201_v35  ;;  %v2188_v35 = vld [vmem:[#allocation12 + $0x340] sm:$0xff] }
 0x1b6   : > { %2629 = vmatpush.msrb.mxu2 %v2188_v35  ;;  %2568 = vmatpush.msrb.mxu1 %v2168_v3  ;;  %v2220_v3 = vld [vmem:[#allocation12 + $0x440] sm:$0xff] }
 0x1b7   : > { %2384 = vmatmul.f32.gmra.mxu2 %v5462_v61  ;;  %6486 = vst [vmem:[#allocation47_spill] sm:$0xff] %v5466_v15  ;;  %v5484_v34 = vsel %vm6347_vm10, %v1462_v22, %v5466_v15  ;;  %v5502_v36 = vsel %vm6347_vm10, %v5466_v15, %v1464_v11  ;;  %2698 = vmatpush.msra.mxu0 %v2200_v59  ;;  %v860_v22 = vand.u32 2147483648, %v5452_v2  ;;  %v2167_v59 = vld [vmem:[#allocation12 + $0x298] sm:$0xff]  ;;  %v2164_v11 = vld [vmem:[#allocation12 + $0x280] sm:$0xff] }
 0x1b8   : > { %2470 = vmatmul.f32.gmra.mxu0 %v5323_v49  ;;  %2569 = vmatpush.msrb.mxu1 %v2167_v59  ;;  %v857_v2 = vsel %vm5520_vm12, %v5469_v44, %v853_v7  ;;  %v2187_v15 = vld [vmem:[#allocation12 + $0x338] sm:$0xff]  ;;  %v5547_v44 = vsel %vm6347_vm10, %v1465_v26, %v1466_v0 }
 0x1b9   : > { %2699 = vmatpush.msra.mxu0 %v2199_v60  ;;  %v2196_v60 = vld [vmem:[#allocation12 + $0x380] sm:$0xff]  ;;  %2759 = vmatpush.msra.mxu3 %v2220_v3 }
 0x1ba   : > { %2570 = vmatpush.msrb.mxu1 %v2166_v4  ;;  %2630 = vmatpush.msrb.mxu2 %v2187_v15  ;;  %v1467_v4 = vrot.slane %v5024_v62, 1 }
 0x1bb   : > { %2340 = vmatmul.f32.gmra.mxu1 %v5134_v52  ;;  %2700 = vmatpush.msra.mxu0 %v2198_v8  ;;  %v861_v8 = vor.u32 1.1754944e-38, %v860_v22  ;;  %v1141_v22 = vand.u32 15, %v1067_v33  ;;  %v2218_v33 = vld [vmem:[#allocation12 + $0x430] sm:$0xff] }
 0x1bc   : > { %v5572_v3 = vsel %vm6347_vm10, %v1466_v0, %v1467_v4 }
 0x1bd   : > { %2511 = vmatmul.f32.gmra.mxu3 %v4784_v46  ;;  %v5487_v46 = vadd.s32 56, %v4947_v13  ;;  %2701 = vmatpush.msra.mxu0 %v2197_v43  ;;  %v2165_v43 = vld [vmem:[#allocation12 + $0x288] sm:$0xff]  ;;  %v862_v59 = vsel %vm859_vm9, %v861_v8, %v857_v2  ;;  %vm5601_vm12 = vcmp.ne.s32.totalorder %v1141_v22, 15 }
 0x1be   : > { %2571 = vmatpush.msrb.mxu1 %v2165_v43  ;;  %v5542_v7 = vmul.f32 %v862_v59, %v5399_v55  ;;  %v2186_v55 = vld [vmem:[#allocation12 + $0x330] sm:$0xff]  ;;  %v2185_v43 = vld [vmem:[#allocation12 + $0x328] sm:$0xff] }
 0x1bf   : > { %3453 = vmatmul.msk.f32.gmra.mxu2 %vm5474_vm14, %v5484_v34  ;;  %2702 = vmatpush.msra.mxu0 %v2196_v60  ;;  %v2219_v60 = vld [vmem:[#allocation12 + $0x438] sm:$0xff]  ;;  %v6495_v35 = vand.u32 15, %v5487_v46  ;;  %v1069_v46 = vadd.s32 88, %v4947_v13 }
 0x1c0   : > { %3477 = vmatmul.msk.f32.gmra.mxu0 %vm5276_vm1, %v5363_v32  ;;  %2572 = vmatpush.msrb.mxu1 %v2164_v11  ;;  %v1586_v15 = vrot.slane %v5542_v7, 7  ;;  %v1006_v11 = vpop.f32.mrf.mxu2 }
 0x1c1   : > { %2760 = vmatpush.msra.mxu3 %v2219_v60  ;;  %vm5558_vm2 = vcmp.ne.s32.totalorder %v6495_v35, 15  ;;  %2631 = vmatpush.msrb.mxu2 %v2186_v55  ;;  %v1155_v2 = vand.u32 15, %v1069_v46  ;;  %v2217_v60 = vld [vmem:[#allocation12 + $0x428] sm:$0xff]  ;;  %v5592_v55 = vadd.f32 %v5395_v51, %v1006_v11  ;;  %v2184_v46 = vld [vmem:[#allocation12 + $0x320] sm:$0xff] }
 0x1c2   : > { %v5565_v8 = vsel %vm6344_vm4, %v5173_v21, %v1586_v15  ;;  %v1468_v21 = vrot.slane %v5134_v52, 1  ;;  %v5584_v0 = vsel %vm6344_vm4, %v1586_v15, %v5069_v58  ;;  %v2216_v11 = vld [vmem:[#allocation12 + $0x420] sm:$0xff] }
 0x1c3   : > { %2343 = vmatmul.f32.gmra.mxu1 %v5205_v23  ;;  %6498 = vst [vmem:[#allocation49_spill] sm:$0xff] %v5565_v8  ;;  %2761 = vmatpush.msra.mxu3 %v2218_v33  ;;  %v1469_v33 = vrot.slane %v5205_v23, 1  ;;  %v3400_v15 = vmul.f32 -1.442695, %v5592_v55  ;;  %vm5640_vm9 = vcmp.ne.s32.totalorder %v1155_v2, 15 }
 0x1c4   : > { %2632 = vmatpush.msrb.mxu2 %v2185_v43  ;;  %6499 = vst [vmem:[#allocation50_spill] sm:$0xff] %v5584_v0  ;;  %v5589_v59 = vsel %vm6347_vm10, %v1467_v4, %v1468_v21 }
 0x1c5   : > { %2514 = vmatmul.f32.gmra.mxu3 %v4789_v19  ;;  %v5608_v43 = vsel %vm6347_vm10, %v1468_v21, %v1469_v33  ;;  %3815 = vpow2.f32 %v3400_v15  ;;  %v2183_v21 = vld [vmem:[#allocation12 + $0x318] sm:$0xff] }
 0x1c6   : > { %2762 = vmatpush.msra.mxu3 %v2217_v60  ;;  %2633 = vmatpush.msrb.mxu2 %v2184_v46  ;;  %v5611_v60 = vadd.s32 104, %v4947_v13 }
 0x1c7   : > { %2390 = vmatmul.f32.gmra.mxu2 %v5502_v36 }
 0x1c8   : > { %2476 = vmatmul.f32.gmra.mxu0 %v5380_v20  ;;  %2763 = vmatpush.msra.mxu3 %v2216_v11  ;;  %v1169_v46 = vand.u32 15, %v5611_v60  ;;  %v1472_v20 = vrot.slane %v5357_v31, 1 }
 0x1c9   : > { %2634 = vmatpush.msrb.mxu2 %v2183_v21  ;;  %v6504_v21 = vmov 0 }
 0x1ca   : > { %v6505_v21 = vsel %vm5640_vm9, 4294967295, %v6504_v21  ;;  %vm5689_vm4 = vcmp.ne.s32.totalorder %v1169_v46, 15 }
 0x1cb   : > { %2346 = vmatmul.f32.gmra.mxu1 %v5268_v56  ;;  %v3816_v58 = vpop.eup %3815  ;;  %6506 = vst [vmem:[#allocation53_spill] sm:$0xff] %v6505_v21 }
 0x1cd   : > { %2517 = vmatmul.f32.gmra.mxu3 %v4884_v25 }
 0x1cf   : > { %3455 = vmatmul.msk.f32.gmra.mxu2 %vm5515_vm6, %v5529_v16 }
 0x1d0   : > { %3479 = vmatmul.msk.f32.gmra.mxu0 %vm5352_vm3, %v5411_v57 }
 0x1d3   : > { %2349 = vmatmul.f32.gmra.mxu1 %v5333_v6 }
 0x1d5   : > { %2520 = vmatmul.f32.gmra.mxu3 %v4928_v53 }
 0x1d7   : > { %2396 = vmatmul.f32.gmra.mxu2 %v5547_v44 }
 0x1d8   : > { %2482 = vmatmul.f32.gmra.mxu0 %v5428_v47 }
 0x1db   : > { %2352 = vmatmul.f32.gmra.mxu1 %v5357_v31 }
 0x1dd   : > { %2523 = vmatmul.f32.gmra.mxu3 %v4960_v38 }
 0x1df   : > { %3457 = vmatmul.msk.f32.gmra.mxu2 %vm5558_vm2, %v5572_v3 }
 0x1e0   : > { %3481 = vmatmul.msk.f32.gmra.mxu0 %vm5403_vm7, %v5565_v8 }
 0x1e3   : > { %2355 = vmatmul.f32.gmra.mxu1 %v5375_v1 }
 0x1e5   : > { %2526 = vmatmul.f32.gmra.mxu3 %v5024_v62  ;;  %v5595_v35 = vpop.f32.mrf.mxu3 }
 0x1e6   : > { %6500 = vst [vmem:[#allocation51_spill] sm:$0xff] %v5595_v35 }
 0x1e7   : > { %2402 = vmatmul.f32.gmra.mxu2 %v5589_v59 }
 0x1e8   : > { %2488 = vmatmul.f32.gmra.mxu0 %v5584_v0  ;;  %v2215_v0 = vld [vmem:[#allocation12 + $0x418] sm:$0xff] }
 0x1e9   : > { %2764 = vmatpush.msra.mxu3 %v2215_v0  ;;  %v2214_v0 = vld [vmem:[#allocation12 + $0x410] sm:$0xff] }
 0x1ea   : > { %v5627_v11 = vpop.f32.mrf.mxu0 }
 0x1eb   : > { %2358 = vmatmul.f32.gmra.mxu1 %v4897_v14  ;;  %2765 = vmatpush.msra.mxu3 %v2214_v0  ;;  %v2180_v0 = vld [vmem:[#allocation12 + $0x300] sm:$0xff] }
 0x1ed   : > { %2529 = vmatmul.f32.gmra.mxu3 %v5134_v52  ;;  %v5616_v22 = vpop.f32.mrf.mxu3 }
 0x1ee   : > { %6503 = vst [vmem:[#allocation52_spill] sm:$0xff] %v5616_v22  ;;  %v2213_v22 = vld [vmem:[#allocation12 + $0x408] sm:$0xff] }
 0x1ef   : > { %3459 = vmatmul.msk.f32.gmra.mxu2 %vm5601_vm12, %v5608_v43  ;;  %2766 = vmatpush.msra.mxu3 %v2213_v22 }
 0x1f0   : > { %2703 = vmatmul.f32.vlgmr.msra.gmra.mxu0 %v4789_v19  ;;  %v2314_v50 = vpop.f32.mrf.mxu1  ;;  %v1470_v19 = vrot.slane %v5268_v56, 1 }
 0x1f2   : > { %v5625_v15 = vsel %vm6347_vm10, %v1469_v33, %v1470_v19  ;;  %v1471_v33 = vrot.slane %v5333_v6, 1 }
 0x1f3   : > { %2573 = vmatmul.f32.vlgmr.msrb.gmra.mxu1 %v5462_v61  ;;  %v5632_v61 = vadd.f32 1.0, %v3816_v58 }
 0x1f4   : > { %v5647_v58 = vsel %vm6347_vm10, %v1470_v19, %v1471_v33  ;;  %v5675_v49 = vsel %vm6347_vm10, %v1471_v33, %v1472_v20  ;;  %v2212_v33 = vld [vmem:[#allocation12 + $0x400] sm:$0xff] }
 0x1f5   : > { %2532 = vmatmul.f32.gmra.mxu3 %v5205_v23  ;;  %3817 = vrcp.f32 %v5632_v61  ;;  %vm1038_vm7 = vweird.f32 %v5632_v61 }
 0x1f6   : > { %2767 = vmatpush.msra.mxu3 %v2212_v33 }
 0x1f7   : > { %2408 = vmatmul.f32.gmra.mxu2 %v5625_v15 }
 0x1f8   : > { %2706 = vmatmul.f32.gmra.mxu0 %v4884_v25  ;;  %v5630_v60 = vpop.f32.mrf.mxu3  ;;  %v2317_v8 = vpop.f32.mrf.mxu1  ;;  %v2182_v25 = vld [vmem:[#allocation12 + $0x310] sm:$0xff] }
 0x1f9   : > { %2635 = vmatpush.msrb.mxu2 %v2182_v25 }
 0x1fa   : > { %v2249_v47 = vpop.f32.mrf.mxu2 }
 0x1fb   : > { %3483 = vmatmul.msk.f32.gmra.mxu1 %vm5436_vm13, %v5484_v34  ;;  %v5650_v34 = vadd.s32 120, %v4947_v13  ;;  %v3818_v57 = vpop.eup %3817  ;;  %2636 = vmatpush.msrb.mxu2 %v2181_v54  ;;  %v2250_v32 = vadd.f32 %v5666_v10, %v2249_v47  ;;  %v1473_v47 = vrot.slane %v5375_v1, 1 }
 0x1fc   : > { %v1034_v25 = vmul.f32 %v3818_v57, %v5632_v61  ;;  %vm1039_vm3 = vweird.f32 %v3818_v57 }
 0x1fd   : > { %2535 = vmatmul.f32.gmra.mxu3 %v5268_v56  ;;  %2637 = vmatpush.msrb.mxu2 %v2180_v0  ;;  %v5680_v35 = vadd.f32 %v2314_v50, %v2250_v32  ;;  %v5697_v50 = vsel %vm6347_vm10, %v1472_v20, %v1473_v47  ;;  %v1042_v0 = vand.u32 2147483647, %v5632_v61  ;;  %vm5710_vm10 = vmor %vm1038_vm7, %vm1039_vm3  ;;  %vm6514_vm3 = vcmp.lt.s32.totalorder %v4947_v13, 7 }
 0x1fe   : > { %v1035_v54 = vsub.f32 1.0, %v1034_v25  ;;  %6511 = vst [vmem:[#allocation55_spill] sm:$0xff] %v5697_v50  ;;  %v1044_v25 = vand.u32 2147483648, %v5632_v61 }
 0x1ff   : > { %3461 = vmatmul.msk.f32.gmra.mxu2 %vm5640_vm9, %v5647_v58  ;;  %vm1043_vm1 = vcmp.eq.f32.partialorder %v1042_v0, 8.507059e+37 }
 0x200   : > { %2709 = vmatmul.f32.gmra.mxu0 %v4928_v53  ;;  %v5655_v5 = vpop.f32.mrf.mxu3  ;;  %v5657_v2 = vpop.f32.mrf.mxu1  ;;  %v1036_v22 = vmul.f32 %v3818_v57, %v1035_v54  ;;  %v1045_v33 = vor.u32 1.1754944e-38, %v1044_v25  ;;  %v1051_v54 = vstv %s1050_s12 }
 0x201   : > { %v5660_v53 = vpop.f32.mrf.mxu0  ;;  %vm5740_vm7 = vcmp.eq.s32.totalorder %v1051_v54, 1 }
 0x202   : > { %v2252_v19 = vpop.f32.mrf.mxu2 }
 0x203   : > { %2579 = vmatmul.f32.gmra.mxu1 %v5502_v36  ;;  %v2253_v32 = vadd.f32 %v5666_v10, %v2252_v19 }
 0x205   : > { %2538 = vmatmul.f32.gmra.mxu3 %v5333_v6  ;;  %v5708_v20 = vadd.f32 %v2317_v8, %v2253_v32 }
 0x207   : > { %2414 = vmatmul.f32.gmra.mxu2 %v5675_v49 }
 0x208   : > { %2712 = vmatmul.f32.gmra.mxu0 %v4960_v38  ;;  %v5678_v12 = vpop.f32.mrf.mxu3  ;;  %v2323_v9 = vpop.f32.mrf.mxu1  ;;  %v6508_v38 = vmov 0 }
 0x209   : > { %v5683_v21 = vpop.f32.mrf.mxu0  ;;  %v6509_v38 = vsel %vm5689_vm4, 4294967295, %v6508_v38 }
 0x20a   : > { %v2255_v24 = vpop.f32.mrf.mxu2  ;;  %6510 = vst [vmem:[#allocation54_spill] sm:$0xff] %v6509_v38  ;;  %v5715_v38 = vrot.slane %v4897_v14, 1 }
 0x20b   : > { %3485 = vmatmul.msk.f32.gmra.mxu1 %vm5474_vm14, %v5529_v16  ;;  %v2256_v61 = vadd.f32 %v5666_v10, %v2255_v24  ;;  %v6517_v24 = vand.u32 15, %v5650_v34 }
 0x20c   : > { %v5728_v32 = vsel %vm6514_vm3, %v1473_v47, %v5715_v38 }
 0x20d   : > { %2541 = vmatmul.f32.gmra.mxu3 %v5357_v31 }
 0x20f   : > { %3463 = vmatmul.msk.f32.gmra.mxu2 %vm5689_vm4, %v5697_v50 }
 0x210   : > { %2715 = vmatmul.f32.gmra.mxu0 %v5024_v62  ;;  %v5703_v46 = vpop.f32.mrf.mxu3  ;;  %v2326_v19 = vpop.f32.mrf.mxu1  ;;  %v1037_v62 = vadd.f32 %v3818_v57, %v1036_v22 }
 0x211   : > { %v5721_v8 = vpop.f32.mrf.mxu0 }
 0x212   : > { %v2258_v42 = vpop.f32.mrf.mxu2  ;;  %v1041_v22 = vsel %vm5710_vm10, %v3818_v57, %v1037_v62  ;;  %v2321_v57 = vadd.f32 %v5657_v2, %v2256_v61  ;;  %vm6521_vm10 = vmmov %vm6514_vm3  ;;  %vm6523_vm3 = vcmp.lt.s32.totalorder %v4947_v13, 1 }
 0x213   : > { %2585 = vmatmul.f32.gmra.mxu1 %v5547_v44  ;;  %v1046_v50 = vsel %vm1043_vm1, %v1045_v33, %v1041_v22  ;;  %vm5747_vm1 = vcmp.ne.s32.totalorder %v6517_v24, 15  ;;  %v2259_v2 = vadd.f32 %v5666_v10, %v2258_v42 }
 0x214   : > { %v5735_v0 = vmul.f32 %v1046_v50, %v5592_v55  ;;  %v6520_v55 = vrot.slane %v5155_v28, 1 }
 0x215   : > { %2544 = vmatmul.f32.gmra.mxu3 %v5375_v1 }
 0x216   : > { %v1491_v50 = vsel %vm6521_vm10, %v5715_v38, %v6520_v55  ;;  %v5761_v33 = vsel %vm5740_vm7, %v5735_v0, 0.0 }
 0x217   : > { %2420 = vmatmul.f32.gmra.mxu2 %v5728_v32  ;;  %6522 = vst [vmem:[#allocation56_spill] sm:$0xff] %v5761_v33  ;;  %v6357_v28 = vrot.slane %v5761_v33, 7 }
 0x218   : > { %2718 = vmatmul.f32.gmra.mxu0 %v5134_v52  ;;  %v5731_v25 = vpop.f32.mrf.mxu3  ;;  %v2329_v45 = vpop.f32.mrf.mxu1 }
 0x219   : > { %v5763_v34 = vpop.f32.mrf.mxu0  ;;  %v1795_v24 = vsel %vm6523_vm3, %v6357_v28, %v5218_v37 }
 0x21a   : > { %v2261_v62 = vpop.f32.mrf.mxu2 }
 0x21b   : > { %3487 = vmatmul.msk.f32.gmra.mxu1 %vm5515_vm6, %v5572_v3  ;;  %v2262_v54 = vadd.f32 %v5666_v10, %v2261_v62 }
 0x21d   : > { %2547 = vmatmul.f32.gmra.mxu3 %v4897_v14 }
 0x21f   : > { %3465 = vmatmul.msk.f32.gmra.mxu2 %vm5747_vm1, %v1491_v50 }
 0x220   : > { %2721 = vmatmul.f32.gmra.mxu0 %v5205_v23  ;;  %v5767_v22 = vpop.f32.mrf.mxu3  ;;  %v5769_v42 = vpop.f32.mrf.mxu1  ;;  %v2324_v23 = vadd.f32 %v2323_v9, %v2259_v2  ;;  %v5787_v2 = vadd.f32 %v5395_v51, %v5551_v29  ;;  %v2274_v29 = vadd.f32 %v5666_v10, %v5630_v60  ;;  %v2277_v60 = vadd.f32 %v5666_v10, %v5655_v5 }
 0x221   : > { %v5791_v62 = vpop.f32.mrf.mxu0  ;;  %v2280_v5 = vadd.f32 %v5666_v10, %v5678_v12  ;;  %v2283_v12 = vadd.f32 %v5666_v10, %v5703_v46 }
 0x222   : > { %v2264_v61 = vpop.f32.mrf.mxu2  ;;  %v3399_v27 = vmul.f32 -1.442695, %v5787_v2 }
 0x223   : > { %2591 = vmatmul.f32.gmra.mxu1 %v5589_v59  ;;  %v2265_v37 = vadd.f32 %v5666_v10, %v2264_v61 }
 0x224   : > { %3819 = vpow2.f32 %v3399_v27 }
 0x225   : > { %2550 = vmatmul.f32.gmra.mxu3 %v5542_v7 }
 0x227   : > { %3499 = vmatmul.msk.f32.vlgmr.msrb.gmra.mxu2 %vm5081_vm15, %v1795_v24  ;;  %v5809_v24 = vadd.f32 %v2329_v45, %v2265_v37 }
 0x228   : > { %2724 = vmatmul.f32.gmra.mxu0 %v5268_v56  ;;  %v5783_v9 = vpop.f32.mrf.mxu3  ;;  %v5789_v55 = vpop.f32.mrf.mxu1  ;;  %v2327_v56 = vadd.f32 %v2326_v19, %v2262_v54 }
 0x229   : > { %v5811_v28 = vpop.f32.mrf.mxu0 }
 0x22a   : > { %v2379_v50 = vpop.f32.mrf.mxu2 }
 0x22b   : > { %v2380_v33 = vadd.f32 %v2379_v50, %v5680_v35  ;;  %3489 = vmatmul.msk.f32.gmra.mxu1 %vm5558_vm2, %v5608_v43 }
 0x22d   : > { %2553 = vmatmul.f32.gmra.mxu3 %v4991_v40  ;;  %v2445_v51 = vadd.f32 %v5627_v11, %v2380_v33 }
 0x22f   : > { %2641 = vmatmul.f32.gmra.mxu2 %v5300_v39  ;;  %v3820_v39 = vpop.eup %3819 }
 0x230   : > { %2727 = vmatmul.f32.gmra.mxu0 %v5333_v6  ;;  %v5805_v35 = vpop.f32.mrf.mxu3  ;;  %v2338_v19 = vpop.f32.mrf.mxu1 }
 0x231   : > { %v5807_v54 = vadd.f32 %v2338_v19, %v2274_v29  ;;  %v5833_v48 = vpop.f32.mrf.mxu0  ;;  %v6531_v19 = vld [vmem:[#allocation51_spill] sm:$0xff] }
 0x232   : > { %v2382_v50 = vpop.f32.mrf.mxu2 }
 0x233   : > { %v2383_v11 = vadd.f32 %v2382_v50, %v5708_v20  ;;  %2597 = vmatmul.f32.gmra.mxu1 %v5625_v15  ;;  %v1016_v20 = vadd.f32 1.0, %v3820_v39 }
 0x235   : > { %2768 = vmatmul.f32.vlgmr.msra.gmra.mxu3 %v5502_v36  ;;  %v2448_v6 = vadd.f32 %v5660_v53, %v2383_v11  ;;  %3821 = vrcp.f32 %v1016_v20  ;;  %vm1023_vm15 = vweird.f32 %v1016_v20 }
 0x237   : > { %3501 = vmatmul.msk.f32.gmra.mxu2 %vm5241_vm0, %v4998_v30 }
 0x238   : > { %2730 = vmatmul.f32.gmra.mxu0 %v5357_v31  ;;  %v2509_v45 = vpop.f32.mrf.mxu3  ;;  %v2341_v33 = vpop.f32.mrf.mxu1 }
 0x239   : > { %v5823_v61 = vadd.f32 %v2509_v45, %v2445_v51  ;;  %v5825_v27 = vadd.f32 %v2341_v33, %v2277_v60  ;;  %v6525_v60 = vld [vmem:[#allocation55_spill] sm:$0xff]  ;;  %v2286_v33 = vadd.f32 %v5666_v10, %v5731_v25 }
 0x23a   : > { %v2385_v36 = vpop.f32.mrf.mxu2 }
 0x23b   : > { %v2386_v37 = vadd.f32 %v2385_v36, %v2321_v57  ;;  %3491 = vmatmul.msk.f32.gmra.mxu1 %vm5601_vm12, %v5647_v58  ;;  %v6528_v36 = vld [vmem:[#allocation35_spill] sm:$0xff] }
 0x23d   : > { %3517 = vmatmul.msk.f32.gmra.mxu3 %vm5436_vm13, %v5529_v16  ;;  %v2451_v30 = vadd.f32 %v5683_v21, %v2386_v37  ;;  %v3822_v16 = vpop.eup %3821 }
 0x23e   : > { %v1019_v21 = vmul.f32 %v3822_v16, %v1016_v20  ;;  %vm1024_vm0 = vweird.f32 %v3822_v16 }
 0x23f   : > { %2647 = vmatmul.f32.gmra.mxu2 %v5032_v17  ;;  %v5850_v17 = vpop.f32.mrf.mxu0 }
 0x240   : > { %2733 = vmatmul.f32.gmra.mxu0 %v5375_v1  ;;  %v2512_v31 = vpop.f32.mrf.mxu3  ;;  %v2344_v53 = vpop.f32.mrf.mxu1 }
 0x241   : > { %v5840_v57 = vadd.f32 %v2512_v31, %v2448_v6  ;;  %v5842_v51 = vadd.f32 %v2344_v53, %v2280_v5  ;;  %v1029_v5 = vand.u32 2147483648, %v1016_v20  ;;  %v1027_v53 = vand.u32 2147483647, %v1016_v20 }
 0x242   : > { %v2388_v18 = vpop.f32.mrf.mxu2  ;;  %v1698_v20 = vrot.slane %v5542_v7, 1 }
 0x243   : > { %v2389_v29 = vadd.f32 %v2388_v18, %v2324_v23  ;;  %2603 = vmatmul.f32.gmra.mxu1 %v5675_v49  ;;  %vm1028_vm13 = vcmp.eq.f32.partialorder %v1027_v53, 8.507059e+37 }
 0x245   : > { %2774 = vmatmul.f32.gmra.mxu3 %v5547_v44  ;;  %v2454_v1 = vadd.f32 %v5721_v8, %v2389_v29  ;;  %v1020_v44 = vsub.f32 1.0, %v1019_v21 }
 0x247   : > { %3503 = vmatmul.msk.f32.gmra.mxu2 %vm5327_vm11, %v5147_v41  ;;  %v1021_v41 = vmul.f32 %v3822_v16, %v1020_v44  ;;  %v5872_v31 = vpop.f32.mrf.mxu0  ;;  %vm5876_vm11 = vmor %vm1023_vm15, %vm1024_vm0 }
 0x248   : > { %2736 = vmatmul.f32.gmra.mxu0 %v4897_v14  ;;  %v2515_v50 = vpop.f32.mrf.mxu3  ;;  %v2347_v23 = vpop.f32.mrf.mxu1  ;;  %v6552_v14 = vld [vmem:[#allocation33_spill] sm:$0xff] }
 0x249   : > { %v5855_v11 = vadd.f32 %v2515_v50, %v2451_v30  ;;  %v5857_v6 = vadd.f32 %v2347_v23, %v2283_v12  ;;  %v2268_v50 = vadd.f32 %v5666_v10, %v6531_v19  ;;  %v6532_v23 = vld [vmem:[#allocation36_spill] sm:$0xff] }
 0x24a   : > { %v2391_v8 = vpop.f32.mrf.mxu2 }
 0x24b   : > { %v2392_v39 = vadd.f32 %v2391_v8, %v2327_v56  ;;  %3493 = vmatmul.msk.f32.gmra.mxu1 %vm5640_vm9, %v6525_v60 }
 0x24d   : > { %3519 = vmatmul.msk.f32.gmra.mxu3 %vm5474_vm14, %v5572_v3  ;;  %v2457_v45 = vadd.f32 %v5763_v34, %v2392_v39  ;;  %v1022_v34 = vadd.f32 %v3822_v16, %v1021_v41  ;;  %v2333_v39 = vadd.f32 %v5769_v42, %v2268_v50  ;;  %vm6534_vm14 = vmmov %vm6521_vm10 }
 0x24e   : > { %v5903_v41 = vsel %vm6534_vm14, %v5715_v38, %v1698_v20  ;;  %v5919_v38 = vrot.slane %v4991_v40, 1 }
 0x24f   : > { %2653 = vmatmul.f32.gmra.mxu2 %v6528_v36  ;;  %v1026_v12 = vsel %vm5876_vm11, %v3822_v16, %v1022_v34 }
 0x250   : > { %2739 = vmatmul.f32.gmra.mxu0 %v5542_v7  ;;  %v2518_v37 = vpop.f32.mrf.mxu3  ;;  %v2350_v56 = vpop.f32.mrf.mxu1 }
 0x251   : > { %v5870_v30 = vadd.f32 %v2518_v37, %v2454_v1  ;;  %v5874_v3 = vadd.f32 %v2350_v56, %v2286_v33  ;;  %v1030_v1 = vor.u32 1.1754944e-38, %v1029_v5  ;;  %v6536_v37 = vld [vmem:[#allocation52_spill] sm:$0xff]  ;;  %v6537_v5 = vld [vmem:[#allocation38_spill] sm:$0xff] }
 0x252   : > { %v2394_v18 = vpop.f32.mrf.mxu2  ;;  %v2271_v56 = vadd.f32 %v5666_v10, %v6536_v37  ;;  %v6547_v37 = vld [vmem:[#allocation45_spill] sm:$0xff] }
 0x253   : > { %v2395_v25 = vadd.f32 %v2394_v18, %v5809_v24  ;;  %2609 = vmatmul.f32.gmra.mxu1 %v5728_v32  ;;  %v2289_v24 = vadd.f32 %v5666_v10, %v5767_v22  ;;  %v1031_v16 = vsel %vm1028_vm13, %v1030_v1, %v1026_v12  ;;  %v2474_v22 = vpop.f32.mrf.mxu0  ;;  %v6539_v1 = vld [vmem:[#allocation41_spill] sm:$0xff] }
 0x255   : > { %2780 = vmatmul.f32.gmra.mxu3 %v5589_v59  ;;  %v2460_v21 = vadd.f32 %v5791_v62, %v2395_v25 }
 0x257   : > { %3505 = vmatmul.msk.f32.gmra.mxu2 %vm5009_vm5, %v6532_v23  ;;  %vm6538_vm5 = vmmov %vm6521_vm10  ;;  %v6543_v23 = vld [vmem:[#allocation42_spill] sm:$0xff] }
 0x258   : > { %2742 = vmatmul.f32.gmra.mxu0 %v4991_v40  ;;  %v2521_v59 = vpop.f32.mrf.mxu3  ;;  %v2353_v62 = vpop.f32.mrf.mxu1  ;;  %v1700_v40 = vsel %vm6538_vm5, %v1698_v20, %v5919_v38  ;;  %vm6559_vm10 = vmmov %vm6523_vm3 }
 0x259   : > { %v5895_v8 = vadd.f32 %v2521_v59, %v2457_v45  ;;  %v5898_v46 = vadd.f32 %v2353_v62, %v2289_v24  ;;  %v5909_v45 = vmul.f32 %v1031_v16, %v5787_v2  ;;  %v2292_v2 = vadd.f32 %v5666_v10, %v5783_v9  ;;  %v6541_v24 = vld [vmem:[#allocation46_spill] sm:$0xff] }
 0x25a   : > { %v2397_v7 = vpop.f32.mrf.mxu2 }
 0x25b   : > { %v2398_v33 = vadd.f32 %v2397_v7, %v2333_v39  ;;  %3495 = vmatmul.msk.f32.gmra.mxu1 %vm5689_vm4, %v5903_v41  ;;  %v2477_v9 = vpop.f32.mrf.mxu0  ;;  %v6544_v39 = vld [vmem:[#allocation44_spill] sm:$0xff]  ;;  %v6545_v7 = vld [vmem:[#allocation37_spill] sm:$0xff] }
 0x25d   : > { %3521 = vmatmul.msk.f32.gmra.mxu3 %vm5515_vm6, %v5608_v43  ;;  %v2463_v42 = vadd.f32 %v5811_v28, %v2398_v33  ;;  %v2336_v28 = vadd.f32 %v5789_v55, %v2271_v56  ;;  %v2295_v55 = vadd.f32 %v5666_v10, %v5805_v35  ;;  %vm6542_vm6 = vmmov %vm6538_vm5 }
 0x25f   : > { %2659 = vmatmul.f32.gmra.mxu2 %v6537_v5 }
 0x260   : > { %3514 = vmatmul.msk.f32.gmra.mxu0 %vm5740_vm7, %v5909_v45  ;;  %v2524_v34 = vpop.f32.mrf.mxu3  ;;  %v2356_v63 = vpop.f32.mrf.mxu1 }
 0x261   : > { %v5926_v43 = vadd.f32 %v2524_v34, %v2460_v21  ;;  %v5929_v53 = vadd.f32 %v2356_v63, %v2292_v2  ;;  %v6548_v63 = vld [vmem:[#allocation49_spill] sm:$0xff] }
 0x262   : > { %v2400_v18 = vpop.f32.mrf.mxu2 }
 0x263   : > { %v2401_v29 = vadd.f32 %v2400_v18, %v2336_v28  ;;  %2615 = vmatmul.f32.gmra.mxu1 %v1700_v40  ;;  %v2480_v35 = vpop.f32.mrf.mxu0  ;;  %v6549_v28 = vld [vmem:[#allocation40_spill] sm:$0xff] }
 0x265   : > { %2786 = vmatmul.f32.gmra.mxu3 %v5625_v15  ;;  %v2466_v25 = vadd.f32 %v5833_v48, %v2401_v29  ;;  %v1715_v48 = vsel %vm6542_vm6, %v5919_v38, %v6541_v24  ;;  %v6554_v24 = vld [vmem:[#allocation43_spill] sm:$0xff] }
 0x267   : > { %3507 = vmatmul.msk.f32.gmra.mxu2 %vm5149_vm8, %v6539_v1  ;;  %vm6546_vm8 = vnez %v6545_v7 }
 0x268   : > { %3515 = vmatmul.msk.f32.gmra.mxu0 %vm5740_vm7, %v5735_v0  ;;  %v2527_v12 = vpop.f32.mrf.mxu3  ;;  %v2359_v20 = vpop.f32.mrf.mxu1 }
 0x269   : > { %v5944_v19 = vadd.f32 %v2527_v12, %v2463_v42  ;;  %v5946_v50 = vadd.f32 %v2359_v20, %v2295_v55 }
 0x26a   : > { %v2403_v15 = vpop.f32.mrf.mxu2 }
 0x26b   : > { %v2404_v0 = vadd.f32 %v2403_v15, %v5807_v54  ;;  %3497 = vmatmul.msk.f32.gmra.mxu1 %vm5747_vm1, %v1715_v48 }
 0x26d   : > { %3523 = vmatmul.msk.f32.gmra.mxu3 %vm5558_vm2, %v5647_v58  ;;  %v2469_v10 = vadd.f32 %v5850_v17, %v2404_v0  ;;  %v2483_v17 = vpop.f32.mrf.mxu0  ;;  %vm6550_vm2 = vnez %v6549_v28 }
 0x26f   : > { %2665 = vmatmul.f32.gmra.mxu2 %v6543_v23 }
 0x270   : > { %v2530_v44 = vpop.f32.mrf.mxu3 }
 0x271   : > { %v5960_v59 = vadd.f32 %v2530_v44, %v2466_v25 }
 0x272   : > { %v2406_v62 = vpop.f32.mrf.mxu2 }
 0x273   : > { %v2407_v16 = vadd.f32 %v2406_v62, %v5825_v27 }
 0x275   : > { %2792 = vmatmul.f32.gmra.mxu3 %v5675_v49  ;;  %v2472_v54 = vadd.f32 %v5872_v31, %v2407_v16  ;;  %v2486_v2 = vpop.f32.mrf.mxu0 }
 0x277   : > { %3509 = vmatmul.msk.f32.gmra.mxu2 %vm6546_vm8, %v6544_v39 }
 0x278   : > { %v2533_v26 = vpop.f32.mrf.mxu3 }
 0x279   : > { %v5968_v58 = vadd.f32 %v2533_v26, %v2469_v10 }
 0x27a   : > { %v2409_v33 = vpop.f32.mrf.mxu2 }
 0x27b   : > { %v2410_v42 = vadd.f32 %v2409_v33, %v5842_v51 }
 0x27d   : > { %3525 = vmatmul.msk.f32.gmra.mxu3 %vm5601_vm12, %v6525_v60  ;;  %v2475_v27 = vadd.f32 %v2474_v22, %v2410_v42  ;;  %v2489_v18 = vpop.f32.mrf.mxu0  ;;  %vm6553_vm12 = vmmov %vm6523_vm3 }
 0x27e   : > { %vm6560_vm3 = vmmov %vm6538_vm5 }
 0x27f   : > { %2671 = vmatmul.f32.gmra.mxu2 %v6547_v37  ;;  %v6561_v37 = vld [vmem:[#allocation47_spill] sm:$0xff] }
 0x280   : > { %v2536_v49 = vpop.f32.mrf.mxu3 }
 0x281   : > { %v5975_v31 = vadd.f32 %v2536_v49, %v2472_v54 }
 0x282   : > { %v2412_v56 = vpop.f32.mrf.mxu2 }
 0x283   : > { %v2413_v5 = vadd.f32 %v2412_v56, %v5857_v6  ;;  %v2574_v6 = vpop.f32.mrf.mxu1 }
 0x285   : > { %2798 = vmatmul.f32.gmra.mxu3 %v5728_v32  ;;  %v2478_v34 = vadd.f32 %v2477_v9, %v2413_v5  ;;  %v1053_v32 = vsel %vm5740_vm7, %v5909_v45, 0.0  ;;  %v6551_v9 = vld [vmem:[#allocation50_spill] sm:$0xff]  ;;  %v2704_v15 = vpop.f32.mrf.mxu0  ;;  %vm6556_vm7 = vmmov %vm6538_vm5 }
 0x286   : > { %v1778_v1 = vrot.slane %v1053_v32, 7  ;;  %v1890_v20 = vrot.slane %v1053_v32, 1 }
 0x287   : > { %3511 = vmatmul.msk.f32.gmra.mxu2 %vm6550_vm2, %v6548_v63 }
 0x288   : > { %v2539_v51 = vpop.f32.mrf.mxu3 }
 0x289   : > { %v5982_v4 = vadd.f32 %v2539_v51, %v2475_v27 }
 0x28a   : > { %v2415_v60 = vpop.f32.mrf.mxu2 }
 0x28b   : > { %v2416_v22 = vadd.f32 %v2415_v60, %v5874_v3  ;;  %v2577_v45 = vpop.f32.mrf.mxu1 }
 0x28d   : > { %3527 = vmatmul.msk.f32.gmra.mxu3 %vm5640_vm9, %v5903_v41  ;;  %v2481_v29 = vadd.f32 %v2480_v35, %v2416_v22  ;;  %v1781_v41 = vsel %vm6553_vm12, %v6552_v14, %v1778_v1  ;;  %vm6555_vm9 = vnez %v6554_v24  ;;  %v6557_v35 = vld [vmem:[#allocation56_spill] sm:$0xff]  ;;  %v2707_v54 = vpop.f32.mrf.mxu0 }
 0x28e   : > { %v6558_v23 = vrot.slane %v6557_v35, 7 }
 0x28f   : > { %2677 = vmatmul.f32.gmra.mxu2 %v6551_v9 }
 0x290   : > { %v2542_v25 = vpop.f32.mrf.mxu3  ;;  %v1780_v44 = vsel %vm6559_vm10, %v1778_v1, %v6558_v23 }
 0x291   : > { %v5992_v55 = vadd.f32 %v2542_v25, %v2478_v34 }
 0x292   : > { %v2418_v21 = vpop.f32.mrf.mxu2 }
 0x293   : > { %v2419_v3 = vadd.f32 %v2418_v21, %v5898_v46  ;;  %v1893_v46 = vsel %vm6556_vm7, %v5919_v38, %v1890_v20  ;;  %v2580_v39 = vpop.f32.mrf.mxu1 }
 0x295   : > { %2804 = vmatmul.f32.gmra.mxu3 %v1700_v40  ;;  %v2484_v12 = vadd.f32 %v2483_v17, %v2419_v3  ;;  %v2710_v27 = vpop.f32.mrf.mxu0 }
 0x297   : > { %3513 = vmatmul.msk.f32.gmra.mxu2 %vm6555_vm9, %v1781_v41 }
 0x298   : > { %v2545_v52 = vpop.f32.mrf.mxu3 }
 0x299   : > { %v6000_v48 = vadd.f32 %v2545_v52, %v2481_v29 }
 0x29a   : > { %v2421_v0 = vpop.f32.mrf.mxu2 }
 0x29b   : > { %v2422_v10 = vadd.f32 %v2421_v0, %v5929_v53  ;;  %v1891_v53 = vrot.slane %v6557_v35, 1  ;;  %v2583_v56 = vpop.f32.mrf.mxu1 }
 0x29c   : > { %v2584_v24 = vadd.f32 %v2583_v56, %v5870_v30 }
 0x29d   : > { %3529 = vmatmul.msk.f32.gmra.mxu3 %vm5689_vm4, %v1893_v46  ;;  %v2487_v40 = vadd.f32 %v2486_v2, %v2422_v10  ;;  %v1892_v36 = vsel %vm6560_vm3, %v1890_v20, %v1891_v53  ;;  %vm6562_vm4 = vmmov %vm6560_vm3  ;;  %v2713_v28 = vpop.f32.mrf.mxu0 }
 0x29e   : > { %v1907_v49 = vsel %vm6562_vm4, %v1891_v53, %v6561_v37 }
 0x29f   : > { %2683 = vmatmul.f32.gmra.mxu2 %v1780_v44 }
 0x2a0   : > { %v2548_v62 = vpop.f32.mrf.mxu3 }
 0x2a1   : > { %v6012_v16 = vadd.f32 %v2548_v62, %v2484_v12 }
 0x2a2   : > { %v2424_v7 = vpop.f32.mrf.mxu2 }
 0x2a3   : > { %v2425_v38 = vadd.f32 %v2424_v7, %v5946_v50  ;;  %v2575_v50 = vadd.f32 %v2574_v6, %v5823_v61  ;;  %v2586_v51 = vpop.f32.mrf.mxu1  ;;  %v2581_v61 = vadd.f32 %v2580_v39, %v5855_v11 }
 0x2a4   : > { %v2587_v30 = vadd.f32 %v2586_v51, %v5895_v8 }
 0x2a5   : > { %2810 = vmatmul.f32.gmra.mxu3 %v1892_v36  ;;  %v2490_v26 = vadd.f32 %v2489_v18, %v2425_v38  ;;  %v2578_v18 = vadd.f32 %v2577_v45, %v5840_v57  ;;  %v2716_v25 = vpop.f32.mrf.mxu0 }
 0x2a8   : > { %v2551_v17 = vpop.f32.mrf.mxu3 }
 0x2a9   : > { %v6018_v33 = vadd.f32 %v2551_v17, %v2487_v40 }
 0x2aa   : > { %v2639_v42 = vpop.f32.mrf.mxu2 }
 0x2ab   : > { %v2640_v34 = vadd.f32 %v2639_v42, %v2575_v50  ;;  %v2589_v6 = vpop.f32.mrf.mxu1 }
 0x2ad   : > { %3531 = vmatmul.msk.f32.gmra.mxu3 %vm5747_vm1, %v1907_v49  ;;  %v2705_v60 = vadd.f32 %v2704_v15, %v2640_v34  ;;  %v6036_v45 = vpop.f32.mrf.mxu0 }
 0x2b0   : > { %v2554_v2 = vpop.f32.mrf.mxu3 }
 0x2b1   : > { %v6026_v5 = vadd.f32 %v2554_v2, %v2490_v26 }
 0x2b2   : > { %v2642_v63 = vpop.f32.mrf.mxu2 }
 0x2b3   : > { %v2643_v13 = vadd.f32 %v2642_v63, %v2578_v18  ;;  %v6038_v0 = vpop.f32.mrf.mxu1  ;;  %v2590_v18 = vadd.f32 %v2589_v6, %v5926_v43 }
 0x2b5   : > { %v2708_v47 = vadd.f32 %v2707_v54, %v2643_v13  ;;  %v6045_v56 = vpop.f32.mrf.mxu0 }
 0x2b8   : > { %v2769_v22 = vpop.f32.mrf.mxu3 }
 0x2b9   : > { %v2770_v29 = vadd.f32 %v2769_v22, %v2705_v60 }
 0x2ba   : > { %v2645_v9 = vpop.f32.mrf.mxu2 }
 0x2bb   : > { %v3401_v32 = vmul.f32 -1.442695, %v2770_v29  ;;  %v2646_v12 = vadd.f32 %v2645_v9, %v2581_v61  ;;  %v6049_v50 = vpop.f32.mrf.mxu1 }
 0x2bd   : > { %3823 = vpow2.f32 %v3401_v32  ;;  %v2711_v57 = vadd.f32 %v2710_v27, %v2646_v12 }
 0x2c0   : > { %v2772_v1 = vpop.f32.mrf.mxu3 }
 0x2c1   : > { %v6030_v21 = vadd.f32 %v2772_v1, %v2708_v47  ;;  %v3888_v47 = vld [vmem:[%s4525_s21] sm:$0xff] }
 0x2c2   : > { %v2648_v41 = vpop.f32.mrf.mxu2 }
 0x2c3   : > { %v3824_v3 = vpop.eup %3823  ;;  %v3402_v14 = vmul.f32 -1.442695, %v6030_v21  ;;  %v2649_v10 = vadd.f32 %v2648_v41, %v2584_v24  ;;  %v6065_v24 = vpop.f32.mrf.mxu0 }
 0x2c4   : > { %v2865_v20 = vadd.f32 1.0, %v3824_v3 }
 0x2c5   : > { %3825 = vpow2.f32 %v3402_v14  ;;  %v2714_v54 = vadd.f32 %v2713_v28, %v2649_v10  ;;  %v6068_v10 = vpop.f32.mrf.mxu1 }
 0x2c6   : > { %3827 = vrcp.f32 %v2865_v20  ;;  %v2892_v53 = vand.u32 2147483648, %v2865_v20  ;;  %v2890_v38 = vand.u32 2147483647, %v2865_v20  ;;  %vm2886_vm15 = vweird.f32 %v2865_v20 }
 0x2c8   : > { %v2775_v15 = vpop.f32.mrf.mxu3  ;;  %v2893_v2 = vor.u32 1.1754944e-38, %v2892_v53  ;;  %vm2891_vm11 = vcmp.eq.f32.partialorder %v2890_v38, 8.507059e+37 }
 0x2c9   : > { %v6034_v52 = vadd.f32 %v2775_v15, %v2711_v57 }
 0x2ca   : > { %v2651_v40 = vpop.f32.mrf.mxu2 }
 0x2cb   : > { %v3826_v11 = vpop.eup %3825  ;;  %v3403_v46 = vmul.f32 -1.442695, %v6034_v52  ;;  %v2652_v42 = vadd.f32 %v2651_v40, %v2587_v30  ;;  %v3889_v30 = vld [vmem:[%s4525_s21 + $0x8] sm:$0xff] }
 0x2cc   : > { %v3828_v35 = vpop.eup %3827  ;;  %v2866_v23 = vadd.f32 1.0, %v3826_v11 }
 0x2cd   : > { %v2882_v44 = vmul.f32 %v3828_v35, %v2865_v20  ;;  %3829 = vpow2.f32 %v3403_v46  ;;  %vm2887_vm1 = vweird.f32 %v3828_v35  ;;  %v2717_v22 = vadd.f32 %v2716_v25, %v2652_v42 }
 0x2ce   : > { %3831 = vrcp.f32 %v2866_v23  ;;  %vm2888_vm0 = vmor %vm2886_vm15, %vm2887_vm1  ;;  %v2905_v13 = vand.u32 2147483647, %v2866_v23  ;;  %v2907_v32 = vand.u32 2147483648, %v2866_v23  ;;  %vm2901_vm14 = vweird.f32 %v2866_v23 }
 0x2cf   : > { %v2883_v62 = vsub.f32 1.0, %v2882_v44 }
 0x2d0   : > { %v2778_v39 = vpop.f32.mrf.mxu3  ;;  %v2908_v41 = vor.u32 1.1754944e-38, %v2907_v32  ;;  %vm2906_vm6 = vcmp.eq.f32.partialorder %v2905_v13, 8.507059e+37  ;;  %v3890_v13 = vld [vmem:[%s4525_s21 + $0x10] sm:$0xff] }
 0x2d1   : > { %v2884_v7 = vmul.f32 %v3828_v35, %v2883_v62  ;;  %v6042_v36 = vadd.f32 %v2778_v39, %v2714_v54 }
 0x2d2   : > { %v2654_v37 = vpop.f32.mrf.mxu2 }
 0x2d3   : > { %v3830_v26 = vpop.eup %3829  ;;  %v2885_v17 = vadd.f32 %v3828_v35, %v2884_v7  ;;  %v3404_v27 = vmul.f32 -1.442695, %v6042_v36  ;;  %v2655_v25 = vadd.f32 %v2654_v37, %v2590_v18  ;;  %v2601_v18 = vpop.f32.mrf.mxu1 }
 0x2d4   : > { %v3832_v49 = vpop.eup %3831  ;;  %v6047_v8 = vadd.f32 1.0, %v3830_v26 }
 0x2d5   : > { %v2889_v34 = vsel %vm2888_vm0, %v3828_v35, %v2885_v17  ;;  %v2897_v63 = vmul.f32 %v3832_v49, %v2866_v23  ;;  %3833 = vpow2.f32 %v3404_v27  ;;  %vm2902_vm13 = vweird.f32 %v3832_v49 }
 0x2d6   : > { %v2894_v28 = vsel %vm2891_vm11, %v2893_v2, %v2889_v34  ;;  %3835 = vrcp.f32 %v6047_v8  ;;  %vm2903_vm5 = vmor %vm2901_vm14, %vm2902_vm13  ;;  %v2720_v35 = vadd.f32 %v6036_v45, %v2655_v25  ;;  %v2593_v23 = vadd.f32 %v6038_v0, %v5944_v19 }
 0x2d7   : > { %v3121_v51 = vmul.f32 %v2894_v28, %v2770_v29  ;;  %v2898_v60 = vsub.f32 1.0, %v2897_v63  ;;  %v2920_v44 = vand.u32 2147483647, %v6047_v8  ;;  %v2922_v62 = vand.u32 2147483648, %v6047_v8  ;;  %v2728_v28 = vpop.f32.mrf.mxu0 }
 0x2d8   : > { %v2781_v9 = vpop.f32.mrf.mxu3  ;;  %vm2916_vm2 = vweird.f32 %v6047_v8  ;;  %v2596_v63 = vadd.f32 %v6049_v50, %v5960_v59 }
 0x2d9   : > { %v3137_v1 = vadd.f32 %v3888_v47, %v3121_v51  ;;  %v2899_v61 = vmul.f32 %v3832_v49, %v2898_v60  ;;  %v6054_v3 = vadd.f32 %v2781_v9, %v2717_v22  ;;  %v2923_v17 = vor.u32 1.1754944e-38, %v2922_v62 }
 0x2da   : > { %v2657_v6 = vpop.f32.mrf.mxu2  ;;  %vm2921_vm9 = vcmp.eq.f32.partialorder %v2920_v44, 8.507059e+37 }
 0x2db   : > { %v3834_v12 = vpop.eup %3833  ;;  %3153 = vst [vmem:[%s6058_s20] sm:$0xff] %v3137_v1  ;;  %v2900_v29 = vadd.f32 %v3832_v49, %v2899_v61  ;;  %v3405_v43 = vmul.f32 -1.442695, %v6054_v3  ;;  %v2658_v45 = vadd.f32 %v2657_v6, %v2593_v23 }
 0x2dc   : > { %v3836_v14 = vpop.eup %3835  ;;  %v6062_v20 = vadd.f32 1.0, %v3834_v12 }
 0x2dd   : > { %v2904_v57 = vsel %vm2903_vm5, %v3832_v49, %v2900_v29  ;;  %v2912_v15 = vmul.f32 %v3836_v14, %v6047_v8  ;;  %3837 = vpow2.f32 %v3405_v43  ;;  %vm2917_vm8 = vweird.f32 %v3836_v14 }
 0x2de   : > { %v2909_v11 = vsel %vm2906_vm6, %v2908_v41, %v2904_v57  ;;  %3839 = vrcp.f32 %v6062_v20  ;;  %vm2918_vm12 = vmor %vm2916_vm2, %vm2917_vm8  ;;  %v2723_v34 = vadd.f32 %v6045_v56, %v2658_v45  ;;  %v2935_v51 = vand.u32 2147483647, %v6062_v20 }
 0x2df   : > { %v3122_v46 = vmul.f32 %v2909_v11, %v6030_v21  ;;  %v2913_v40 = vsub.f32 1.0, %v2912_v15  ;;  %v2937_v60 = vand.u32 2147483648, %v6062_v20  ;;  %vm2931_vm10 = vweird.f32 %v6062_v20  ;;  %v2731_v62 = vpop.f32.mrf.mxu0 }
 0x2e0   : > { %v2784_v54 = vpop.f32.mrf.mxu3  ;;  %vm2936_vm4 = vcmp.eq.f32.partialorder %v2935_v51, 8.507059e+37  ;;  %v2599_v57 = vadd.f32 %v6068_v10, %v5968_v58 }
 0x2e1   : > { %v3138_v53 = vadd.f32 %v3889_v30, %v3122_v46  ;;  %v2914_v39 = vmul.f32 %v3836_v14, %v2913_v40  ;;  %v6077_v7 = vadd.f32 %v2784_v54, %v2720_v35  ;;  %v2938_v12 = vor.u32 1.1754944e-38, %v2937_v60  ;;  %v3891_v40 = vld [vmem:[%s4525_s21 + $0x18] sm:$0xff] }
 0x2e2   : > { %v2660_v19 = vpop.f32.mrf.mxu2 }
 0x2e3   : > { %v3838_v38 = vpop.eup %3837  ;;  %3154 = vst [vmem:[%s6058_s20 + $0x8] sm:$0xff] %v3138_v53  ;;  %v2915_v21 = vadd.f32 %v3836_v14, %v2914_v39  ;;  %v3406_v26 = vmul.f32 -1.442695, %v6077_v7  ;;  %v2661_v56 = vadd.f32 %v2660_v19, %v2596_v63 }
 0x2e4   : > { %v3840_v0 = vpop.eup %3839  ;;  %v6082_v42 = vadd.f32 1.0, %v3838_v38 }
 0x2e5   : > { %v2919_v27 = vsel %vm2918_vm12, %v3836_v14, %v2915_v21  ;;  %v2927_v37 = vmul.f32 %v3840_v0, %v6062_v20  ;;  %3841 = vpow2.f32 %v3406_v26  ;;  %vm2932_vm7 = vweird.f32 %v3840_v0 }
 0x2e6   : > { %v2924_v49 = vsel %vm2921_vm9, %v2923_v17, %v2919_v27  ;;  %3843 = vrcp.f32 %v6082_v42  ;;  %vm2933_vm3 = vmor %vm2931_vm10, %vm2932_vm7  ;;  %v2726_v20 = vadd.f32 %v6065_v24, %v2661_v56  ;;  %v2950_v15 = vand.u32 2147483647, %v6082_v42 }
 0x2e7   : > { %v3123_v2 = vmul.f32 %v2924_v49, %v6034_v52  ;;  %v2928_v8 = vsub.f32 1.0, %v2927_v37  ;;  %v2952_v11 = vand.u32 2147483648, %v6082_v42  ;;  %vm2946_vm15 = vweird.f32 %v6082_v42 }
 0x2e8   : > { %v2787_v22 = vpop.f32.mrf.mxu3  ;;  %vm2951_vm11 = vcmp.eq.f32.partialorder %v2950_v15, 8.507059e+37 }
 0x2e9   : > { %v3139_v32 = vadd.f32 %v3890_v13, %v3123_v2  ;;  %v2929_v9 = vmul.f32 %v3840_v0, %v2928_v8  ;;  %v6093_v47 = vadd.f32 %v2787_v22, %v2723_v34  ;;  %v2953_v39 = vor.u32 1.1754944e-38, %v2952_v11  ;;  %v3892_v2 = vld [vmem:[%s4525_s21 + $0x20] sm:$0xff] }
 0x2ea   : > { %v2663_v50 = vpop.f32.mrf.mxu2 }
 0x2eb   : > { %v3842_v52 = vpop.eup %3841  ;;  %3155 = vst [vmem:[%s6058_s20 + $0x10] sm:$0xff] %v3139_v32  ;;  %v2930_v1 = vadd.f32 %v3840_v0, %v2929_v9  ;;  %v3407_v59 = vmul.f32 -1.442695, %v6093_v47  ;;  %v2664_v24 = vadd.f32 %v2663_v50, %v2599_v57 }
 0x2ec   : > { %v3844_v61 = vpop.eup %3843  ;;  %v6098_v29 = vadd.f32 1.0, %v3842_v52 }
 0x2ed   : > { %v2934_v25 = vsel %vm2933_vm3, %v3840_v0, %v2930_v1  ;;  %v2942_v43 = vmul.f32 %v3844_v61, %v6082_v42  ;;  %3845 = vpow2.f32 %v3407_v59  ;;  %vm2947_vm1 = vweird.f32 %v3844_v61 }
 0x2ee   : > { %v2939_v6 = vsel %vm2936_vm4, %v2938_v12, %v2934_v25  ;;  %3847 = vrcp.f32 %v6098_v29  ;;  %vm2948_vm0 = vmor %vm2946_vm15, %vm2947_vm1  ;;  %v2729_v17 = vadd.f32 %v2728_v28, %v2664_v24  ;;  %v2602_v42 = vadd.f32 %v2601_v18, %v5975_v31  ;;  %v2734_v18 = vpop.f32.mrf.mxu0 }
 0x2ef   : > { %v3124_v14 = vmul.f32 %v2939_v6, %v6042_v36  ;;  %v2943_v41 = vsub.f32 1.0, %v2942_v43  ;;  %v2604_v36 = vpop.f32.mrf.mxu1  ;;  %v2965_v27 = vand.u32 2147483647, %v6098_v29  ;;  %v2967_v37 = vand.u32 2147483648, %v6098_v29  ;;  %v3893_v6 = vld [vmem:[%s4525_s21 + $0x28] sm:$0xff] }
 0x2f0   : > { %v2790_v46 = vpop.f32.mrf.mxu3  ;;  %vm2961_vm14 = vweird.f32 %v6098_v29  ;;  %v2605_v12 = vadd.f32 %v2604_v36, %v5982_v4 }
 0x2f1   : > { %v3140_v35 = vadd.f32 %v3891_v40, %v3124_v14  ;;  %v2944_v23 = vmul.f32 %v3844_v61, %v2943_v41  ;;  %v6109_v44 = vadd.f32 %v2790_v46, %v2726_v20  ;;  %v2968_v13 = vor.u32 1.1754944e-38, %v2967_v37 }
 0x2f2   : > { %v2666_v10 = vpop.f32.mrf.mxu2  ;;  %vm2966_vm6 = vcmp.eq.f32.partialorder %v2965_v27, 8.507059e+37 }
 0x2f3   : > { %v3846_v54 = vpop.eup %3845  ;;  %3156 = vst [vmem:[%s6058_s20 + $0x18] sm:$0xff] %v3140_v35  ;;  %v2945_v30 = vadd.f32 %v3844_v61, %v2944_v23  ;;  %v3408_v58 = vmul.f32 -1.442695, %v6109_v44 }
 0x2f4   : > { %v3848_v53 = vpop.eup %3847  ;;  %v6114_v38 = vadd.f32 1.0, %v3846_v54 }
 0x2f5   : > { %v2949_v21 = vsel %vm2948_vm0, %v3844_v61, %v2945_v30  ;;  %v2957_v45 = vmul.f32 %v3848_v53, %v6098_v29  ;;  %3849 = vpow2.f32 %v3408_v58  ;;  %vm2962_vm13 = vweird.f32 %v3848_v53 }
 0x2f6   : > { %v2954_v26 = vsel %vm2951_vm11, %v2953_v39, %v2949_v21  ;;  %3851 = vrcp.f32 %v6114_v38  ;;  %vm2963_vm5 = vmor %vm2961_vm14, %vm2962_vm13  ;;  %v2980_v29 = vand.u32 2147483647, %v6114_v38  ;;  %v2982_v25 = vand.u32 2147483648, %v6114_v38  ;;  %v2737_v54 = vpop.f32.mrf.mxu0 }
 0x2f7   : > { %v3125_v19 = vmul.f32 %v2954_v26, %v6054_v3  ;;  %v2958_v0 = vsub.f32 1.0, %v2957_v45  ;;  %v2667_v3 = vadd.f32 %v2666_v10, %v2602_v42  ;;  %v2607_v9 = vpop.f32.mrf.mxu1  ;;  %vm2976_vm2 = vweird.f32 %v6114_v38  ;;  %v3894_v45 = vld [vmem:[%s4525_s21 + $0x30] sm:$0xff] }
 0x2f8   : > { %v2793_v49 = vpop.f32.mrf.mxu3  ;;  %v2983_v40 = vor.u32 1.1754944e-38, %v2982_v25  ;;  %vm2981_vm9 = vcmp.eq.f32.partialorder %v2980_v29, 8.507059e+37 }
 0x2f9   : > { %v3141_v8 = vadd.f32 %v3892_v2, %v3125_v19  ;;  %v2959_v34 = vmul.f32 %v3848_v53, %v2958_v0  ;;  %v6123_v63 = vadd.f32 %v2793_v49, %v2729_v17  ;;  %v2732_v61 = vadd.f32 %v2731_v62, %v2667_v3 }
 0x2fa   : > { %v2669_v31 = vpop.f32.mrf.mxu2 }
 0x2fb   : > { %v3850_v51 = vpop.eup %3849  ;;  %3157 = vst [vmem:[%s6058_s20 + $0x20] sm:$0xff] %v3141_v8  ;;  %v2960_v60 = vadd.f32 %v3848_v53, %v2959_v34  ;;  %v3409_v28 = vmul.f32 -1.442695, %v6123_v63 }
 0x2fc   : > { %v3852_v22 = vpop.eup %3851  ;;  %v6128_v32 = vadd.f32 1.0, %v3850_v51 }
 0x2fd   : > { %v2964_v52 = vsel %vm2963_vm5, %v3848_v53, %v2960_v60  ;;  %v2972_v1 = vmul.f32 %v3852_v22, %v6114_v38  ;;  %3853 = vpow2.f32 %v3409_v28  ;;  %vm2977_vm8 = vweird.f32 %v3852_v22 }
 0x2fe   : > { %v2969_v56 = vsel %vm2966_vm6, %v2968_v13, %v2964_v52  ;;  %3855 = vrcp.f32 %v6128_v32  ;;  %vm2978_vm12 = vmor %vm2976_vm2, %vm2977_vm8  ;;  %v2608_v53 = vadd.f32 %v2607_v9, %v5992_v55  ;;  %v2995_v39 = vand.u32 2147483647, %v6128_v32  ;;  %v3895_v52 = vld [vmem:[%s4525_s21 + $0x38] sm:$0xff] }
 0x2ff   : > { %v3126_v59 = vmul.f32 %v2969_v56, %v6077_v7  ;;  %v2973_v50 = vsub.f32 1.0, %v2972_v1  ;;  %v2670_v7 = vadd.f32 %v2669_v31, %v2605_v12  ;;  %v2610_v30 = vpop.f32.mrf.mxu1  ;;  %v2997_v38 = vand.u32 2147483648, %v6128_v32  ;;  %v2740_v31 = vpop.f32.mrf.mxu0 }
 0x300   : > { %v2796_v43 = vpop.f32.mrf.mxu3  ;;  %vm2991_vm10 = vweird.f32 %v6128_v32  ;;  %vm2996_vm4 = vcmp.eq.f32.partialorder %v2995_v39, 8.507059e+37 }
 0x301   : > { %v3142_v14 = vadd.f32 %v3893_v6, %v3126_v59  ;;  %v2974_v41 = vmul.f32 %v3852_v22, %v2973_v50  ;;  %v6137_v20 = vadd.f32 %v2796_v43, %v2732_v61  ;;  %v2735_v10 = vadd.f32 %v2734_v18, %v2670_v7 }
 0x302   : > { %v2672_v4 = vpop.f32.mrf.mxu2  ;;  %v2998_v49 = vor.u32 1.1754944e-38, %v2997_v38 }
 0x303   : > { %v3854_v57 = vpop.eup %3853  ;;  %3158 = vst [vmem:[%s6058_s20 + $0x28] sm:$0xff] %v3142_v14  ;;  %v2975_v15 = vadd.f32 %v3852_v22, %v2974_v41  ;;  %v3410_v11 = vmul.f32 -1.442695, %v6137_v20 }
 0x304   : > { %v3856_v46 = vpop.eup %3855  ;;  %v6142_v35 = vadd.f32 1.0, %v3854_v57 }
 0x305   : > { %v2979_v23 = vsel %vm2978_vm12, %v3852_v22, %v2975_v15  ;;  %v2987_v62 = vmul.f32 %v3856_v46, %v6128_v32  ;;  %3857 = vpow2.f32 %v3410_v11  ;;  %vm2992_vm7 = vweird.f32 %v3856_v46 }
 0x306   : > { %v2984_v36 = vsel %vm2981_vm9, %v2983_v40, %v2979_v23  ;;  %3859 = vrcp.f32 %v6142_v35  ;;  %vm2993_vm3 = vmor %vm2991_vm10, %vm2992_vm7  ;;  %v2611_v22 = vadd.f32 %v2610_v30, %v6000_v48  ;;  %v3010_v18 = vand.u32 2147483647, %v6142_v35 }
 0x307   : > { %v3127_v24 = vmul.f32 %v2984_v36, %v6093_v47  ;;  %v2988_v58 = vsub.f32 1.0, %v2987_v62  ;;  %v2673_v47 = vadd.f32 %v2672_v4, %v2608_v53  ;;  %v3012_v13 = vand.u32 2147483648, %v6142_v35  ;;  %v2613_v9 = vpop.f32.mrf.mxu1  ;;  %v2743_v36 = vpop.f32.mrf.mxu0 }
 0x308   : > { %v2799_v21 = vpop.f32.mrf.mxu3  ;;  %vm3006_vm15 = vweird.f32 %v6142_v35  ;;  %vm3011_vm11 = vcmp.eq.f32.partialorder %v3010_v18, 8.507059e+37  ;;  %v2614_v11 = vadd.f32 %v2613_v9, %v6012_v16 }
 0x309   : > { %v3143_v26 = vadd.f32 %v3894_v45, %v3127_v24  ;;  %v2989_v19 = vmul.f32 %v3856_v46, %v2988_v58  ;;  %v6151_v0 = vadd.f32 %v2799_v21, %v2735_v10  ;;  %v2738_v28 = vadd.f32 %v2737_v54, %v2673_v47 }
 0x30a   : > { %v2675_v55 = vpop.f32.mrf.mxu2  ;;  %v3013_v29 = vor.u32 1.1754944e-38, %v3012_v13 }
 0x30b   : > { %v3858_v17 = vpop.eup %3857  ;;  %3159 = vst [vmem:[%s6058_s20 + $0x30] sm:$0xff] %v3143_v26  ;;  %v2990_v42 = vadd.f32 %v3856_v46, %v2989_v19  ;;  %v3411_v27 = vmul.f32 -1.442695, %v6151_v0  ;;  %v2676_v61 = vadd.f32 %v2675_v55, %v2611_v22 }
 0x30c   : > { %v3860_v37 = vpop.eup %3859  ;;  %v6156_v2 = vadd.f32 1.0, %v3858_v17 }
 0x30d   : > { %v2994_v8 = vsel %vm2993_vm3, %v3856_v46, %v2990_v42  ;;  %v3002_v34 = vmul.f32 %v3860_v37, %v6142_v35  ;;  %3861 = vpow2.f32 %v3411_v27  ;;  %vm3007_vm1 = vweird.f32 %v3860_v37  ;;  %v3896_v35 = vld [vmem:[%s4525_s21 + $0x40] sm:$0xff] }
 0x30e   : > { %v2999_v51 = vsel %vm2996_vm4, %v2998_v49, %v2994_v8  ;;  %3863 = vrcp.f32 %v6156_v2  ;;  %vm3008_vm0 = vmor %vm3006_vm15, %vm3007_vm1  ;;  %v2741_v7 = vadd.f32 %v2740_v31, %v2676_v61  ;;  %v3025_v4 = vand.u32 2147483647, %v6156_v2  ;;  %v3897_v49 = vld [vmem:[%s4525_s21 + $0x48] sm:$0xff] }
 0x30f   : > { %v3128_v60 = vmul.f32 %v2999_v51, %v6109_v44  ;;  %v3003_v3 = vsub.f32 1.0, %v3002_v34  ;;  %v3027_v46 = vand.u32 2147483648, %v6156_v2  ;;  %v2616_v24 = vpop.f32.mrf.mxu1  ;;  %vm3021_vm14 = vweird.f32 %v6156_v2 }
 0x310   : > { %v2802_v32 = vpop.f32.mrf.mxu3  ;;  %vm3026_vm6 = vcmp.eq.f32.partialorder %v3025_v4, 8.507059e+37  ;;  %v2617_v47 = vadd.f32 %v2616_v24, %v6018_v33 }
 0x311   : > { %v3144_v1 = vadd.f32 %v3895_v52, %v3128_v60  ;;  %v3004_v56 = vmul.f32 %v3860_v37, %v3003_v3  ;;  %v6165_v59 = vadd.f32 %v2802_v32, %v2738_v28  ;;  %v3028_v53 = vor.u32 1.1754944e-38, %v3027_v46  ;;  %v2746_v28 = vpop.f32.mrf.mxu0 }
 0x312   : > { %v2678_v43 = vpop.f32.mrf.mxu2 }
 0x313   : > { %v3862_v50 = vpop.eup %3861  ;;  %3160 = vst [vmem:[%s6058_s20 + $0x38] sm:$0xff] %v3144_v1  ;;  %v3005_v44 = vadd.f32 %v3860_v37, %v3004_v56  ;;  %v3412_v48 = vmul.f32 -1.442695, %v6165_v59  ;;  %v2679_v58 = vadd.f32 %v2678_v43, %v2614_v11 }
 0x314   : > { %v3864_v12 = vpop.eup %3863  ;;  %v6170_v25 = vadd.f32 1.0, %v3862_v50 }
 0x315   : > { %v3009_v6 = vsel %vm3008_vm0, %v3860_v37, %v3005_v44  ;;  %v3017_v14 = vmul.f32 %v3864_v12, %v6156_v2  ;;  %3865 = vpow2.f32 %v3412_v48  ;;  %vm3022_vm13 = vweird.f32 %v3864_v12 }
 0x316   : > { %v3014_v41 = vsel %vm3011_vm11, %v3013_v29, %v3009_v6  ;;  %3867 = vrcp.f32 %v6170_v25  ;;  %vm3023_vm5 = vmor %vm3021_vm14, %vm3022_vm13  ;;  %v2744_v42 = vadd.f32 %v2743_v36, %v2679_v58  ;;  %v3040_v27 = vand.u32 2147483647, %v6170_v25  ;;  %v3898_v29 = vld [vmem:[%s4525_s21 + $0x50] sm:$0xff] }
 0x317   : > { %v3129_v57 = vmul.f32 %v3014_v41, %v6123_v63  ;;  %v3018_v15 = vsub.f32 1.0, %v3017_v14  ;;  %v3042_v55 = vand.u32 2147483648, %v6170_v25  ;;  %vm3036_vm2 = vweird.f32 %v6170_v25  ;;  %v2619_v18 = vpop.f32.mrf.mxu1 }
 0x318   : > { %v2805_v40 = vpop.f32.mrf.mxu3  ;;  %vm3041_vm9 = vcmp.eq.f32.partialorder %v3040_v27, 8.507059e+37  ;;  %v2620_v50 = vadd.f32 %v2619_v18, %v6026_v5 }
 0x319   : > { %v3145_v23 = vadd.f32 %v3896_v35, %v3129_v57  ;;  %v3019_v62 = vmul.f32 %v3864_v12, %v3018_v15  ;;  %v6179_v54 = vadd.f32 %v2805_v40, %v2741_v7  ;;  %v3043_v31 = vor.u32 1.1754944e-38, %v3042_v55  ;;  %v2749_v46 = vpop.f32.mrf.mxu0  ;;  %v3900_v55 = vld [vmem:[%s4525_s21 + $0x60] sm:$0xff] }
 0x31a   : > { %v2681_v26 = vpop.f32.mrf.mxu2 }
 0x31b   : > { %v3866_v30 = vpop.eup %3865  ;;  %3161 = vst [vmem:[%s6058_s20 + $0x40] sm:$0xff] %v3145_v23  ;;  %v3020_v63 = vadd.f32 %v3864_v12, %v3019_v62  ;;  %v3413_v16 = vmul.f32 -1.442695, %v6179_v54 }
 0x31c   : > { %v3868_v10 = vpop.eup %3867  ;;  %v6184_v39 = vadd.f32 1.0, %v3866_v30 }
 0x31d   : > { %v3024_v38 = vsel %vm3023_vm5, %v3864_v12, %v3020_v63  ;;  %v3032_v21 = vmul.f32 %v3868_v10, %v6170_v25  ;;  %3869 = vpow2.f32 %v3413_v16  ;;  %vm3037_vm8 = vweird.f32 %v3868_v10  ;;  %v3899_v63 = vld [vmem:[%s4525_s21 + $0x58] sm:$0xff] }
 0x31e   : > { %v3029_v45 = vsel %vm3026_vm6, %v3028_v53, %v3024_v38  ;;  %3871 = vrcp.f32 %v6184_v39  ;;  %vm3038_vm12 = vmor %vm3036_vm2, %vm3037_vm8  ;;  %v3055_v44 = vand.u32 2147483647, %v6184_v39  ;;  %v3057_v61 = vand.u32 2147483648, %v6184_v39 }
 0x31f   : > { %v3130_v19 = vmul.f32 %v3029_v45, %v6137_v20  ;;  %v3033_v17 = vsub.f32 1.0, %v3032_v21  ;;  %v2682_v20 = vadd.f32 %v2681_v26, %v2617_v47  ;;  %vm3051_vm10 = vweird.f32 %v6184_v39 }
 0x320   : > { %v2808_v37 = vpop.f32.mrf.mxu3  ;;  %v3058_v15 = vor.u32 1.1754944e-38, %v3057_v61  ;;  %vm3056_vm4 = vcmp.eq.f32.partialorder %v3055_v44, 8.507059e+37 }
 0x321   : > { %v3146_v2 = vadd.f32 %v3897_v49, %v3130_v19  ;;  %v3034_v8 = vmul.f32 %v3868_v10, %v3033_v17  ;;  %v6193_v34 = vadd.f32 %v2808_v37, %v2744_v42  ;;  %v2747_v56 = vadd.f32 %v2746_v28, %v2682_v20 }
 0x322   : > { %v2684_v48 = vpop.f32.mrf.mxu2 }
 0x323   : > { %v3870_v51 = vpop.eup %3869  ;;  %3162 = vst [vmem:[%s6058_s20 + $0x48] sm:$0xff] %v3146_v2  ;;  %v3035_v60 = vadd.f32 %v3868_v10, %v3034_v8  ;;  %v3414_v3 = vmul.f32 -1.442695, %v6193_v34 }
 0x324   : > { %v3872_v33 = vpop.eup %3871  ;;  %v2877_v22 = vadd.f32 1.0, %v3870_v51 }
 0x325   : > { %v3039_v13 = vsel %vm3038_vm12, %v3868_v10, %v3035_v60  ;;  %v3047_v32 = vmul.f32 %v3872_v33, %v6184_v39  ;;  %3873 = vpow2.f32 %v3414_v3  ;;  %vm3052_vm7 = vweird.f32 %v3872_v33 }
 0x326   : > { %v3044_v9 = vsel %vm3041_vm9, %v3043_v31, %v3039_v13  ;;  %3875 = vrcp.f32 %v2877_v22  ;;  %vm3053_vm3 = vmor %vm3051_vm10, %vm3052_vm7  ;;  %v3070_v36 = vand.u32 2147483647, %v2877_v22  ;;  %v3072_v30 = vand.u32 2147483648, %v2877_v22  ;;  %v3901_v13 = vld [vmem:[%s4525_s21 + $0x68] sm:$0xff] }
 0x327   : > { %v3131_v52 = vmul.f32 %v3044_v9, %v6151_v0  ;;  %v3048_v1 = vsub.f32 1.0, %v3047_v32  ;;  %v2685_v0 = vadd.f32 %v2684_v48, %v2620_v50  ;;  %vm3066_vm15 = vweird.f32 %v2877_v22 }
 0x328   : > { %v2811_v12 = vpop.f32.mrf.mxu3  ;;  %vm3071_vm11 = vcmp.eq.f32.partialorder %v3070_v36, 8.507059e+37 }
 0x329   : > { %v3147_v25 = vadd.f32 %v3898_v29, %v3131_v52  ;;  %v3049_v43 = vmul.f32 %v3872_v33, %v3048_v1  ;;  %v6204_v6 = vadd.f32 %v2811_v12, %v2747_v56  ;;  %v2750_v62 = vadd.f32 %v2749_v46, %v2685_v0 }
 0x32b   : > { %v3874_v14 = vpop.eup %3873  ;;  %3163 = vst [vmem:[%s6058_s20 + $0x50] sm:$0xff] %v3147_v25  ;;  %v3050_v41 = vadd.f32 %v3872_v33, %v3049_v43  ;;  %v3415_v5 = vmul.f32 -1.442695, %v6204_v6  ;;  %v3902_v25 = vld [vmem:[%s4525_s21 + $0x70] sm:$0xff] }
 0x32c   : > { %v3876_v57 = vpop.eup %3875  ;;  %v2878_v7 = vadd.f32 1.0, %v3874_v14 }
 0x32d   : > { %v3054_v11 = vsel %vm3053_vm3, %v3872_v33, %v3050_v41  ;;  %v3062_v4 = vmul.f32 %v3876_v57, %v2877_v22  ;;  %3877 = vpow2.f32 %v3415_v5  ;;  %vm3067_vm1 = vweird.f32 %v3876_v57 }
 0x32e   : > { %v3059_v40 = vsel %vm3056_vm4, %v3058_v15, %v3054_v11  ;;  %3879 = vrcp.f32 %v2878_v7  ;;  %vm3068_vm0 = vmor %vm3066_vm15, %vm3067_vm1  ;;  %v3087_v27 = vand.u32 2147483648, %v2878_v7  ;;  %v3085_v2 = vand.u32 2147483647, %v2878_v7 }
 0x32f   : > { %v3132_v35 = vmul.f32 %v3059_v40, %v6165_v59  ;;  %v3063_v23 = vsub.f32 1.0, %v3062_v4  ;;  %v3073_v59 = vor.u32 1.1754944e-38, %v3072_v30  ;;  %vm3081_vm14 = vweird.f32 %v2878_v7 }
 0x330   : > { %v2814_v24 = vpop.f32.mrf.mxu3  ;;  %v3088_v20 = vor.u32 1.1754944e-38, %v3087_v27  ;;  %vm3086_vm6 = vcmp.eq.f32.partialorder %v3085_v2, 8.507059e+37 }
 0x331   : > { %v3148_v58 = vadd.f32 %v3899_v63, %v3132_v35  ;;  %v3064_v16 = vmul.f32 %v3876_v57, %v3063_v23  ;;  %v6211_v10 = vadd.f32 %v2814_v24, %v2750_v62 }
 0x333   : > { %v3878_v53 = vpop.eup %3877  ;;  %3164 = vst [vmem:[%s6058_s20 + $0x58] sm:$0xff] %v3148_v58  ;;  %v3065_v39 = vadd.f32 %v3876_v57, %v3064_v16  ;;  %v3416_v38 = vmul.f32 -1.442695, %v6211_v10 }
 0x334   : > { %v3880_v21 = vpop.eup %3879  ;;  %v2879_v45 = vadd.f32 1.0, %v3878_v53 }
 0x335   : > { %v3069_v26 = vsel %vm3068_vm0, %v3876_v57, %v3065_v39  ;;  %v3077_v19 = vmul.f32 %v3880_v21, %v2878_v7  ;;  %3881 = vpow2.f32 %v3416_v38  ;;  %vm3082_vm13 = vweird.f32 %v3880_v21  ;;  %v3903_v7 = vld [vmem:[%s4525_s21 + $0x78] sm:$0xff] }
 0x336   : > { %v3074_v17 = vsel %vm3071_vm11, %v3073_v59, %v3069_v26  ;;  %3883 = vrcp.f32 %v2879_v45  ;;  %vm3083_vm5 = vmor %vm3081_vm14, %vm3082_vm13  ;;  %v3102_v18 = vand.u32 2147483648, %v2879_v45  ;;  %v3100_v52 = vand.u32 2147483647, %v2879_v45 }
 0x337   : > { %v3133_v42 = vmul.f32 %v3074_v17, %v6179_v54  ;;  %v3078_v47 = vsub.f32 1.0, %v3077_v19  ;;  %vm3096_vm2 = vweird.f32 %v2879_v45 }
 0x338   : > { %v3103_v50 = vor.u32 1.1754944e-38, %v3102_v18  ;;  %vm3101_vm9 = vcmp.eq.f32.partialorder %v3100_v52, 8.507059e+37 }
 0x339   : > { %v3149_v37 = vadd.f32 %v3900_v55, %v3133_v42  ;;  %v3079_v49 = vmul.f32 %v3880_v21, %v3078_v47 }
 0x33b   : > { %v3882_v8 = vpop.eup %3881  ;;  %3165 = vst [vmem:[%s6058_s20 + $0x60] sm:$0xff] %v3149_v37  ;;  %v3080_v51 = vadd.f32 %v3880_v21, %v3079_v49 }
 0x33c   : > { %v3884_v60 = vpop.eup %3883  ;;  %v2880_v3 = vadd.f32 1.0, %v3882_v8 }
 0x33d   : > { %v3084_v54 = vsel %vm3083_vm5, %v3880_v21, %v3080_v51  ;;  %v3092_v33 = vmul.f32 %v3884_v60, %v2879_v45  ;;  %vm3097_vm8 = vweird.f32 %v3884_v60 }
 0x33e   : > { %v3089_v28 = vsel %vm3086_vm6, %v3088_v20, %v3084_v54  ;;  %3885 = vrcp.f32 %v2880_v3  ;;  %vm3098_vm12 = vmor %vm3096_vm2, %vm3097_vm8  ;;  %v3117_v29 = vand.u32 2147483648, %v2880_v3  ;;  %v3115_v41 = vand.u32 2147483647, %v2880_v3 }
 0x33f   : > { %v3134_v31 = vmul.f32 %v3089_v28, %v6193_v34  ;;  %v3093_v22 = vsub.f32 1.0, %v3092_v33  ;;  %vm3111_vm10 = vweird.f32 %v2880_v3 }
 0x340   : > { %vm3116_vm4 = vcmp.eq.f32.partialorder %v3115_v41, 8.507059e+37 }
 0x341   : > { %v3150_v32 = vadd.f32 %v3901_v13, %v3134_v31  ;;  %v3094_v9 = vmul.f32 %v3884_v60, %v3093_v22 }
 0x343   : > { %3166 = vst [vmem:[%s6058_s20 + $0x68] sm:$0xff] %v3150_v32  ;;  %v3095_v1 = vadd.f32 %v3884_v60, %v3094_v9 }
 0x344   : > { %v3886_v56 = vpop.eup %3885 }
 0x345   : > { %v3099_v44 = vsel %vm3098_vm12, %v3884_v60, %v3095_v1  ;;  %v3107_v34 = vmul.f32 %v3886_v56, %v2880_v3  ;;  %vm3112_vm7 = vweird.f32 %v3886_v56 }
 0x346   : > { %v3104_v61 = vsel %vm3101_vm9, %v3103_v50, %v3099_v44  ;;  %vm3113_vm3 = vmor %vm3111_vm10, %vm3112_vm7 }
 0x347   : > { %v3135_v48 = vmul.f32 %v3104_v61, %v6204_v6  ;;  %v3108_v12 = vsub.f32 1.0, %v3107_v34  ;;  %v3118_v6 = vor.u32 1.1754944e-38, %v3117_v29 }
 0x349   : > { %v3151_v43 = vadd.f32 %v3902_v25, %v3135_v48  ;;  %v3109_v14 = vmul.f32 %v3886_v56, %v3108_v12 }
 0x34b   : > { %3167 = vst [vmem:[%s6058_s20 + $0x70] sm:$0xff] %v3151_v43  ;;  %v3110_v0 = vadd.f32 %v3886_v56, %v3109_v14 }
 0x34d   : > { %v3114_v5 = vsel %vm3113_vm3, %v3886_v56, %v3110_v0 }
 0x34e   : > { %v3119_v57 = vsel %vm3116_vm4, %v3118_v6, %v3114_v5 }
 0x34f   : > { %v3136_v15 = vmul.f32 %v3119_v57, %v6211_v10 }
 0x351   : > { %v3152_v11 = vadd.f32 %v3903_v7, %v3136_v15 }
 0x353   : > { %3168 = vst [vmem:[%s6058_s20 + $0x78] sm:$0xff] %v3152_v11 }
 0x354   : > { %4081 = shalt.err (!%p4078_p10)
}
 0x355   : > { %s4218_s27 = smov 128   ;;  %s4219_s21 = smov 8  }
 0x356   : > { %3578 = dma.vmem_to_hbm [thread:$0]  (%p4455_p5), %s3186_s15, 2048, %s3188_s9, %s3170_s18, %s4218_s27, %s4218_s27, %s4219_s21  }
 0x357 PF: > { %p3622_p12 = scmp.ge.s32.totalorder %s4212_s14, 2  ;;  %s3202_s20 = sand.u32 1, %s4184_s30  }
 0x358   : > { %s3203_s1 = scalar_lea.sflag [#allocation6], %s3202_s20 }
 0x359   : > { %p3598_p7 = pnand %p3622_p12, %p4459_p11 }
 0x35b   : > { %p3599_p6 = pneg %p3598_p7 }
 0x35d   : > { %4155 = dma.done.wait (%p3599_p6), %s3203_s1, 2048  }
 0x35e   : > { %4157 = vsyncadd (%p3599_p6), %s3203_s1, 4294965248  ;;  %s27_s14 = sadd.s32 1, %s4212_s14   ;;  %s6566_s27 = sld [smem:[#allocation19_spill]] }
 0x35f   : > { %p6249_p1 = scmp.ge.s32.totalorder %s27_s14, 6   ;;  %s6567_s28 = sld [smem:[#allocation20_spill]] }
 0x360   : > { %s6568_s29 = sld [smem:[#allocation30_spill]]  ;;  %s6575_s24 = smov %s4164_s25 }
 0x361   : > { %s6569_s6 = sld [smem:[#allocation21_spill]]  ;;  %s6576_s25 = smov %s4168_s26 }
 0x362   : > { %s6570_s9 = sld [smem:[#allocation31_spill]]  ;;  %s6577_s26 = smov %s4502_s0 }
 0x363   : > { %s6571_s10 = sld [smem:[#allocation24_spill]]  ;;  %s6578_s30 = smov %s4188_s8 }
 0x364   : > { %s6572_s11 = sld [smem:[#allocation25_spill]]  ;;  %26 = sbr.rel (!%p6249_p1) target bundleno = 22 (0x16), region = 125 }
 0x365   : > { %s6573_s12 = sld [smem:[#allocation27_spill]] }
 0x366   : > { %s6574_s13 = sld [smem:[#allocation28_spill]] }
 0x367   : > { %s6579_s8 = smov %s6569_s6 }
 0x369   :  { %3209 = vsyncpa [#allocation5], 1 }
 0x36a   :  { %3211 = vsyncpa [#allocation5 + $0x1], 1 }
 0x36b   :  { %3212 = vsyncpa [#allocation8], 1 }
 0x36c   :  { %3214 = vsyncpa [#allocation8 + $0x1], 1 }
 0x36d   :  { %3215 = vsyncpa [#allocation11], 1 }
 0x36e   :  { %3216 = vsyncpa [#allocation6], 1 }
 0x36f   :  { %3218 = vsyncpa [#allocation6 + $0x1], 1 }

</bundles_post_ra>
